<compile_context>
chip_gen: v7x
topology: tpu7x:2x2x1
jax: 0.10.0
libtpu: 0.0.40
codegen_flags: <defaults>
</compile_context>

<pallas_src>
import functools
import math

import numpy as np
import jax
import jax.numpy as jnp
from jax.experimental import pallas as pl
from jax.experimental.pallas import tpu as pltpu


def hetgat_kernel(h_ref, wb_ref, mk_ref, out_ref, *, T, A, O, BT, D, C, PACK):
    """One batch tile (BT rows) of the HetGAT forward."""
    N = 1 + A + O
    TC = T * C
    TT = T * T

    # --- single fused MXU matmul: all projections + all attention-logit terms
    h2 = h_ref[...].reshape(N * BT, D)                       # free leading merge
    proj = jnp.dot(h2, wb_ref[...],
                   preferred_element_type=jnp.float32)       # (N*BT, TC+T+TT)
    proj = proj.reshape(N, BT, TC + T + TT)                  # free leading split

    p_self = proj[0]                                         # (BT, TC+T+TT)
    mpk = mk_ref[...].astype(jnp.float32)                    # (BT, N*T) in {0,1}

    # --- shared "self" softmax factor: pu[b,i] = sum_m exp(u[b,m,i] - mu[b])
    # (mu + per-branch mv >= true joint max, so only benign underflow can occur)
    eu_cols = p_self[:, TC + T:TC + T + TT]                  # (BT, TT), col m*T+i
    mu = jnp.max(eu_cols, axis=-1, keepdims=True)
    eu = jnp.exp(eu_cols - mu)
    pu = eu[:, 0:T]
    for m in range(1, T):
        pu = pu + eu[:, m * T:(m + 1) * T]                   # contiguous T-lane groups

    def branch(node0, n):
        # One attention branch (ally or opp), unrolled over its n nodes.
        ps, msks, vs = [], [], []
        for k in range(n):
            p_k = proj[node0 + k]                            # (BT, TC+T+TT)
            mk = mpk[:, (node0 + k) * T:(node0 + k + 1) * T]  # (BT, T)
            ps.append(p_k)
            msks.append(mk)
            vs.append(p_k[:, TC:TC + T] - 1e6 * mk)          # additive mask bias
        mv = jnp.max(vs[0], axis=-1, keepdims=True)
        for k in range(1, n):
            mv = jnp.maximum(mv, jnp.max(vs[k], axis=-1, keepdims=True))
        ees = [jnp.exp(v - mv) for v in vs]
        sum_ee = ees[0]
        for k in range(1, n):
            sum_ee = sum_ee + ees[k]
        # softmax denominator over the whole (m, i, k) axis (masked terms ~ 0)
        z = jnp.sum(pu * sum_ee, axis=-1, keepdims=True)     # (BT, 1)
        ws = jnp.zeros((BT, C), jnp.float32)
        for k in range(n):
            pg = pu * ees[k] * (1.0 - msks[k])               # hoisted out of i-loop
            for i in range(T):
                ws = ws + pg[:, i:i + 1] * ps[k][:, i * C:(i + 1) * C]
        return ws * pl.reciprocal(z, approx=True)            # (BT, C)

    ally_ws = branch(1, A)
    opp_ws = branch(1 + A, O)

    # --- masked self sum (multiplicative {0,1} factor, as in the reference) --
    self_sum = mpk[:, 0:1] * p_self[:, 0:C]
    for m in range(1, T):
        self_sum = self_sum + mpk[:, m:m + 1] * p_self[:, m * C:(m + 1) * C]

    x = self_sum + ally_ws + opp_ws
    # ELU(alpha=1).  expm1-accurate tail (series for |x| <= 1e-3) without
    # depending on a lax.expm1 Mosaic lowering.
    xn = jnp.minimum(x, 0.0)
    em1 = jnp.where(xn < -1e-3,
                    jnp.exp(xn) - 1.0,
                    xn * (1.0 + xn * (0.5 + xn * (1.0 / 6.0))))
    x = jnp.where(x > 0.0, x, em1)

    if PACK == 1:
        out_ref[...] = x
    else:
        # Lane-dense output block: PACK batch rows per 128-lane output row.
        q = BT // PACK
        for j in range(PACK):
            out_ref[:, j * C:(j + 1) * C] = x[j * q:(j + 1) * q, :]


def _choose_batch_tile(B, cap):
    """Largest multiple of 32 dividing B, <= cap, keeping grid >= 2 when possible."""
    target = B if B < 64 else min(cap, B // 2)
    bt = 32
    for cand in range(32, target + 1, 32):
        if B % cand == 0:
            bt = cand
    return bt


def hetgat_forward(h, W, a, ALL_TYPE_MASK, num_ally, num_opp, hidden_dim,
                   batch_tile=1024):
    """Pallas TPU equivalent of HetGAT.forward(h, num_ally, num_opp, ALL_TYPE_MASK)."""
    T, D, C = W.shape
    B, N, _ = h.shape
    A, O = num_ally, num_opp
    assert N == 1 + A + O and C == hidden_dim
    assert T == ALL_TYPE_MASK.shape[0] and tuple(ALL_TYPE_MASK.shape[1:]) == (B, N)
    # TODO(synk): pad the batch to a multiple of 32 for ragged batch sizes.
    assert B % 32 == 0, "wrapper assumes the batch is a multiple of 32"

    W = W.astype(jnp.float32)
    a = a.astype(jnp.float32)
    a_self = a[:, :C, 0]                                     # (T, C)
    a_oth = a[:, C:, 0]                                      # (T, C)

    # Fused weight matrix (built in f32, stored bf16):
    #   [0 : T*C)          col t*C+c -> W[t][:, c]               (projections)
    #   [T*C : T*C+T)      col i     -> W[i] @ a_oth[i]          ("other" logit)
    #   [T*C+T : +T*T)     col m*T+i -> W[m] @ a_self[i]         ("self" logit)
    W_cat = jnp.transpose(W, (1, 0, 2)).reshape(D, T * C)
    Wa_o = jnp.einsum('tdc,tc->dt', W, a_oth)
    Wa_s = jnp.einsum('mdc,ic->dmi', W, a_self).reshape(D, T * T)
    W_big = jnp.concatenate([W_cat, Wa_o, Wa_s], axis=1).astype(jnp.bfloat16)
    WBN = T * C + T + T * T

    # Node-major, bf16 activations (free proj slicing in-kernel, half the DMA).
    h_nm = jnp.transpose(h.astype(jnp.bfloat16), (1, 0, 2))  # (N, B, D)

    # Single lane-packed mask: mask_pack[b, node*T + t] = ALL_TYPE_MASK[t, b, node].
    mask_pack = jnp.transpose(ALL_TYPE_MASK.astype(jnp.bfloat16),
                              (1, 2, 0)).reshape(B, N * T)   # (B, N*T)

    BT = _choose_batch_tile(B, batch_tile)
    G = B // BT

    # Lane-dense output packing factor (4 when C == 32).
    PACK = 128 // C if (C < 128 and 128 % C == 0 and BT % ((128 // C) * 8) == 0) else 1
    if PACK > 1:
        out_shape = jax.ShapeDtypeStruct((B // PACK, C * PACK), jnp.float32)
        out_spec = pl.BlockSpec((BT // PACK, C * PACK), lambda b: (b, 0))
    else:
        out_shape = jax.ShapeDtypeStruct((B, C), jnp.float32)
        out_spec = pl.BlockSpec((BT, C), lambda b: (b, 0))

    kernel = functools.partial(hetgat_kernel, T=T, A=A, O=O, BT=BT, D=D, C=C,
                               PACK=PACK)
    cost = pl.CostEstimate(
        flops=2 * B * N * D * WBN + 6 * B * (A + O) * T * C,
        transcendentals=B * (T * T + (A + O) * T),
        bytes_accessed=int(h_nm.size * 2 + mask_pack.size * 2
                           + W_big.size * 2 + B * C * 4))

    out = pl.pallas_call(
        kernel,
        out_shape=out_shape,
        grid=(G,),
        in_specs=[
            pl.BlockSpec((N, BT, D), lambda b: (0, b, 0)),    # h, node-major bf16
            pl.BlockSpec((D, WBN), lambda b: (0, 0)),         # fused weights (replicated)
            pl.BlockSpec((BT, N * T), lambda b: (b, 0)),      # packed bf16 masks
        ],
        out_specs=out_spec,
        compiler_params=pltpu.CompilerParams(
            dimension_semantics=("parallel",),
            vmem_limit_bytes=48 * 1024 * 1024),
        cost_estimate=cost,
    )(h_nm, W_big, mask_pack)

    if PACK > 1:
        q = BT // PACK
        out = out.reshape(G, q, PACK, C).transpose(0, 2, 1, 3).reshape(B, C)
    return out


def hetgat_ref_numpy(h, W, a, mask, num_ally, num_opp, hidden_dim):
    """Literal numpy (float64) translation of the PyTorch forward."""
    h = np.asarray(h, np.float64)
    W = np.asarray(W, np.float64)
    a = np.asarray(a, np.float64)
    mask = np.asarray(mask, bool)
    T = W.shape[0]
    B = h.shape[0]
    C = hidden_dim

    mask_self = mask[:, :, 0:1]
    mask_ally = mask[:, :, 1:1 + num_ally]
    mask_opp = mask[:, :, 1 + num_ally:]
    h_self = h[:, 0:1, :]
    h_ally = h[:, 1:1 + num_ally, :]
    h_opp = h[:, 1 + num_ally:, :]

    MASK_ALLY = np.broadcast_to(mask_ally[None], (T, T, B, num_ally)) \
        .transpose(2, 0, 1, 3).reshape(B, T * T * num_ally)
    MASK_OPP = np.broadcast_to(mask_opp[None], (T, T, B, num_opp)) \
        .transpose(2, 0, 1, 3).reshape(B, T * T * num_opp)

    H_SELF = np.stack([h_self @ W[i] for i in range(T)])    # (T, B, 1, C)
    H_ALLY = np.stack([h_ally @ W[i] for i in range(T)])    # (T, B, A, C)
    H_OPP = np.stack([h_opp @ W[i] for i in range(T)])      # (T, B, O, C)

    copy_times = max(num_ally, num_opp)
    H_SELF_INP = np.tile(H_SELF[:, None], (1, T, 1, copy_times, 1))

    def softmax(x):
        m = x.max(-1, keepdims=True)
        e = np.exp(x - m)
        return e / e.sum(-1, keepdims=True)

    def branch(H_X, MASK_X, num_x):
        H_X_INP = np.tile(H_X[None], (T, 1, 1, 1, 1))                 # (T,T,B,n,C)
        X_INPUT = np.concatenate([H_SELF_INP[..., :num_x, :], H_X_INP], axis=-1)
        E_X = np.stack([X_INPUT[:, i] @ a[i] for i in range(T)], axis=1)
        E_sq = E_X.transpose(2, 0, 1, 3, 4).reshape(B, T * T * num_x)
        E_sq = np.where(MASK_X, -1e6, E_sq)
        att = softmax(E_sq)
        att = np.where(MASK_X, 0.0, att)
        H_flat = H_X_INP.transpose(2, 0, 1, 3, 4).reshape(B, T * T * num_x, C)
        return np.einsum('bn,bnc->bc', att, H_flat)

    ally_ws = branch(H_ALLY, MASK_ALLY, num_ally)
    opp_ws = branch(H_OPP, MASK_OPP, num_opp)

    mask_self_exp = np.broadcast_to(mask_self[..., None], (T, B, 1, C)).astype(np.float64)
    h_self_sum = (H_SELF * mask_self_exp).sum(0).reshape(B, C)

    x = h_self_sum + ally_ws + opp_ws
    return np.where(x > 0, x, np.expm1(x)).reshape(B, C)


if __name__ == "__main__":
    input_dim, hidden_dim = 32, 32
    num_type, num_ally, num_opp = 3, 4, 3
    B = 64                                    # multiple of 32; grid of 2 at BT=32
    N = 1 + num_ally + num_opp
    neg_slope = 0.2
    gain = math.sqrt(2.0 / (1.0 + neg_slope ** 2))

    key = jax.random.PRNGKey(0)
    kW, ka, kh, kt = jax.random.split(key, 4)

    bound_W = gain * math.sqrt(3.0 / input_dim)
    W = jax.random.uniform(kW, (num_type, input_dim, hidden_dim),
                           jnp.float32, -bound_W, bound_W)
    # Half the kaiming bound keeps attention logits O(5), so the bf16-fed
    # kernel vs. float64 reference comparison has comfortable margin.
    bound_a = 0.5 * gain * math.sqrt(3.0)
    a = jax.random.uniform(ka, (num_type, 2 * hidden_dim, 1),
                           jnp.float32, -bound_a, bound_a)
    h = jax.random.normal(kh, (B, N, input_dim), jnp.float32)

    # Round h / W through bf16 so the float64 reference sees exactly the values
    # the bf16-fed kernel consumes (only the once-rounded folded logit weights
    # and the bf16 MXU pass then differ).
    h = h.astype(jnp.bfloat16).astype(jnp.float32)
    W = W.astype(jnp.bfloat16).astype(jnp.float32)

    ent_type = jax.random.randint(kt, (B, N), 0, num_type)
    # True == masked-out for ally/opp; used as a multiplicative mask for self.
    ALL_TYPE_MASK = ent_type[None, :, :] != jnp.arange(num_type)[:, None, None]

    out = hetgat_forward(h, W, a, ALL_TYPE_MASK, num_ally, num_opp, hidden_dim,
                         batch_tile=32)       # small B: force a 2-step grid
    out = jax.block_until_ready(out)

    ref = hetgat_ref_numpy(np.asarray(h), np.asarray(W), np.asarray(a),
                           np.asarray(ALL_TYPE_MASK), num_ally, num_opp, hidden_dim)
    np.testing.assert_allclose(np.asarray(out), ref, rtol=5e-2, atol=5e-2)
    print("KERNEL_OK")
</pallas_src>

<mosaic_0001>
module attributes {stable_mosaic.version = 11 : i64} {
  func.func @hetgat_kernel(%arg0: i32, %arg1: memref<8x32x32xbf16, #tpu.memory_space<vmem>>, %arg2: memref<32x108xbf16, #tpu.memory_space<vmem>>, %arg3: memref<32x24xbf16, #tpu.memory_space<vmem>>, %arg4: memref<8x128xf32, #tpu.memory_space<vmem>>) attributes {dimension_semantics = [#tpu.dimension_semantics<parallel>], iteration_bounds = array<i64: 2>, scalar_prefetch = 0 : i64, scratch_operands = 0 : i64, tpu.core_type = #tpu.core_type<tc>, window_params = [{transform_indices = @transform_0, window_bounds = array<i64: 8, 32, 32>}, {pipeline_mode = #tpu.pipeline_mode<synchronous>, transform_indices = @transform_1, window_bounds = array<i64: 32, 108>}, {transform_indices = @transform_2, window_bounds = array<i64: 32, 24>}, {transform_indices = @transform_3, window_bounds = array<i64: 8, 128>}]} {
    %c0 = arith.constant 0 : index
    %c0_0 = arith.constant 0 : index
    %c0_1 = arith.constant 0 : index
    %0 = vector.load %arg1[%c0, %c0_0, %c0_1] : memref<8x32x32xbf16, #tpu.memory_space<vmem>>, vector<8x32x32xbf16>
    %1 = vector.shape_cast %0 : vector<8x32x32xbf16> to vector<256x32xbf16>
    %c0_2 = arith.constant 0 : index
    %c0_3 = arith.constant 0 : index
    %2 = vector.load %arg2[%c0_2, %c0_3] : memref<32x108xbf16, #tpu.memory_space<vmem>>, vector<32x108xbf16>
    %cst = arith.constant dense<0.000000e+00> : vector<256x108xf32>
    %3 = tpu.matmul %1, %2, %cst {dimension_numbers = #tpu.dot_dimension_numbers<[1], [0], [0], [1], [0, 0, 1, 1], [], []>} : vector<256x32xbf16>, vector<32x108xbf16>, vector<256x108xf32> -> vector<256x108xf32>
    %4 = vector.shape_cast %3 : vector<256x108xf32> to vector<8x32x108xf32>
    %5 = vector.extract_strided_slice %4 {offsets = [0, 0, 0], sizes = [1, 32, 108], strides = [1, 1, 1]} : vector<8x32x108xf32> to vector<1x32x108xf32>
    %6 = vector.shape_cast %5 : vector<1x32x108xf32> to vector<32x108xf32>
    %c0_4 = arith.constant 0 : index
    %c0_5 = arith.constant 0 : index
    %7 = vector.load %arg3[%c0_4, %c0_5] : memref<32x24xbf16, #tpu.memory_space<vmem>>, vector<32x24xbf16>
    %8 = arith.extf %7 : vector<32x24xbf16> to vector<32x24xf32>
    %9 = vector.extract_strided_slice %6 {offsets = [0, 99], sizes = [32, 9], strides = [1, 1]} : vector<32x108xf32> to vector<32x9xf32>
    %cst_6 = arith.constant dense<0xFF800000> : vector<32xf32>
    %10 = vector.multi_reduction <maximumf>, %9, %cst_6 [1] : vector<32x9xf32> to vector<32xf32>
    %11 = vector.shape_cast %10 : vector<32xf32> to vector<32x1xf32>
    %12 = vector.broadcast %11 : vector<32x1xf32> to vector<32x9xf32>
    %13 = arith.subf %9, %12 : vector<32x9xf32>
    %14 = math.exp %13 : vector<32x9xf32>
    %15 = vector.extract_strided_slice %14 {offsets = [0, 0], sizes = [32, 3], strides = [1, 1]} : vector<32x9xf32> to vector<32x3xf32>
    %16 = vector.extract_strided_slice %14 {offsets = [0, 3], sizes = [32, 3], strides = [1, 1]} : vector<32x9xf32> to vector<32x3xf32>
    %17 = arith.addf %15, %16 : vector<32x3xf32>
    %18 = vector.extract_strided_slice %14 {offsets = [0, 6], sizes = [32, 3], strides = [1, 1]} : vector<32x9xf32> to vector<32x3xf32>
    %19 = arith.addf %17, %18 : vector<32x3xf32>
    %20 = vector.extract_strided_slice %4 {offsets = [1, 0, 0], sizes = [1, 32, 108], strides = [1, 1, 1]} : vector<8x32x108xf32> to vector<1x32x108xf32>
    %21 = vector.shape_cast %20 : vector<1x32x108xf32> to vector<32x108xf32>
    %22 = vector.extract_strided_slice %8 {offsets = [0, 3], sizes = [32, 3], strides = [1, 1]} : vector<32x24xf32> to vector<32x3xf32>
    %23 = vector.extract_strided_slice %21 {offsets = [0, 96], sizes = [32, 3], strides = [1, 1]} : vector<32x108xf32> to vector<32x3xf32>
    %cst_7 = arith.constant 1.000000e+06 : f32
    %24 = vector.broadcast %cst_7 : f32 to vector<32x3xf32>
    %25 = arith.mulf %24, %22 : vector<32x3xf32>
    %26 = arith.subf %23, %25 : vector<32x3xf32>
    %27 = vector.extract_strided_slice %4 {offsets = [2, 0, 0], sizes = [1, 32, 108], strides = [1, 1, 1]} : vector<8x32x108xf32> to vector<1x32x108xf32>
    %28 = vector.shape_cast %27 : vector<1x32x108xf32> to vector<32x108xf32>
    %29 = vector.extract_strided_slice %8 {offsets = [0, 6], sizes = [32, 3], strides = [1, 1]} : vector<32x24xf32> to vector<32x3xf32>
    %30 = vector.extract_strided_slice %28 {offsets = [0, 96], sizes = [32, 3], strides = [1, 1]} : vector<32x108xf32> to vector<32x3xf32>
    %cst_8 = arith.constant 1.000000e+06 : f32
    %31 = vector.broadcast %cst_8 : f32 to vector<32x3xf32>
    %32 = arith.mulf %31, %29 : vector<32x3xf32>
    %33 = arith.subf %30, %32 : vector<32x3xf32>
    %34 = vector.extract_strided_slice %4 {offsets = [3, 0, 0], sizes = [1, 32, 108], strides = [1, 1, 1]} : vector<8x32x108xf32> to vector<1x32x108xf32>
    %35 = vector.shape_cast %34 : vector<1x32x108xf32> to vector<32x108xf32>
    %36 = vector.extract_strided_slice %8 {offsets = [0, 9], sizes = [32, 3], strides = [1, 1]} : vector<32x24xf32> to vector<32x3xf32>
    %37 = vector.extract_strided_slice %35 {offsets = [0, 96], sizes = [32, 3], strides = [1, 1]} : vector<32x108xf32> to vector<32x3xf32>
    %cst_9 = arith.constant 1.000000e+06 : f32
    %38 = vector.broadcast %cst_9 : f32 to vector<32x3xf32>
    %39 = arith.mulf %38, %36 : vector<32x3xf32>
    %40 = arith.subf %37, %39 : vector<32x3xf32>
    %41 = vector.extract_strided_slice %4 {offsets = [4, 0, 0], sizes = [1, 32, 108], strides = [1, 1, 1]} : vector<8x32x108xf32> to vector<1x32x108xf32>
    %42 = vector.shape_cast %41 : vector<1x32x108xf32> to vector<32x108xf32>
    %43 = vector.extract_strided_slice %8 {offsets = [0, 12], sizes = [32, 3], strides = [1, 1]} : vector<32x24xf32> to vector<32x3xf32>
    %44 = vector.extract_strided_slice %42 {offsets = [0, 96], sizes = [32, 3], strides = [1, 1]} : vector<32x108xf32> to vector<32x3xf32>
    %cst_10 = arith.constant 1.000000e+06 : f32
    %45 = vector.broadcast %cst_10 : f32 to vector<32x3xf32>
    %46 = arith.mulf %45, %43 : vector<32x3xf32>
    %47 = arith.subf %44, %46 : vector<32x3xf32>
    %cst_11 = arith.constant dense<0xFF800000> : vector<32xf32>
    %48 = vector.multi_reduction <maximumf>, %26, %cst_11 [1] : vector<32x3xf32> to vector<32xf32>
    %49 = vector.shape_cast %48 : vector<32xf32> to vector<32x1xf32>
    %cst_12 = arith.constant dense<0xFF800000> : vector<32xf32>
    %50 = vector.multi_reduction <maximumf>, %33, %cst_12 [1] : vector<32x3xf32> to vector<32xf32>
    %51 = vector.shape_cast %50 : vector<32xf32> to vector<32x1xf32>
    %52 = arith.maximumf %49, %51 : vector<32x1xf32>
    %cst_13 = arith.constant dense<0xFF800000> : vector<32xf32>
    %53 = vector.multi_reduction <maximumf>, %40, %cst_13 [1] : vector<32x3xf32> to vector<32xf32>
    %54 = vector.shape_cast %53 : vector<32xf32> to vector<32x1xf32>
    %55 = arith.maximumf %52, %54 : vector<32x1xf32>
    %cst_14 = arith.constant dense<0xFF800000> : vector<32xf32>
    %56 = vector.multi_reduction <maximumf>, %47, %cst_14 [1] : vector<32x3xf32> to vector<32xf32>
    %57 = vector.shape_cast %56 : vector<32xf32> to vector<32x1xf32>
    %58 = arith.maximumf %55, %57 : vector<32x1xf32>
    %59 = vector.broadcast %58 : vector<32x1xf32> to vector<32x3xf32>
    %60 = arith.subf %26, %59 : vector<32x3xf32>
    %61 = math.exp %60 : vector<32x3xf32>
    %62 = vector.broadcast %58 : vector<32x1xf32> to vector<32x3xf32>
    %63 = arith.subf %33, %62 : vector<32x3xf32>
    %64 = math.exp %63 : vector<32x3xf32>
    %65 = vector.broadcast %58 : vector<32x1xf32> to vector<32x3xf32>
    %66 = arith.subf %40, %65 : vector<32x3xf32>
    %67 = math.exp %66 : vector<32x3xf32>
    %68 = vector.broadcast %58 : vector<32x1xf32> to vector<32x3xf32>
    %69 = arith.subf %47, %68 : vector<32x3xf32>
    %70 = math.exp %69 : vector<32x3xf32>
    %71 = arith.addf %61, %64 : vector<32x3xf32>
    %72 = arith.addf %71, %67 : vector<32x3xf32>
    %73 = arith.addf %72, %70 : vector<32x3xf32>
    %74 = arith.mulf %19, %73 : vector<32x3xf32>
    %cst_15 = arith.constant dense<0.000000e+00> : vector<32xf32>
    %75 = vector.multi_reduction <add>, %74, %cst_15 [1] : vector<32x3xf32> to vector<32xf32>
    %76 = vector.shape_cast %75 : vector<32xf32> to vector<32x1xf32>
    %cst_16 = arith.constant 0.000000e+00 : f32
    %77 = vector.broadcast %cst_16 : f32 to vector<32x32xf32>
    %78 = arith.mulf %19, %61 : vector<32x3xf32>
    %cst_17 = arith.constant 1.000000e+00 : f32
    %79 = vector.broadcast %cst_17 : f32 to vector<32x3xf32>
    %80 = arith.subf %79, %22 : vector<32x3xf32>
    %81 = arith.mulf %78, %80 : vector<32x3xf32>
    %82 = vector.extract_strided_slice %81 {offsets = [0, 0], sizes = [32, 1], strides = [1, 1]} : vector<32x3xf32> to vector<32x1xf32>
    %83 = vector.extract_strided_slice %21 {offsets = [0, 0], sizes = [32, 32], strides = [1, 1]} : vector<32x108xf32> to vector<32x32xf32>
    %84 = vector.broadcast %82 : vector<32x1xf32> to vector<32x32xf32>
    %85 = arith.mulf %84, %83 : vector<32x32xf32>
    %86 = arith.addf %77, %85 : vector<32x32xf32>
    %87 = vector.extract_strided_slice %81 {offsets = [0, 1], sizes = [32, 1], strides = [1, 1]} : vector<32x3xf32> to vector<32x1xf32>
    %88 = vector.extract_strided_slice %21 {offsets = [0, 32], sizes = [32, 32], strides = [1, 1]} : vector<32x108xf32> to vector<32x32xf32>
    %89 = vector.broadcast %87 : vector<32x1xf32> to vector<32x32xf32>
    %90 = arith.mulf %89, %88 : vector<32x32xf32>
    %91 = arith.addf %86, %90 : vector<32x32xf32>
    %92 = vector.extract_strided_slice %81 {offsets = [0, 2], sizes = [32, 1], strides = [1, 1]} : vector<32x3xf32> to vector<32x1xf32>
    %93 = vector.extract_strided_slice %21 {offsets = [0, 64], sizes = [32, 32], strides = [1, 1]} : vector<32x108xf32> to vector<32x32xf32>
    %94 = vector.broadcast %92 : vector<32x1xf32> to vector<32x32xf32>
    %95 = arith.mulf %94, %93 : vector<32x32xf32>
    %96 = arith.addf %91, %95 : vector<32x32xf32>
    %97 = arith.mulf %19, %64 : vector<32x3xf32>
    %cst_18 = arith.constant 1.000000e+00 : f32
    %98 = vector.broadcast %cst_18 : f32 to vector<32x3xf32>
    %99 = arith.subf %98, %29 : vector<32x3xf32>
    %100 = arith.mulf %97, %99 : vector<32x3xf32>
    %101 = vector.extract_strided_slice %100 {offsets = [0, 0], sizes = [32, 1], strides = [1, 1]} : vector<32x3xf32> to vector<32x1xf32>
    %102 = vector.extract_strided_slice %28 {offsets = [0, 0], sizes = [32, 32], strides = [1, 1]} : vector<32x108xf32> to vector<32x32xf32>
    %103 = vector.broadcast %101 : vector<32x1xf32> to vector<32x32xf32>
    %104 = arith.mulf %103, %102 : vector<32x32xf32>
    %105 = arith.addf %96, %104 : vector<32x32xf32>
    %106 = vector.extract_strided_slice %100 {offsets = [0, 1], sizes = [32, 1], strides = [1, 1]} : vector<32x3xf32> to vector<32x1xf32>
    %107 = vector.extract_strided_slice %28 {offsets = [0, 32], sizes = [32, 32], strides = [1, 1]} : vector<32x108xf32> to vector<32x32xf32>
    %108 = vector.broadcast %106 : vector<32x1xf32> to vector<32x32xf32>
    %109 = arith.mulf %108, %107 : vector<32x32xf32>
    %110 = arith.addf %105, %109 : vector<32x32xf32>
    %111 = vector.extract_strided_slice %100 {offsets = [0, 2], sizes = [32, 1], strides = [1, 1]} : vector<32x3xf32> to vector<32x1xf32>
    %112 = vector.extract_strided_slice %28 {offsets = [0, 64], sizes = [32, 32], strides = [1, 1]} : vector<32x108xf32> to vector<32x32xf32>
    %113 = vector.broadcast %111 : vector<32x1xf32> to vector<32x32xf32>
    %114 = arith.mulf %113, %112 : vector<32x32xf32>
    %115 = arith.addf %110, %114 : vector<32x32xf32>
    %116 = arith.mulf %19, %67 : vector<32x3xf32>
    %cst_19 = arith.constant 1.000000e+00 : f32
    %117 = vector.broadcast %cst_19 : f32 to vector<32x3xf32>
    %118 = arith.subf %117, %36 : vector<32x3xf32>
    %119 = arith.mulf %116, %118 : vector<32x3xf32>
    %120 = vector.extract_strided_slice %119 {offsets = [0, 0], sizes = [32, 1], strides = [1, 1]} : vector<32x3xf32> to vector<32x1xf32>
    %121 = vector.extract_strided_slice %35 {offsets = [0, 0], sizes = [32, 32], strides = [1, 1]} : vector<32x108xf32> to vector<32x32xf32>
    %122 = vector.broadcast %120 : vector<32x1xf32> to vector<32x32xf32>
    %123 = arith.mulf %122, %121 : vector<32x32xf32>
    %124 = arith.addf %115, %123 : vector<32x32xf32>
    %125 = vector.extract_strided_slice %119 {offsets = [0, 1], sizes = [32, 1], strides = [1, 1]} : vector<32x3xf32> to vector<32x1xf32>
    %126 = vector.extract_strided_slice %35 {offsets = [0, 32], sizes = [32, 32], strides = [1, 1]} : vector<32x108xf32> to vector<32x32xf32>
    %127 = vector.broadcast %125 : vector<32x1xf32> to vector<32x32xf32>
    %128 = arith.mulf %127, %126 : vector<32x32xf32>
    %129 = arith.addf %124, %128 : vector<32x32xf32>
    %130 = vector.extract_strided_slice %119 {offsets = [0, 2], sizes = [32, 1], strides = [1, 1]} : vector<32x3xf32> to vector<32x1xf32>
    %131 = vector.extract_strided_slice %35 {offsets = [0, 64], sizes = [32, 32], strides = [1, 1]} : vector<32x108xf32> to vector<32x32xf32>
    %132 = vector.broadcast %130 : vector<32x1xf32> to vector<32x32xf32>
    %133 = arith.mulf %132, %131 : vector<32x32xf32>
    %134 = arith.addf %129, %133 : vector<32x32xf32>
    %135 = arith.mulf %19, %70 : vector<32x3xf32>
    %cst_20 = arith.constant 1.000000e+00 : f32
    %136 = vector.broadcast %cst_20 : f32 to vector<32x3xf32>
    %137 = arith.subf %136, %43 : vector<32x3xf32>
    %138 = arith.mulf %135, %137 : vector<32x3xf32>
    %139 = vector.extract_strided_slice %138 {offsets = [0, 0], sizes = [32, 1], strides = [1, 1]} : vector<32x3xf32> to vector<32x1xf32>
    %140 = vector.extract_strided_slice %42 {offsets = [0, 0], sizes = [32, 32], strides = [1, 1]} : vector<32x108xf32> to vector<32x32xf32>
    %141 = vector.broadcast %139 : vector<32x1xf32> to vector<32x32xf32>
    %142 = arith.mulf %141, %140 : vector<32x32xf32>
    %143 = arith.addf %134, %142 : vector<32x32xf32>
    %144 = vector.extract_strided_slice %138 {offsets = [0, 1], sizes = [32, 1], strides = [1, 1]} : vector<32x3xf32> to vector<32x1xf32>
    %145 = vector.extract_strided_slice %42 {offsets = [0, 32], sizes = [32, 32], strides = [1, 1]} : vector<32x108xf32> to vector<32x32xf32>
    %146 = vector.broadcast %144 : vector<32x1xf32> to vector<32x32xf32>
    %147 = arith.mulf %146, %145 : vector<32x32xf32>
    %148 = arith.addf %143, %147 : vector<32x32xf32>
    %149 = vector.extract_strided_slice %138 {offsets = [0, 2], sizes = [32, 1], strides = [1, 1]} : vector<32x3xf32> to vector<32x1xf32>
    %150 = vector.extract_strided_slice %42 {offsets = [0, 64], sizes = [32, 32], strides = [1, 1]} : vector<32x108xf32> to vector<32x32xf32>
    %151 = vector.broadcast %149 : vector<32x1xf32> to vector<32x32xf32>
    %152 = arith.mulf %151, %150 : vector<32x32xf32>
    %153 = arith.addf %148, %152 : vector<32x32xf32>
    %154 = tpu.reciprocal %76 {approx = true} : vector<32x1xf32> -> vector<32x1xf32>
    %155 = vector.broadcast %154 : vector<32x1xf32> to vector<32x32xf32>
    %156 = arith.mulf %153, %155 : vector<32x32xf32>
    %157 = vector.extract_strided_slice %4 {offsets = [5, 0, 0], sizes = [1, 32, 108], strides = [1, 1, 1]} : vector<8x32x108xf32> to vector<1x32x108xf32>
    %158 = vector.shape_cast %157 : vector<1x32x108xf32> to vector<32x108xf32>
    %159 = vector.extract_strided_slice %8 {offsets = [0, 15], sizes = [32, 3], strides = [1, 1]} : vector<32x24xf32> to vector<32x3xf32>
    %160 = vector.extract_strided_slice %158 {offsets = [0, 96], sizes = [32, 3], strides = [1, 1]} : vector<32x108xf32> to vector<32x3xf32>
    %cst_21 = arith.constant 1.000000e+06 : f32
    %161 = vector.broadcast %cst_21 : f32 to vector<32x3xf32>
    %162 = arith.mulf %161, %159 : vector<32x3xf32>
    %163 = arith.subf %160, %162 : vector<32x3xf32>
    %164 = vector.extract_strided_slice %4 {offsets = [6, 0, 0], sizes = [1, 32, 108], strides = [1, 1, 1]} : vector<8x32x108xf32> to vector<1x32x108xf32>
    %165 = vector.shape_cast %164 : vector<1x32x108xf32> to vector<32x108xf32>
    %166 = vector.extract_strided_slice %8 {offsets = [0, 18], sizes = [32, 3], strides = [1, 1]} : vector<32x24xf32> to vector<32x3xf32>
    %167 = vector.extract_strided_slice %165 {offsets = [0, 96], sizes = [32, 3], strides = [1, 1]} : vector<32x108xf32> to vector<32x3xf32>
    %cst_22 = arith.constant 1.000000e+06 : f32
    %168 = vector.broadcast %cst_22 : f32 to vector<32x3xf32>
    %169 = arith.mulf %168, %166 : vector<32x3xf32>
    %170 = arith.subf %167, %169 : vector<32x3xf32>
    %171 = vector.extract_strided_slice %4 {offsets = [7, 0, 0], sizes = [1, 32, 108], strides = [1, 1, 1]} : vector<8x32x108xf32> to vector<1x32x108xf32>
    %172 = vector.shape_cast %171 : vector<1x32x108xf32> to vector<32x108xf32>
    %173 = vector.extract_strided_slice %8 {offsets = [0, 21], sizes = [32, 3], strides = [1, 1]} : vector<32x24xf32> to vector<32x3xf32>
    %174 = vector.extract_strided_slice %172 {offsets = [0, 96], sizes = [32, 3], strides = [1, 1]} : vector<32x108xf32> to vector<32x3xf32>
    %cst_23 = arith.constant 1.000000e+06 : f32
    %175 = vector.broadcast %cst_23 : f32 to vector<32x3xf32>
    %176 = arith.mulf %175, %173 : vector<32x3xf32>
    %177 = arith.subf %174, %176 : vector<32x3xf32>
    %cst_24 = arith.constant dense<0xFF800000> : vector<32xf32>
    %178 = vector.multi_reduction <maximumf>, %163, %cst_24 [1] : vector<32x3xf32> to vector<32xf32>
    %179 = vector.shape_cast %178 : vector<32xf32> to vector<32x1xf32>
    %cst_25 = arith.constant dense<0xFF800000> : vector<32xf32>
    %180 = vector.multi_reduction <maximumf>, %170, %cst_25 [1] : vector<32x3xf32> to vector<32xf32>
    %181 = vector.shape_cast %180 : vector<32xf32> to vector<32x1xf32>
    %182 = arith.maximumf %179, %181 : vector<32x1xf32>
    %cst_26 = arith.constant dense<0xFF800000> : vector<32xf32>
    %183 = vector.multi_reduction <maximumf>, %177, %cst_26 [1] : vector<32x3xf32> to vector<32xf32>
    %184 = vector.shape_cast %183 : vector<32xf32> to vector<32x1xf32>
    %185 = arith.maximumf %182, %184 : vector<32x1xf32>
    %186 = vector.broadcast %185 : vector<32x1xf32> to vector<32x3xf32>
    %187 = arith.subf %163, %186 : vector<32x3xf32>
    %188 = math.exp %187 : vector<32x3xf32>
    %189 = vector.broadcast %185 : vector<32x1xf32> to vector<32x3xf32>
    %190 = arith.subf %170, %189 : vector<32x3xf32>
    %191 = math.exp %190 : vector<32x3xf32>
    %192 = vector.broadcast %185 : vector<32x1xf32> to vector<32x3xf32>
    %193 = arith.subf %177, %192 : vector<32x3xf32>
    %194 = math.exp %193 : vector<32x3xf32>
    %195 = arith.addf %188, %191 : vector<32x3xf32>
    %196 = arith.addf %195, %194 : vector<32x3xf32>
    %197 = arith.mulf %19, %196 : vector<32x3xf32>
    %cst_27 = arith.constant dense<0.000000e+00> : vector<32xf32>
    %198 = vector.multi_reduction <add>, %197, %cst_27 [1] : vector<32x3xf32> to vector<32xf32>
    %199 = vector.shape_cast %198 : vector<32xf32> to vector<32x1xf32>
    %cst_28 = arith.constant 0.000000e+00 : f32
    %200 = vector.broadcast %cst_28 : f32 to vector<32x32xf32>
    %201 = arith.mulf %19, %188 : vector<32x3xf32>
    %cst_29 = arith.constant 1.000000e+00 : f32
    %202 = vector.broadcast %cst_29 : f32 to vector<32x3xf32>
    %203 = arith.subf %202, %159 : vector<32x3xf32>
    %204 = arith.mulf %201, %203 : vector<32x3xf32>
    %205 = vector.extract_strided_slice %204 {offsets = [0, 0], sizes = [32, 1], strides = [1, 1]} : vector<32x3xf32> to vector<32x1xf32>
    %206 = vector.extract_strided_slice %158 {offsets = [0, 0], sizes = [32, 32], strides = [1, 1]} : vector<32x108xf32> to vector<32x32xf32>
    %207 = vector.broadcast %205 : vector<32x1xf32> to vector<32x32xf32>
    %208 = arith.mulf %207, %206 : vector<32x32xf32>
    %209 = arith.addf %200, %208 : vector<32x32xf32>
    %210 = vector.extract_strided_slice %204 {offsets = [0, 1], sizes = [32, 1], strides = [1, 1]} : vector<32x3xf32> to vector<32x1xf32>
    %211 = vector.extract_strided_slice %158 {offsets = [0, 32], sizes = [32, 32], strides = [1, 1]} : vector<32x108xf32> to vector<32x32xf32>
    %212 = vector.broadcast %210 : vector<32x1xf32> to vector<32x32xf32>
    %213 = arith.mulf %212, %211 : vector<32x32xf32>
    %214 = arith.addf %209, %213 : vector<32x32xf32>
    %215 = vector.extract_strided_slice %204 {offsets = [0, 2], sizes = [32, 1], strides = [1, 1]} : vector<32x3xf32> to vector<32x1xf32>
    %216 = vector.extract_strided_slice %158 {offsets = [0, 64], sizes = [32, 32], strides = [1, 1]} : vector<32x108xf32> to vector<32x32xf32>
    %217 = vector.broadcast %215 : vector<32x1xf32> to vector<32x32xf32>
    %218 = arith.mulf %217, %216 : vector<32x32xf32>
    %219 = arith.addf %214, %218 : vector<32x32xf32>
    %220 = arith.mulf %19, %191 : vector<32x3xf32>
    %cst_30 = arith.constant 1.000000e+00 : f32
    %221 = vector.broadcast %cst_30 : f32 to vector<32x3xf32>
    %222 = arith.subf %221, %166 : vector<32x3xf32>
    %223 = arith.mulf %220, %222 : vector<32x3xf32>
    %224 = vector.extract_strided_slice %223 {offsets = [0, 0], sizes = [32, 1], strides = [1, 1]} : vector<32x3xf32> to vector<32x1xf32>
    %225 = vector.extract_strided_slice %165 {offsets = [0, 0], sizes = [32, 32], strides = [1, 1]} : vector<32x108xf32> to vector<32x32xf32>
    %226 = vector.broadcast %224 : vector<32x1xf32> to vector<32x32xf32>
    %227 = arith.mulf %226, %225 : vector<32x32xf32>
    %228 = arith.addf %219, %227 : vector<32x32xf32>
    %229 = vector.extract_strided_slice %223 {offsets = [0, 1], sizes = [32, 1], strides = [1, 1]} : vector<32x3xf32> to vector<32x1xf32>
    %230 = vector.extract_strided_slice %165 {offsets = [0, 32], sizes = [32, 32], strides = [1, 1]} : vector<32x108xf32> to vector<32x32xf32>
    %231 = vector.broadcast %229 : vector<32x1xf32> to vector<32x32xf32>
    %232 = arith.mulf %231, %230 : vector<32x32xf32>
    %233 = arith.addf %228, %232 : vector<32x32xf32>
    %234 = vector.extract_strided_slice %223 {offsets = [0, 2], sizes = [32, 1], strides = [1, 1]} : vector<32x3xf32> to vector<32x1xf32>
    %235 = vector.extract_strided_slice %165 {offsets = [0, 64], sizes = [32, 32], strides = [1, 1]} : vector<32x108xf32> to vector<32x32xf32>
    %236 = vector.broadcast %234 : vector<32x1xf32> to vector<32x32xf32>
    %237 = arith.mulf %236, %235 : vector<32x32xf32>
    %238 = arith.addf %233, %237 : vector<32x32xf32>
    %239 = arith.mulf %19, %194 : vector<32x3xf32>
    %cst_31 = arith.constant 1.000000e+00 : f32
    %240 = vector.broadcast %cst_31 : f32 to vector<32x3xf32>
    %241 = arith.subf %240, %173 : vector<32x3xf32>
    %242 = arith.mulf %239, %241 : vector<32x3xf32>
    %243 = vector.extract_strided_slice %242 {offsets = [0, 0], sizes = [32, 1], strides = [1, 1]} : vector<32x3xf32> to vector<32x1xf32>
    %244 = vector.extract_strided_slice %172 {offsets = [0, 0], sizes = [32, 32], strides = [1, 1]} : vector<32x108xf32> to vector<32x32xf32>
    %245 = vector.broadcast %243 : vector<32x1xf32> to vector<32x32xf32>
    %246 = arith.mulf %245, %244 : vector<32x32xf32>
    %247 = arith.addf %238, %246 : vector<32x32xf32>
    %248 = vector.extract_strided_slice %242 {offsets = [0, 1], sizes = [32, 1], strides = [1, 1]} : vector<32x3xf32> to vector<32x1xf32>
    %249 = vector.extract_strided_slice %172 {offsets = [0, 32], sizes = [32, 32], strides = [1, 1]} : vector<32x108xf32> to vector<32x32xf32>
    %250 = vector.broadcast %248 : vector<32x1xf32> to vector<32x32xf32>
    %251 = arith.mulf %250, %249 : vector<32x32xf32>
    %252 = arith.addf %247, %251 : vector<32x32xf32>
    %253 = vector.extract_strided_slice %242 {offsets = [0, 2], sizes = [32, 1], strides = [1, 1]} : vector<32x3xf32> to vector<32x1xf32>
    %254 = vector.extract_strided_slice %172 {offsets = [0, 64], sizes = [32, 32], strides = [1, 1]} : vector<32x108xf32> to vector<32x32xf32>
    %255 = vector.broadcast %253 : vector<32x1xf32> to vector<32x32xf32>
    %256 = arith.mulf %255, %254 : vector<32x32xf32>
    %257 = arith.addf %252, %256 : vector<32x32xf32>
    %258 = tpu.reciprocal %199 {approx = true} : vector<32x1xf32> -> vector<32x1xf32>
    %259 = vector.broadcast %258 : vector<32x1xf32> to vector<32x32xf32>
    %260 = arith.mulf %257, %259 : vector<32x32xf32>
    %261 = vector.extract_strided_slice %8 {offsets = [0, 0], sizes = [32, 1], strides = [1, 1]} : vector<32x24xf32> to vector<32x1xf32>
    %262 = vector.extract_strided_slice %6 {offsets = [0, 0], sizes = [32, 32], strides = [1, 1]} : vector<32x108xf32> to vector<32x32xf32>
    %263 = vector.broadcast %261 : vector<32x1xf32> to vector<32x32xf32>
    %264 = arith.mulf %263, %262 : vector<32x32xf32>
    %265 = vector.extract_strided_slice %8 {offsets = [0, 1], sizes = [32, 1], strides = [1, 1]} : vector<32x24xf32> to vector<32x1xf32>
    %266 = vector.extract_strided_slice %6 {offsets = [0, 32], sizes = [32, 32], strides = [1, 1]} : vector<32x108xf32> to vector<32x32xf32>
    %267 = vector.broadcast %265 : vector<32x1xf32> to vector<32x32xf32>
    %268 = arith.mulf %267, %266 : vector<32x32xf32>
    %269 = arith.addf %264, %268 : vector<32x32xf32>
    %270 = vector.extract_strided_slice %8 {offsets = [0, 2], sizes = [32, 1], strides = [1, 1]} : vector<32x24xf32> to vector<32x1xf32>
    %271 = vector.extract_strided_slice %6 {offsets = [0, 64], sizes = [32, 32], strides = [1, 1]} : vector<32x108xf32> to vector<32x32xf32>
    %272 = vector.broadcast %270 : vector<32x1xf32> to vector<32x32xf32>
    %273 = arith.mulf %272, %271 : vector<32x32xf32>
    %274 = arith.addf %269, %273 : vector<32x32xf32>
    %275 = arith.addf %274, %156 : vector<32x32xf32>
    %276 = arith.addf %275, %260 : vector<32x32xf32>
    %cst_32 = arith.constant 0.000000e+00 : f32
    %277 = vector.broadcast %cst_32 : f32 to vector<32x32xf32>
    %278 = arith.minimumf %276, %277 : vector<32x32xf32>
    %cst_33 = arith.constant -1.000000e-03 : f32
    %279 = vector.broadcast %cst_33 : f32 to vector<32x32xf32>
    %280 = arith.cmpf olt, %278, %279 : vector<32x32xf32>
    %281 = math.exp %278 : vector<32x32xf32>
    %cst_34 = arith.constant 1.000000e+00 : f32
    %282 = vector.broadcast %cst_34 : f32 to vector<32x32xf32>
    %283 = arith.subf %281, %282 : vector<32x32xf32>
    %cst_35 = arith.constant 0.166666672 : f32
    %284 = vector.broadcast %cst_35 : f32 to vector<32x32xf32>
    %285 = arith.mulf %278, %284 : vector<32x32xf32>
    %cst_36 = arith.constant 5.000000e-01 : f32
    %286 = vector.broadcast %cst_36 : f32 to vector<32x32xf32>
    %287 = arith.addf %286, %285 : vector<32x32xf32>
    %288 = arith.mulf %278, %287 : vector<32x32xf32>
    %cst_37 = arith.constant 1.000000e+00 : f32
    %289 = vector.broadcast %cst_37 : f32 to vector<32x32xf32>
    %290 = arith.addf %289, %288 : vector<32x32xf32>
    %291 = arith.mulf %278, %290 : vector<32x32xf32>
    %292 = arith.select %280, %283, %291 : vector<32x32xi1>, vector<32x32xf32>
    %cst_38 = arith.constant 0.000000e+00 : f32
    %293 = vector.broadcast %cst_38 : f32 to vector<32x32xf32>
    %294 = arith.cmpf ogt, %276, %293 : vector<32x32xf32>
    %295 = arith.select %294, %276, %292 : vector<32x32xi1>, vector<32x32xf32>
    %296 = vector.extract_strided_slice %295 {offsets = [0, 0], sizes = [8, 32], strides = [1, 1]} : vector<32x32xf32> to vector<8x32xf32>
    %c0_39 = arith.constant 0 : index
    %c0_40 = arith.constant 0 : index
    %297 = vector.load %arg4[%c0_39, %c0_40] : memref<8x128xf32, #tpu.memory_space<vmem>>, vector<8x32xf32>
    tpu.vector_store %arg4[%c0_39, %c0_40], %296 {strides = array<i32>} : memref<8x128xf32, #tpu.memory_space<vmem>>, vector<8x32xf32>,
    %298 = vector.extract_strided_slice %295 {offsets = [8, 0], sizes = [8, 32], strides = [1, 1]} : vector<32x32xf32> to vector<8x32xf32>
    %c0_41 = arith.constant 0 : index
    %c32 = arith.constant 32 : index
    %299 = vector.load %arg4[%c0_41, %c32] : memref<8x128xf32, #tpu.memory_space<vmem>>, vector<8x32xf32>
    tpu.vector_store %arg4[%c0_41, %c32], %298 {strides = array<i32>} : memref<8x128xf32, #tpu.memory_space<vmem>>, vector<8x32xf32>,
    %300 = vector.extract_strided_slice %295 {offsets = [16, 0], sizes = [8, 32], strides = [1, 1]} : vector<32x32xf32> to vector<8x32xf32>
    %c0_42 = arith.constant 0 : index
    %c64 = arith.constant 64 : index
    %301 = vector.load %arg4[%c0_42, %c64] : memref<8x128xf32, #tpu.memory_space<vmem>>, vector<8x32xf32>
    tpu.vector_store %arg4[%c0_42, %c64], %300 {strides = array<i32>} : memref<8x128xf32, #tpu.memory_space<vmem>>, vector<8x32xf32>,
    %302 = vector.extract_strided_slice %295 {offsets = [24, 0], sizes = [8, 32], strides = [1, 1]} : vector<32x32xf32> to vector<8x32xf32>
    %c0_43 = arith.constant 0 : index
    %c96 = arith.constant 96 : index
    %303 = vector.load %arg4[%c0_43, %c96] : memref<8x128xf32, #tpu.memory_space<vmem>>, vector<8x32xf32>
    tpu.vector_store %arg4[%c0_43, %c96], %302 {strides = array<i32>} : memref<8x128xf32, #tpu.memory_space<vmem>>, vector<8x32xf32>,
    return
  }
  func.func @transform_0(%arg0: i32) -> (i32, i32, i32) {
    %c0_i32 = arith.constant 0 : i32
    %c0_i32_0 = arith.constant 0 : i32
    %c0_i32_1 = arith.constant 0 : i32
    return %c0_i32, %arg0, %c0_i32_0 : i32, i32, i32
  }
  func.func @transform_1(%arg0: i32) -> (i32, i32) {
    %c0_i32 = arith.constant 0 : i32
    %c0_i32_0 = arith.constant 0 : i32
    %c0_i32_1 = arith.constant 0 : i32
    return %c0_i32, %c0_i32_0 : i32, i32
  }
  func.func @transform_2(%arg0: i32) -> (i32, i32) {
    %c0_i32 = arith.constant 0 : i32
    %c0_i32_0 = arith.constant 0 : i32
    return %arg0, %c0_i32 : i32, i32
  }
  func.func @transform_3(%arg0: i32) -> (i32, i32) {
    %c0_i32 = arith.constant 0 : i32
    %c0_i32_0 = arith.constant 0 : i32
    return %arg0, %c0_i32 : i32, i32
  }
}

</mosaic_0001>

<bundles_post_ra>
// kernel: tpu_custom_call.1
= control target key start
LH: loop header
LB: loop body
LE: loop exit
PB: predicated region body
PF: predicated region fallthrough
CT: control target
= control target key end

     0   :  { %8 = vsyncpa [#allocation4], 0  ;;  %s4475_s0 = inlined_call_operand.vmem [shape: bf16[8,64,32], index: 0, kind: input, shape index: {}]   ;;  %s4476_s1 = inlined_call_operand.vmem [shape: bf16[32,108], index: 1, kind: input, shape index: {}]   ;;  %s4477_s2 = inlined_call_operand.vmem [shape: bf16[64,24], index: 2, kind: input, shape index: {}]   ;;  %s4478_s3 = inlined_call_operand.hbm [shape: f32[16,128], index: 3, kind: output, shape index: {}]  }
   0x1   :  { %10 = vsyncpa [#allocation4 + $0x1], 0  ;;  %s2969_s12 = smov 0   ;;  %s2971_s13 = smov 0  }
   0x2   :  { %s2973_s14 = smov 0   ;;  %s2975_s15 = smov 0  }
   0x3 LB: > { %s2990_s16 = sadd.s32 4294967295, %s2926_s15   ;;  %s2498_s17 = sadd.s32 4294967294, %s2926_s15   ;;  %s2926_s15 = sphi %s2975_s15, %s4786_s15   ;;  %s2922_s14 = sphi %s2973_s14, %s4785_s14   ;;  %s2918_s13 = sphi %s2971_s13, %s4784_s13   ;;  %s2914_s12 = sphi %s2969_s12, %s4783_s12  }
   0x4   : > { %s2994_s18 = sadd.s32 1, %s2926_s15   ;;  %s23_s19 = sadd.s32 1, %s2922_s14 }
   0x5   : > { %s20_s20 = ssub.s32 %s2926_s15, %s2994_s18  ;;  %p30_p0 = scmp.ne.s32.totalorder %s2922_s14, %s2918_s13 }
   0x6   : > { %p21_p1 = scmp.eq.s32.totalorder %s20_s20, 0  ;;  %p31_p2 = scmp.eq.s32.totalorder %s2926_s15, 0 }
   0x7   : > { %p107_p3 = scmp.eq.s32.totalorder %s2990_s16, 1  ;;  %p112_p4 = scmp.ne.s32.totalorder %s2918_s13, %s2914_s12 }
   0x8   : > { %s3006_s21 = scalar_select %p21_p1, %s2922_s14, %s23_s19  }
   0x9   : > { %p32_p5 = por %p31_p2, %p30_p0  ;;  %p3008_p6 = por %p107_p3, %p30_p0 }
   0xa   : > { %p113_p7 = scmp.eq.s32.totalorder %s2498_s17, 1  ;;  %p2500_p9 = scmp.ge.s32.totalorder %s2926_s15, 2 }
   0xc   : > { %p3012_p8 = por %p113_p7, %p112_p4  ;;  %132 = sbr.rel (%p2500_p9) target bundleno = 31 (0x1f), region = 20 }
  0x13   : > { %135 = sbr.rel (!%p32_p5) target bundleno = 31 (0x1f), region = 24  ;;  %s137_s24 = sand.u32 (%p32_p5), 1, %s2922_s14  }
  0x14   : > { %s2551_s25 = sshll.u32 (%p32_p5), %s2926_s15, 4  ;;  %s2501_s26 = sshll.u32 (%p32_p5), %s137_s24, 7 }
  0x15   : > { %s3024_s29 = scalar_lea.vmem (%p32_p5), %s4475_s0, %s2551_s25  ;;  %s139_s30 = scalar_lea.vmem (%p32_p5), [#allocation2], %s2501_s26 }
  0x16   : > { %v158_v0 = vld [vmem:[%s3024_s29] sm:$0xff] (%p32_p5)   ;;  %v162_v1 = vld [vmem:[%s3024_s29 + $0x8] sm:$0xff] (%p32_p5)  }
  0x17   : > { %v166_v2 = vld [vmem:[%s3024_s29 + $0x20] sm:$0xff] (%p32_p5)   ;;  %159 = vst [vmem:[%s139_s30] sm:$0xff] (%p32_p5), %v158_v0   ;;  %163 = vst [vmem:[%s139_s30 + $0x8] sm:$0xff] (%p32_p5), %v162_v1   ;;  %v170_v3 = vld [vmem:[%s3024_s29 + $0x28] sm:$0xff] (%p32_p5)  }
  0x18   : > { %167 = vst [vmem:[%s139_s30 + $0x10] sm:$0xff] (%p32_p5), %v166_v2   ;;  %v174_v4 = vld [vmem:[%s3024_s29 + $0x40] sm:$0xff] (%p32_p5)   ;;  %v178_v5 = vld [vmem:[%s3024_s29 + $0x48] sm:$0xff] (%p32_p5)   ;;  %171 = vst [vmem:[%s139_s30 + $0x18] sm:$0xff] (%p32_p5), %v170_v3  }
  0x19   : > { %175 = vst [vmem:[%s139_s30 + $0x20] sm:$0xff] (%p32_p5), %v174_v4   ;;  %179 = vst [vmem:[%s139_s30 + $0x28] sm:$0xff] (%p32_p5), %v178_v5   ;;  %v182_v6 = vld [vmem:[%s3024_s29 + $0x60] sm:$0xff] (%p32_p5)   ;;  %v186_v7 = vld [vmem:[%s3024_s29 + $0x68] sm:$0xff] (%p32_p5)  }
  0x1a   : > { %v190_v8 = vld [vmem:[%s3024_s29 + $0x80] sm:$0xff]   ;;  %183 = vst [vmem:[%s139_s30 + $0x30] sm:$0xff] %v182_v6   ;;  %187 = vst [vmem:[%s139_s30 + $0x38] sm:$0xff] %v186_v7   ;;  %v194_v9 = vld [vmem:[%s3024_s29 + $0x88] sm:$0xff]  }
  0x1b   : > { %191 = vst [vmem:[%s139_s30 + $0x40] sm:$0xff] %v190_v8   ;;  %v198_v10 = vld [vmem:[%s3024_s29 + $0xa0] sm:$0xff]   ;;  %v202_v11 = vld [vmem:[%s3024_s29 + $0xa8] sm:$0xff]   ;;  %195 = vst [vmem:[%s139_s30 + $0x48] sm:$0xff] %v194_v9  }
  0x1c   : > { %199 = vst [vmem:[%s139_s30 + $0x50] sm:$0xff] %v198_v10   ;;  %203 = vst [vmem:[%s139_s30 + $0x58] sm:$0xff] %v202_v11   ;;  %v206_v12 = vld [vmem:[%s3024_s29 + $0xc0] sm:$0xff]   ;;  %v210_v13 = vld [vmem:[%s3024_s29 + $0xc8] sm:$0xff]  }
  0x1d   : > { %v214_v14 = vld [vmem:[%s3024_s29 + $0xe0] sm:$0xff]   ;;  %207 = vst [vmem:[%s139_s30 + $0x60] sm:$0xff] %v206_v12   ;;  %211 = vst [vmem:[%s139_s30 + $0x68] sm:$0xff] %v210_v13   ;;  %v218_v15 = vld [vmem:[%s3024_s29 + $0xe8] sm:$0xff]  }
  0x1e   : > { %215 = vst [vmem:[%s139_s30 + $0x70] sm:$0xff] %v214_v14   ;;  %219 = vst [vmem:[%s139_s30 + $0x78] sm:$0xff] %v218_v15  }
  0x1f PF: > { %p2504_p10 = scmp.ge.s32.totalorder %s2926_s15, 1  ;;  %p316_p11 = scmp.lt.s32.totalorder %s2926_s15, 3 }
  0x21   : > { %p317_p12 = pnand %p2504_p10, %p316_p11 }
  0x23   : > { %320 = sbr.rel (%p317_p12) target bundleno = 1759 (0x6df), region = 69 }
  0x2a   : > { %v2758_v16 = vld [vmem:[%s4476_s1] sm:$0xff]   ;;  %s3048_s6 = sand.u32 1, %s2918_s13   ;;  %v2759_v17 = vld [vmem:[%s4476_s1 + $0x8] sm:$0xff]   ;;  %vm487_vm0 = vcmask 261120   ;;  %s2507_s10 = sshll.u32 %s2990_s16, 2  ;;  %vm705_vm1 = vcmask 884504  }
  0x2b   : > { %s2505_s9 = sshll.u32 %s3048_s6, 7  ;;  %2579 = vmatprep.subr.bf16.mxu0 %v2758_v16  ;;  %2615 = vmatprep.subr.bf16.mxu1 %v2758_v16  ;;  %p353_p13 = scmp.lt.s32.totalorder %s2507_s10, 7  ;;  %vm838_vm2 = vcmask 810752   ;;  %vm995_vm3 = vcmask 23552   ;;  %vm2393_vm12 = vcmask 523520   ;;  %vm2399_vm13 = vcmask 785920  }
  0x2c   : > { %2580 = vmatpush3.bf16.msra.mxu0 %v2758_v16  ;;  %2617 = vmatpush3.bf16.msra.mxu1 %v2758_v16  ;;  %s3055_s11 = scalar_lea.vmem [#allocation2], %s2505_s9  ;;  %s2928_s25 = smov 93   ;;  %vm2405_vm14 = vcmask 1048320  }
  0x2d   : > { %v2760_v18 = vld [vmem:[%s3055_s11] sm:$0xff]   ;;  %2581 = vmatprep.subr.bf16.mxu0 %v2759_v17  ;;  %2616 = vmatprep.subr.bf16.mxu1 %v2759_v17  ;;  %v2762_v20 = vld [vmem:[%s3055_s11 + $0x8] sm:$0xff]   ;;  %v2764_v22 = vld [vmem:[%s3055_s11 + $0x10] sm:$0xff]   ;;  %s4788_s10 = smov (!%p353_p13, %s2507_s10), 7  ;;  %s2929_s26 = smov 90  }
  0x2e   : > { %v2761_v19 = vld [vmem:[%s3055_s11 + $0x40] sm:$0xff]   ;;  %2583 = vmatprep.mubr.msk.bf16.mxu0 %vm487_vm0, %v2760_v18  ;;  %v2763_v21 = vld [vmem:[%s3055_s11 + $0x48] sm:$0xff]   ;;  %v2765_v23 = vld [vmem:[%s3055_s11 + $0x50] sm:$0xff]   ;;  %s2508_s17 = sshll.u32 %s4788_s10, 2  ;;  %s2930_s27 = smov 87  }
  0x2f   : > { %2599 = vmatprep.mubr.msk.bf16.mxu1 %vm487_vm0, %v2761_v19  ;;  %v2766_v24 = vld [vmem:[%s3055_s11 + $0x18] sm:$0xff]   ;;  %v2768_v26 = vld [vmem:[%s3055_s11 + $0x20] sm:$0xff]   ;;  %s356_s24 = scalar_lea.vmem %s4477_s2, %s2508_s17  ;;  %v2770_v34 = vld [vmem:[%s3055_s11 + $0x28] sm:$0xff]   ;;  %s2931_s28 = smov 84  }
  0x30   : > { %2582 = vmatpush3.bf16.msra.mxu0 %v2759_v17  ;;  %2618 = vmatpush3.bf16.msra.mxu1 %v2759_v17  ;;  %v2767_v25 = vld [vmem:[%s3055_s11 + $0x58] sm:$0xff]   ;;  %v2769_v27 = vld [vmem:[%s3055_s11 + $0x60] sm:$0xff]   ;;  %v2560_v29 = vld [vmem:[%s356_s24 + $0x8] sm:$0xff]   ;;  %s2932_s29 = smov 96   ;;  %s2933_s30 = smov 81  }
  0x31   : > { %v2553_v28 = vld [vmem:[%s356_s24] sm:$0xff]   ;;  %v3082_v31 = vunpack.c.h.bf16 %v2560_v29  ;;  %v3086_v33 = vunpack.c.l.bf16 %v2560_v29  ;;  %v2771_v35 = vld [vmem:[%s3055_s11 + $0x68] sm:$0xff]   ;;  %v2772_v38 = vld [vmem:[%s3055_s11 + $0x30] sm:$0xff]   ;;  %s2934_s4 = smov 78   ;;  %s2935_s5 = smov 75  }
  0x32   : > { %v3080_v30 = vunpack.c.h.bf16 %v2553_v28  ;;  %v3084_v32 = vunpack.c.l.bf16 %v2553_v28  ;;  %v2773_v39 = vld [vmem:[%s3055_s11 + $0x70] sm:$0xff]   ;;  %v2774_v42 = vld [vmem:[%s3055_s11 + $0x38] sm:$0xff]   ;;  %s2936_s7 = smov 122   ;;  %s2937_s8 = smov 125  }
  0x33   : > { %2584 = vmatmul.mubr.msk.bf16.vlgmr.msra.gmra.mrb[0].mxu0 %vm487_vm0, %v2762_v20  ;;  %2600 = vmatmul.mubr.msk.bf16.vlgmr.msra.gmra.mrb[0].mxu1 %vm487_vm0, %v2763_v21  ;;  %4581 = vst [vmem:[#allocation7_spill] sm:$0xff] %v3082_v31  ;;  %4583 = vst [vmem:[#allocation9_spill] sm:$0xff] %v3086_v33  ;;  %v769_v40 = vmul.f32 1000000.0, %v3082_v31  ;;  %v768_v41 = vmul.f32 1000000.0, %v3086_v33 }
  0x34   : > { %2587 = vmatprep.mubr.msk.bf16.mxu0 %vm487_vm0, %v2764_v22  ;;  %2603 = vmatprep.mubr.msk.bf16.mxu1 %vm487_vm0, %v2765_v23  ;;  %4580 = vst [vmem:[#allocation6_spill] sm:$0xff] %v3080_v30  ;;  %4582 = vst [vmem:[#allocation8_spill] sm:$0xff] %v3084_v32  ;;  %v3091_v36 = vmul.f32 1000000.0, %v3080_v30  ;;  %v3094_v37 = vmul.f32 1000000.0, %v3084_v32 }
  0x35   : > { %v2775_v43 = vld [vmem:[%s3055_s11 + $0x78] sm:$0xff]   ;;  %v3128_v44 = vsub.f32 1.0, %v3080_v30  ;;  %v3132_v45 = vsub.f32 1.0, %v3084_v32  ;;  %v3137_v46 = vsub.f32 1.0, %v3082_v31  ;;  %v3142_v47 = vsub.f32 1.0, %v3086_v33  ;;  %s2939_s9 = smov 3  }
  0x36   : > { %776 = vrot.lane.b32.xlu1 %v3091_v36, %s2928_s25  ;;  %774 = vrot.lane.b32.xlu0 %v3094_v37, %s2928_s25  ;;  %s2942_s10 = smov 29   ;;  %s2943_s11 = smov 64  }
  0x37   : > { %4584 = vst [vmem:[#allocation10_spill] sm:$0xff] %v3128_v44  ;;  %4585 = vst [vmem:[#allocation11_spill] sm:$0xff] %v3132_v45  ;;  %s2947_s17 = smov 32   ;;  %s2506_s19 = sshll.u32 %s3048_s6, 3 }
  0x38   : > { %4586 = vst [vmem:[#allocation12_spill] sm:$0xff] %v3137_v46  ;;  %4587 = vst [vmem:[#allocation13_spill] sm:$0xff] %v3142_v47  ;;  %s350_s20 = scalar_lea.vmem [#allocation3], %s2506_s19  ;;  %s2548_s24 = sshll.u32 %s2990_s16, 7 }
  0x39   : > { %s2948_s16 = smov [#allocation3]  }
  0x3a   : > { %780 = vrot.lane.b32.xlu1 %v769_v40, %s2928_s25  ;;  %778 = vrot.lane.b32.xlu0 %v768_v41, %s2928_s25 }
  0x3b   : > { %2588 = vmatmul.mubr.msk.bf16.gmra.mrb[4].mxu0 %vm487_vm0, %v2766_v24  ;;  %2604 = vmatmul.mubr.msk.bf16.gmra.mrb[4].mxu1 %vm487_vm0, %v2767_v25 }
  0x3c   : > { %2591 = vmatprep.mubr.msk.bf16.mxu0 %vm487_vm0, %v2768_v26  ;;  %2607 = vmatprep.mubr.msk.bf16.mxu1 %vm487_vm0, %v2769_v27 }
  0x3e   : > { %792 = vrot.lane.b32.xlu1 %v3091_v36, %s2929_s26  ;;  %790 = vrot.lane.b32.xlu0 %v3094_v37, %s2929_s26 }
  0x42   : > { %796 = vrot.lane.b32.xlu1 %v769_v40, %s2929_s26  ;;  %794 = vrot.lane.b32.xlu0 %v768_v41, %s2929_s26 }
  0x43   : > { %2592 = vmatmul.mubr.msk.bf16.gmra.mrb[8].mxu0 %vm487_vm0, %v2770_v34  ;;  %2608 = vmatmul.mubr.msk.bf16.gmra.mrb[8].mxu1 %vm487_vm0, %v2771_v35 }
  0x44   : > { %2595 = vmatprep.mubr.msk.bf16.mxu0 %vm487_vm0, %v2772_v38  ;;  %2611 = vmatprep.mubr.msk.bf16.mxu1 %vm487_vm0, %v2773_v39 }
  0x46   : > { %808 = vrot.lane.b32.xlu1 %v3091_v36, %s2930_s27  ;;  %806 = vrot.lane.b32.xlu0 %v3094_v37, %s2930_s27 }
  0x4a   : > { %812 = vrot.lane.b32.xlu1 %v769_v40, %s2930_s27  ;;  %810 = vrot.lane.b32.xlu0 %v768_v41, %s2930_s27 }
  0x4b   : > { %2596 = vmatmul.mubr.msk.bf16.gmra.mrb[12].mxu0 %vm487_vm0, %v2774_v42  ;;  %2612 = vmatmul.mubr.msk.bf16.gmra.mrb[12].mxu1 %vm487_vm0, %v2775_v43 }
  0x4e   : > { %824 = vrot.lane.b32.xlu1 %v3091_v36, %s2931_s28  ;;  %822 = vrot.lane.b32.xlu0 %v3094_v37, %s2931_s28 }
  0x52   : > { %828 = vrot.lane.b32.xlu1 %v769_v40, %s2931_s28  ;;  %826 = vrot.lane.b32.xlu0 %v768_v41, %s2931_s28 }
  0x56   : > { %1038 = vrot.lane.b32.xlu1 %v3128_v44, %s2932_s29  ;;  %1036 = vrot.lane.b32.xlu0 %v3132_v45, %s2932_s29 }
  0x5a   : > { %1042 = vrot.lane.b32.xlu1 %v3137_v46, %s2932_s29  ;;  %1040 = vrot.lane.b32.xlu0 %v3142_v47, %s2932_s29 }
  0x5e   : > { %1180 = vrot.lane.b32.xlu1 %v3132_v45, %s2928_s25  ;;  %1182 = vrot.lane.b32.xlu0 %v3128_v44, %s2928_s25 }
  0x62   : > { %1184 = vrot.lane.b32.xlu1 %v3142_v47, %s2928_s25  ;;  %1186 = vrot.lane.b32.xlu0 %v3137_v46, %s2928_s25  ;;  %s2421_s25 = sshll.u32 %s350_s20, 4  ;;  %s4433_s25 = int_to_ptr.vmem [resolvable:$true] %s2421_s25 }
  0x66   : > { %1326 = vrot.lane.b32.xlu1 %v3128_v44, %s2929_s26  ;;  %1324 = vrot.lane.b32.xlu0 %v3132_v45, %s2929_s26 }
  0x6a   : > { %1330 = vrot.lane.b32.xlu1 %v3137_v46, %s2929_s26  ;;  %1328 = vrot.lane.b32.xlu0 %v3142_v47, %s2929_s26 }
  0x6e   : > { %1468 = vrot.lane.b32.xlu1 %v3132_v45, %s2930_s27  ;;  %1470 = vrot.lane.b32.xlu0 %v3128_v44, %s2930_s27 }
  0x72   : > { %1472 = vrot.lane.b32.xlu1 %v3142_v47, %s2930_s27  ;;  %1474 = vrot.lane.b32.xlu0 %v3137_v46, %s2930_s27 }
  0x76   : > { %1602 = vrot.lane.b32.xlu1 %v3091_v36, %s2933_s30  ;;  %1618 = vrot.lane.b32.xlu0 %v3091_v36, %s2934_s4 }
  0x7a   : > { %1604 = vrot.lane.b32.xlu1 %v768_v41, %s2933_s30  ;;  %1620 = vrot.lane.b32.xlu0 %v768_v41, %s2934_s4 }
  0x7e   : > { %1606 = vrot.lane.b32.xlu1 %v769_v40, %s2933_s30  ;;  %1622 = vrot.lane.b32.xlu0 %v769_v40, %s2934_s4 }
  0x82   : > { %1634 = vrot.lane.b32.xlu1 %v3091_v36, %s2935_s5  ;;  %1636 = vrot.lane.b32.xlu0 %v768_v41, %s2935_s5 }
  0x86   : > { %1638 = vrot.lane.b32.xlu1 %v769_v40, %s2935_s5  ;;  %1616 = vrot.lane.b32.xlu0 %v3094_v37, %s2934_s4 }
  0x8a   : > { %1600 = vrot.lane.b32.xlu1 %v3094_v37, %s2933_s30  ;;  %1804 = vrot.lane.b32.xlu0 %v3132_v45, %s2931_s28 }
  0x8e   : > { %1632 = vrot.lane.b32.xlu1 %v3094_v37, %s2935_s5  ;;  %1808 = vrot.lane.b32.xlu0 %v3142_v47, %s2931_s28 }
  0x92   : > { %1806 = vrot.lane.b32.xlu1 %v3128_v44, %s2931_s28  ;;  %1950 = vrot.lane.b32.xlu0 %v3128_v44, %s2933_s30 }
  0x96   : > { %1810 = vrot.lane.b32.xlu1 %v3137_v46, %s2931_s28  ;;  %1954 = vrot.lane.b32.xlu0 %v3137_v46, %s2933_s30  ;;  %s4431_s28 = scalar_lea.hbm %s4478_s3, %s2548_s24 }
  0x9a   : > { %1952 = vrot.lane.b32.xlu1 %v3142_v47, %s2933_s30 }
  0xa8   : > { %v3196_v48 = vpop.permute.xlu1 %776  ;;  %v3198_v49 = vpop.permute.xlu0 %774 }
  0xac   : > { %v3200_v50 = vpop.permute.xlu1 %780  ;;  %v3202_v51 = vpop.permute.xlu0 %778 }
  0xb0   : > { %v3204_v52 = vpop.permute.xlu1 %792  ;;  %v3206_v53 = vpop.permute.xlu0 %790 }
  0xb4   : > { %v3208_v54 = vpop.permute.xlu1 %796  ;;  %v3210_v55 = vpop.permute.xlu0 %794 }
  0xb8   : > { %v3212_v56 = vpop.permute.xlu1 %808  ;;  %v3214_v57 = vpop.permute.xlu0 %806 }
  0xbc   : > { %v3216_v58 = vpop.permute.xlu1 %812  ;;  %v3218_v59 = vpop.permute.xlu0 %810 }
  0xc0   : > { %v825_v60 = vpop.permute.xlu1 %824  ;;  %v823_v62 = vpop.permute.xlu0 %822 }
  0xc4   : > { %v829_v61 = vpop.permute.xlu1 %828  ;;  %v827_v0 = vpop.permute.xlu0 %826 }
  0xc8   : > { %v3220_v63 = vpop.permute.xlu1 %1038  ;;  %v3226_v3 = vpop.permute.xlu0 %1036 }
  0xc9   : > { %4588 = vst [vmem:[#allocation14_spill] sm:$0xff] %v3220_v63  ;;  %4591 = vst [vmem:[#allocation17_spill] sm:$0xff] %v3226_v3 }
  0xcc   : > { %v3222_v1 = vpop.permute.xlu1 %1042  ;;  %v3230_v5 = vpop.permute.xlu0 %1040 }
  0xcd   : > { %4589 = vst [vmem:[#allocation15_spill] sm:$0xff] %v3222_v1 }
  0xd0   : > { %v3224_v2 = vpop.permute.xlu1 %1180  ;;  %v3236_v8 = vpop.permute.xlu0 %1182 }
  0xd1   : > { %4590 = vst [vmem:[#allocation16_spill] sm:$0xff] %v3224_v2  ;;  %4594 = vst [vmem:[#allocation20_spill] sm:$0xff] %v3236_v8 }
  0xd4   : > { %v3228_v4 = vpop.permute.xlu1 %1184  ;;  %v3240_v10 = vpop.permute.xlu0 %1186 }
  0xd5   : > { %4596 = vst [vmem:[#allocation22_spill] sm:$0xff] %v3240_v10 }
  0xd8   : > { %v3232_v6 = vpop.permute.xlu1 %1326  ;;  %v3244_v12 = vpop.permute.xlu0 %1324 }
  0xd9   : > { %4592 = vst [vmem:[#allocation18_spill] sm:$0xff] %v3232_v6  ;;  %4598 = vst [vmem:[#allocation24_spill] sm:$0xff] %v3244_v12 }
  0xdc   : > { %v3234_v7 = vpop.permute.xlu1 %1330  ;;  %v3246_v14 = vpop.permute.xlu0 %1328 }
  0xdd   : > { %4593 = vst [vmem:[#allocation19_spill] sm:$0xff] %v3234_v7  ;;  %4599 = vst [vmem:[#allocation25_spill] sm:$0xff] %v3246_v14 }
  0xe0   : > { %v3238_v9 = vpop.permute.xlu1 %1468  ;;  %v3248_v16 = vpop.permute.xlu0 %1470 }
  0xe1   : > { %4595 = vst [vmem:[#allocation21_spill] sm:$0xff] %v3238_v9  ;;  %4600 = vst [vmem:[#allocation26_spill] sm:$0xff] %v3248_v16 }
  0xe4   : > { %v3242_v11 = vpop.permute.xlu1 %1472  ;;  %v3252_v18 = vpop.permute.xlu0 %1474 }
  0xe5   : > { %4597 = vst [vmem:[#allocation23_spill] sm:$0xff] %v3242_v11  ;;  %4601 = vst [vmem:[#allocation27_spill] sm:$0xff] %v3252_v18 }
  0xe8   : > { %v1603_v13 = vpop.permute.xlu1 %1602  ;;  %v3286_v38 = vpop.permute.xlu0 %1618 }
  0xec   : > { %v1605_v15 = vpop.permute.xlu1 %1604  ;;  %v1621_v45 = vpop.permute.xlu0 %1620 }
  0xf0   : > { %v3250_v17 = vpop.permute.xlu1 %1606 }
  0xf4   : > { %v3284_v37 = vpop.permute.xlu1 %1634 }
  0xf8   : > { %v3326_v31 = vpop.permute.xlu1 %1638 }
 0x106   : > { %v3254_v19 = vpop.f32.mrb[0].mxu0  ;;  %v3256_v20 = vpop.f32.mrb[0].mxu1 }
 0x107   : > { %4602 = vst [vmem:[#allocation28_spill] sm:$0xff] %v3254_v19  ;;  %4603 = vst [vmem:[#allocation29_spill] sm:$0xff] %v3256_v20  ;;  %v3258_v21 = vpop.f32.mrb[1].mxu0  ;;  %v3260_v22 = vpop.f32.mrb[1].mxu1  ;;  %v712_v23 = vsel %vm705_vm1, %v3254_v19, -inf  ;;  %v3271_v27 = vsub.f32 %v3256_v20, %v827_v0 }
 0x108   : > { %4604 = vst [vmem:[#allocation30_spill] sm:$0xff] %v3258_v21  ;;  %4605 = vst [vmem:[#allocation31_spill] sm:$0xff] %v3260_v22  ;;  %v3264_v24 = vpop.f32.mrb[2].mxu1  ;;  %713 = vmax.xlane.f32.xlu1 %v712_v23  ;;  %v3266_v25 = vpop.f32.mrb[2].mxu0  ;;  %v706_v26 = vsel %vm705_vm1, %v3258_v21, -inf }
 0x109   : > { %4606 = vst [vmem:[#allocation32_spill] sm:$0xff] %v3264_v24  ;;  %4607 = vst [vmem:[#allocation33_spill] sm:$0xff] %v3266_v25  ;;  %v3273_v28 = vpop.f32.mrb[3].mxu1  ;;  %707 = vmax.xlane.f32.xlu0 %v706_v26  ;;  %v3275_v29 = vpop.f32.mrb[3].mxu0  ;;  %v715_v34 = vsel %vm705_vm1, %v3266_v25, -inf  ;;  %v3280_v35 = vsub.f32 %v3264_v24, %v829_v61  ;;  %v889_v36 = vsel %vm838_vm2, %v3271_v27, -inf }
 0x10a   : > { %4608 = vst [vmem:[#allocation34_spill] sm:$0xff] %v3273_v28  ;;  %4609 = vst [vmem:[#allocation35_spill] sm:$0xff] %v3275_v29  ;;  %v3299_v61 = vsub.f32 %v3273_v28, %v825_v60  ;;  %v709_v26 = vsel %vm705_vm1, %v3275_v29, -inf }
 0x10b   : > { %v892_v43 = vsel %vm838_vm2, %v3280_v35, -inf }
 0x10c   : > { %716 = vmax.xlane.f32.xlu1 %v715_v34  ;;  %v3308_v34 = vsub.f32 %v3260_v22, %v823_v62  ;;  %v886_v60 = vsel %vm838_vm2, %v3299_v61, -inf  ;;  %v1623_v22 = vpop.permute.xlu0 %1622 }
 0x10d   : > { %890 = vmax.xlane.f32.xlu0 %v889_v36 }
 0x10e   : > { %v3288_v39 = vpop.f32.mrb[4].mxu0  ;;  %v3290_v40 = vpop.f32.mrb[4].mxu1 }
 0x10f   : > { %4610 = vst [vmem:[#allocation36_spill] sm:$0xff] %v3288_v39  ;;  %4611 = vst [vmem:[#allocation37_spill] sm:$0xff] %v3290_v40  ;;  %v3292_v41 = vpop.f32.mrb[5].mxu0  ;;  %v3294_v42 = vpop.f32.mrb[5].mxu1  ;;  %v3324_v62 = vsub.f32 %v3288_v39, %v3202_v51  ;;  %v3348_v44 = vsub.f32 %v3290_v40, %v1605_v15 }
 0x110   : > { %4612 = vst [vmem:[#allocation38_spill] sm:$0xff] %v3292_v41  ;;  %4613 = vst [vmem:[#allocation39_spill] sm:$0xff] %v3294_v42  ;;  %v3301_v0 = vpop.f32.mrb[6].mxu1  ;;  %893 = vmax.xlane.f32.xlu1 %v892_v43  ;;  %v3303_v23 = vpop.f32.mrb[6].mxu0  ;;  %v883_v43 = vsel %vm838_vm2, %v3308_v34, -inf  ;;  %v3364_v15 = vsub.f32 %v3292_v41, %v3198_v49 }
 0x111   : > { %4614 = vst [vmem:[#allocation40_spill] sm:$0xff] %v3301_v0  ;;  %4615 = vst [vmem:[#allocation41_spill] sm:$0xff] %v3303_v23  ;;  %v3310_v36 = vpop.f32.mrb[7].mxu1  ;;  %710 = vmax.xlane.f32.xlu0 %v709_v26  ;;  %v3312_v32 = vpop.f32.mrb[7].mxu0 }
 0x112   : > { %4616 = vst [vmem:[#allocation42_spill] sm:$0xff] %v3310_v36  ;;  %4617 = vst [vmem:[#allocation43_spill] sm:$0xff] %v3312_v32  ;;  %v3318_v28 = vsub.f32 %v3312_v32, %v3196_v48  ;;  %v3339_v47 = vsub.f32 %v3310_v36, %v1603_v13  ;;  %v1654_v36 = vsel %vm838_vm2, %v3348_v44, -inf  ;;  %v1637_v63 = vpop.permute.xlu0 %1636 }
 0x114   : > { %887 = vmax.xlane.f32.xlu1 %v886_v60  ;;  %v842_v48 = vsel %vm838_vm2, %v3318_v28, -inf  ;;  %v1651_v13 = vsel %vm838_vm2, %v3339_v47, -inf }
 0x115   : > { %884 = vmax.xlane.f32.xlu0 %v883_v43  ;;  %v845_v43 = vsel %vm838_vm2, %v3324_v62, -inf }
 0x116   : > { %v3328_v26 = vpop.f32.mrb[8].mxu0  ;;  %v3330_v33 = vpop.f32.mrb[8].mxu1 }
 0x117   : > { %4618 = vst [vmem:[#allocation44_spill] sm:$0xff] %v3328_v26  ;;  %4619 = vst [vmem:[#allocation45_spill] sm:$0xff] %v3330_v33  ;;  %v3332_v30 = vpop.f32.mrb[9].mxu0  ;;  %v3336_v60 = vpop.f32.mrb[9].mxu1 }
 0x118   : > { %4620 = vst [vmem:[#allocation46_spill] sm:$0xff] %v3332_v30  ;;  %4621 = vst [vmem:[#allocation47_spill] sm:$0xff] %v3336_v60  ;;  %843 = vmax.xlane.f32.xlu1 %v842_v48  ;;  %v3341_v51 = vpop.f32.mrb[10].mxu0  ;;  %v3345_v46 = vpop.f32.mrb[10].mxu1 }
 0x119   : > { %4622 = vst [vmem:[#allocation48_spill] sm:$0xff] %v3341_v51  ;;  %4623 = vst [vmem:[#allocation49_spill] sm:$0xff] %v3345_v46  ;;  %846 = vmax.xlane.f32.xlu0 %v845_v43  ;;  %v3350_v32 = vpop.f32.mrb[11].mxu0  ;;  %v3352_v24 = vpop.f32.mrb[11].mxu1  ;;  %v3358_v48 = vsub.f32 %v3341_v51, %v3208_v54  ;;  %v3367_v40 = vsub.f32 %v3345_v46, %v1623_v22  ;;  %v839_v22 = vsel %vm838_vm2, %v3364_v15, -inf }
 0x11a   : > { %4624 = vst [vmem:[#allocation50_spill] sm:$0xff] %v3350_v32  ;;  %4625 = vst [vmem:[#allocation51_spill] sm:$0xff] %v3352_v24  ;;  %v1601_v43 = vpop.permute.xlu1 %1600 }
 0x11b   : > { %v3380_v51 = vsub.f32 %v3294_v42, %v1601_v43  ;;  %v1669_v6 = vsel %vm838_vm2, %v3367_v40, -inf  ;;  %v3396_v43 = vsub.f32 %v3350_v32, %v3204_v52  ;;  %v3402_v42 = vsub.f32 %v3303_v23, %v3200_v50 }
 0x11c   : > { %1652 = vmax.xlane.f32.xlu1 %v1651_v13  ;;  %v860_v13 = vsel %vm838_vm2, %v3358_v48, -inf }
 0x11d   : > { %1655 = vmax.xlane.f32.xlu0 %v1654_v36  ;;  %v854_v8 = vsel %vm838_vm2, %v3396_v43, -inf  ;;  %v848_v52 = vsel %vm838_vm2, %v3402_v42, -inf }
 0x11e   : > { %v3369_v20 = vpop.f32.mrb[12].mxu0  ;;  %v3371_v39 = vpop.f32.mrb[12].mxu1 }
 0x11f   : > { %4626 = vst [vmem:[#allocation52_spill] sm:$0xff] %v3369_v20  ;;  %4627 = vst [vmem:[#allocation53_spill] sm:$0xff] %v3371_v39  ;;  %v3373_v16 = vpop.f32.mrb[13].mxu0  ;;  %v3375_v54 = vpop.f32.mrb[13].mxu1  ;;  %v3417_v50 = vsub.f32 %v3371_v39, %v1637_v63 }
 0x120   : > { %4628 = vst [vmem:[#allocation54_spill] sm:$0xff] %v3373_v16  ;;  %4629 = vst [vmem:[#allocation55_spill] sm:$0xff] %v3375_v54  ;;  %v3382_v49 = vpop.f32.mrb[14].mxu1  ;;  %861 = vmax.xlane.f32.xlu1 %v860_v13  ;;  %v3384_v36 = vpop.f32.mrb[14].mxu0  ;;  %v1648_v13 = vsel %vm838_vm2, %v3380_v51, -inf }
 0x121   : > { %4630 = vst [vmem:[#allocation56_spill] sm:$0xff] %v3382_v49  ;;  %4631 = vst [vmem:[#allocation57_spill] sm:$0xff] %v3384_v36  ;;  %v3388_v46 = vpop.f32.mrb[15].mxu1  ;;  %840 = vmax.xlane.f32.xlu0 %v839_v22  ;;  %v3390_v41 = vpop.f32.mrb[15].mxu0  ;;  %v3406_v22 = vsub.f32 %v3352_v24, %v3286_v38  ;;  %v3425_v24 = vsub.f32 %v3328_v26, %v3210_v55  ;;  %v1682_v63 = vsel %vm838_vm2, %v3417_v50, -inf }
 0x122   : > { %4632 = vst [vmem:[#allocation58_spill] sm:$0xff] %v3388_v46  ;;  %4633 = vst [vmem:[#allocation59_spill] sm:$0xff] %v3390_v41  ;;  %v3441_v55 = vsub.f32 %v3384_v36, %v3216_v58 }
 0x123   : > { %v1663_v38 = vsel %vm838_vm2, %v3406_v22, -inf }
 0x124   : > { %1670 = vmax.xlane.f32.xlu1 %v1669_v6  ;;  %v3414_v6 = vsub.f32 %v3301_v0, %v3250_v17 }
 0x125   : > { %1649 = vmax.xlane.f32.xlu0 %v1648_v13  ;;  %v1633_v13 = vpop.permute.xlu1 %1632 }
 0x126   : > { %v3428_v17 = vsub.f32 %v3375_v54, %v1633_v13  ;;  %v3466_v54 = vsub.f32 %v3369_v20, %v3218_v59 }
 0x128   : > { %855 = vmax.xlane.f32.xlu1 %v854_v8  ;;  %v1657_v8 = vsel %vm838_vm2, %v3414_v6, -inf  ;;  %v1676_v39 = vsel %vm838_vm2, %v3428_v17, -inf }
 0x129   : > { %849 = vmax.xlane.f32.xlu0 %v848_v52  ;;  %v3433_v52 = vsub.f32 %v3330_v33, %v1621_v45  ;;  %v3447_v45 = vsub.f32 %v3332_v30, %v3206_v53 }
 0x12b   : > { %v1666_v13 = vsel %vm838_vm2, %v3433_v52, -inf }
 0x12c   : > { %1664 = vmax.xlane.f32.xlu1 %v1663_v38  ;;  %v857_v38 = vsel %vm838_vm2, %v3425_v24, -inf }
 0x12d   : > { %1658 = vmax.xlane.f32.xlu0 %v1657_v8  ;;  %v1617_v8 = vpop.permute.xlu0 %1616 }
 0x12e   : > { %v3456_v58 = vsub.f32 %v3336_v60, %v1617_v8  ;;  %v3472_v8 = vsub.f32 %v3373_v16, %v3214_v57 }
 0x130   : > { %1683 = vmax.xlane.f32.xlu1 %v1682_v63  ;;  %v876_v63 = vsel %vm838_vm2, %v3441_v55, -inf }
 0x131   : > { %858 = vmax.xlane.f32.xlu0 %v857_v38  ;;  %v3453_v38 = vsub.f32 %v3390_v41, %v3212_v56  ;;  %v873_v56 = vsel %vm838_vm2, %v3466_v54, -inf }
 0x133   : > { %v870_v53 = vsel %vm838_vm2, %v3453_v38, -inf }
 0x134   : > { %1677 = vmax.xlane.f32.xlu1 %v1676_v39  ;;  %v851_v39 = vsel %vm838_vm2, %v3447_v45, -inf }
 0x135   : > { %1667 = vmax.xlane.f32.xlu0 %v1666_v13  ;;  %v1660_v13 = vsel %vm838_vm2, %v3456_v58, -inf }
 0x138   : > { %877 = vmax.xlane.f32.xlu1 %v876_v63  ;;  %v867_v63 = vsel %vm838_vm2, %v3472_v8, -inf }
 0x139   : > { %852 = vmax.xlane.f32.xlu0 %v851_v39  ;;  %v3478_v39 = vsub.f32 %v3382_v49, %v3326_v31 }
 0x13b   : > { %v1685_v59 = vsel %vm838_vm2, %v3478_v39, -inf }
 0x13c   : > { %871 = vmax.xlane.f32.xlu1 %v870_v53  ;;  %v3484_v53 = vsub.f32 %v3388_v46, %v3284_v37 }
 0x13d   : > { %1661 = vmax.xlane.f32.xlu0 %v1660_v13  ;;  %v3488_v13 = vpop.permute.xlu0 %1804 }
 0x13e   : > { %v1679_v57 = vsel %vm838_vm2, %v3484_v53, -inf  ;;  %4634 = vst [vmem:[#allocation60_spill] sm:$0xff] %v3488_v13 }
 0x141   : > { %874 = vmax.xlane.f32.xlu0 %v873_v56  ;;  %v3490_v56 = vpop.permute.xlu1 %1806  ;;  %v3492_v60 = vpop.permute.xlu0 %1808 }
 0x142   : > { %4635 = vst [vmem:[#allocation61_spill] sm:$0xff] %v3490_v56 }
 0x145   : > { %868 = vmax.xlane.f32.xlu0 %v867_v63  ;;  %v3494_v31 = vpop.permute.xlu1 %1810  ;;  %v3496_v63 = vpop.permute.xlu0 %1950 }
 0x146   : > { %4636 = vst [vmem:[#allocation62_spill] sm:$0xff] %v3494_v31  ;;  %4637 = vst [vmem:[#allocation63_spill] sm:$0xff] %v3496_v63 }
 0x149   : > { %1686 = vmax.xlane.f32.xlu0 %v1685_v59  ;;  %v3498_v49 = vpop.permute.xlu1 %1952  ;;  %v3500_v33 = vpop.permute.xlu0 %1954 }
 0x14a   : > { %4638 = vst [vmem:[#allocation64_spill] sm:$0xff] %v3498_v49  ;;  %4639 = vst [vmem:[#allocation65_spill] sm:$0xff] %v3500_v33 }
 0x14d   : > { %1680 = vmax.xlane.f32.xlu0 %v1679_v57 }
 0x195   : > { %v714_v37 = vpop.xlane.xlu1 %713 }
 0x196   : > { %v720_v59 = vsub.f32 %v3254_v19, %v714_v37  ;;  %v708_v46 = vpop.xlane.xlu0 %707 }
 0x197   : > { %v718_v57 = vsub.f32 %v3258_v21, %v708_v46 }
 0x198   : > { %v726_v0 = vmul.f32 1.442695, %v720_v59 }
 0x199   : > { %v722_v13 = vmul.f32 1.442695, %v718_v57  ;;  %v717_v41 = vpop.xlane.xlu1 %716 }
 0x19a   : > { %2776 = vpow2.f32 %v726_v0  ;;  %v721_v32 = vsub.f32 %v3266_v25, %v717_v41  ;;  %v3505_v36 = vpop.xlane.xlu0 %890 }
 0x19b   : > { %2778 = vpow2.f32 %v722_v13 }
 0x19c   : > { %v728_v31 = vmul.f32 1.442695, %v721_v32 }
 0x19d   : > { %v3507_v63 = vpop.xlane.xlu1 %893 }
 0x19e   : > { %2780 = vpow2.f32 %v728_v31  ;;  %v711_v33 = vpop.xlane.xlu0 %710 }
 0x19f   : > { %v719_v49 = vsub.f32 %v3275_v29, %v711_v33 }
 0x1a1   : > { %v3510_v37 = vpop.xlane.xlu1 %887  ;;  %v724_v19 = vmul.f32 1.442695, %v719_v49 }
 0x1a2   : > { %v885_v46 = vpop.xlane.xlu0 %884 }
 0x1a3   : > { %2782 = vpow2.f32 %v724_v19 }
 0x1a4   : > { %v3512_v59 = vpop.eup %2776 }
 0x1a5   : > { %v3514_v57 = vpop.xlane.xlu1 %843  ;;  %754 = vrot.lane.b32.xlu0 %v3512_v59, %s2936_s7  ;;  %738 = vrot.lane.b32.xlu1 %v3512_v59, %s2937_s8  ;;  %v3518_v41 = vpop.eup %2778 }
 0x1a6   : > { %v847_v32 = vpop.xlane.xlu0 %846  ;;  %4640 = vst [vmem:[#allocation66_spill] sm:$0xff] %v3518_v41 }
 0x1a8   : > { %v3520_v0 = vpop.eup %2780 }
 0x1a9   : > { %4641 = vst [vmem:[#allocation67_spill] sm:$0xff] %v3520_v0  ;;  %v3522_v33 = vpop.xlane.xlu1 %1652  ;;  %734 = vrot.lane.b32.xlu0 %v3518_v41, %s2937_s8  ;;  %740 = vrot.lane.b32.xlu1 %v3520_v0, %s2937_s8 }
 0x1aa   : > { %v1656_v49 = vpop.xlane.xlu0 %1655 }
 0x1ad   : > { %v862_v13 = vpop.xlane.xlu1 %861  ;;  %750 = vrot.lane.b32.xlu0 %v3518_v41, %s2936_s7  ;;  %756 = vrot.lane.b32.xlu1 %v3520_v0, %s2936_s7  ;;  %v3528_v21 = vpop.eup %2782 }
 0x1ae   : > { %v841_v31 = vpop.xlane.xlu0 %840  ;;  %4642 = vst [vmem:[#allocation68_spill] sm:$0xff] %v3528_v21 }
 0x1b1   : > { %736 = vrot.lane.b32.xlu1 %v3528_v21, %s2937_s8  ;;  %v1671_v19 = vpop.xlane.xlu1 %1670 }
 0x1b2   : > { %v1650_v25 = vpop.xlane.xlu0 %1649 }
 0x1b5   : > { %752 = vrot.lane.b32.xlu1 %v3528_v21, %s2936_s7  ;;  %v3532_v23 = vpop.xlane.xlu1 %855 }
 0x1b6   : > { %v850_v29 = vpop.xlane.xlu0 %849 }
 0x1b9   : > { %v3534_v30 = vpop.xlane.xlu1 %1664 }
 0x1ba   : > { %v1659_v16 = vpop.xlane.xlu0 %1658 }
 0x1bd   : > { %v1684_v18 = vpop.xlane.xlu1 %1683 }
 0x1be   : > { %v859_v20 = vpop.xlane.xlu0 %858 }
 0x1c1   : > { %v1678_v3 = vpop.xlane.xlu1 %1677 }
 0x1c2   : > { %v1668_v26 = vpop.xlane.xlu0 %1667 }
 0x1c3   : > { %v1674_v56 = vmax.f32 %v1656_v49, %v1668_v26  ;;  %v4557_v49 = vmov 99  }
 0x1c4   : > { %2678 = vset.pattern.permute.xlu1 %v4557_v49 }
 0x1c5   : > { %v3536_v7 = vmax.f32 %v1674_v56, %v1684_v18 }
 0x1c6   : > { %v853_v10 = vpop.xlane.xlu0 %852 }
 0x1c7   : > { %v1694_v1 = vsub.f32 %v3348_v44, %v3536_v7  ;;  %v1706_v9 = vsub.f32 %v3433_v52, %v3536_v7  ;;  %v865_v44 = vmax.f32 %v847_v32, %v859_v20  ;;  %v863_v56 = vmax.f32 %v841_v31, %v853_v10 }
 0x1c8   : > { %v1675_v32 = vmax.f32 %v1659_v16, %v1671_v19  ;;  %v864_v19 = vmax.f32 %v3514_v57, %v3532_v23 }
 0x1c9   : > { %v1700_v21 = vmul.f32 1.442695, %v1694_v1  ;;  %v1712_v0 = vmul.f32 1.442695, %v1706_v9 }
 0x1ca   : > { %v1662_v12 = vpop.xlane.xlu0 %1661 }
 0x1cb   : > { %2784 = vpow2.f32 %v1700_v21  ;;  %v1672_v2 = vmax.f32 %v1650_v25, %v1662_v12  ;;  %v878_v25 = vpop.xlane.xlu1 %877 }
 0x1cc   : > { %2786 = vpow2.f32 %v1712_v0 }
 0x1cd   : > { %v3542_v11 = vmax.f32 %v1672_v2, %v1678_v3  ;;  %v866_v3 = vmax.f32 %v850_v29, %v862_v13 }
 0x1ce   : > { %v875_v26 = vpop.xlane.xlu0 %874 }
 0x1cf   : > { %v1692_v18 = vsub.f32 %v3380_v51, %v3542_v11  ;;  %v881_v1 = vmax.f32 %v865_v44, %v875_v26 }
 0x1d1   : > { %v1696_v52 = vmul.f32 1.442695, %v1692_v18  ;;  %v897_v12 = vmax.f32 %v881_v1, %v3505_v36 }
 0x1d2   : > { %v869_v41 = vpop.xlane.xlu0 %868 }
 0x1d3   : > { %v879_v9 = vmax.f32 %v863_v56, %v869_v41  ;;  %2788 = vpow2.f32 %v1696_v52  ;;  %v901_v51 = vsub.f32 %v3324_v62, %v897_v12  ;;  %v913_v10 = vsub.f32 %v3425_v24, %v897_v12 }
 0x1d4   : > { %v925_v20 = vsub.f32 %v3466_v54, %v897_v12  ;;  %v937_v36 = vsub.f32 %v3271_v27, %v897_v12  ;;  %v882_v41 = vmax.f32 %v866_v3, %v878_v25  ;;  %v872_v27 = vpop.xlane.xlu1 %871 }
 0x1d5   : > { %v2785_v14 = vpop.eup %2784  ;;  %v3548_v21 = vmax.f32 %v879_v9, %v885_v46  ;;  %v907_v0 = vmul.f32 1.442695, %v901_v51  ;;  %v919_v13 = vmul.f32 1.442695, %v913_v10  ;;  %v880_v44 = vmax.f32 %v864_v19, %v872_v27 }
 0x1d6   : > { %v2787_v2 = vpop.eup %2786  ;;  %1792 = vrot.lane.b32.xlu1 %v2785_v14, %s2939_s9  ;;  %v1687_v29 = vpop.xlane.xlu0 %1686  ;;  %v931_v31 = vmul.f32 1.442695, %v925_v20  ;;  %v943_v24 = vmul.f32 1.442695, %v937_v36  ;;  %v3563_v16 = vmax.f32 %v882_v41, %v3507_v63  ;;  %v4561_v36 = vmov 101  }
 0x1d7   : > { %1936 = vrot.lane.b32.xlu0 %v2787_v2, %s2939_s9  ;;  %v899_v46 = vsub.f32 %v3364_v15, %v3548_v21  ;;  %2790 = vpow2.f32 %v907_v0  ;;  %v3558_v62 = vmax.f32 %v1675_v32, %v1687_v29  ;;  %v3560_v54 = vadd.f32 %v2787_v2, %v2785_v14 }
 0x1d8   : > { %2792 = vpow2.f32 %v919_v13  ;;  %v923_v15 = vsub.f32 %v3472_v8, %v3548_v21  ;;  %v914_v14 = vsub.f32 %v3358_v48, %v3563_v16  ;;  %v938_v23 = vsub.f32 %v3280_v35, %v3563_v16  ;;  %2691 = vset.pattern.permute.xlu0 %v4561_v36 }
 0x1d9   : > { %v903_v26 = vmul.f32 1.442695, %v899_v46  ;;  %2794 = vpow2.f32 %v931_v31  ;;  %v1695_v18 = vsub.f32 %v3414_v6, %v3558_v62  ;;  %v1707_v8 = vsub.f32 %v3367_v40, %v3558_v62 }
 0x1da   : > { %v927_v63 = vmul.f32 1.442695, %v923_v15  ;;  %v3582_v6 = vmax.f32 %v880_v44, %v3510_v37  ;;  %v921_v1 = vmul.f32 1.442695, %v914_v14  ;;  %v911_v48 = vsub.f32 %v3447_v45, %v3548_v21  ;;  %v1681_v25 = vpop.xlane.xlu0 %1680 }
 0x1db   : > { %2796 = vpow2.f32 %v903_v26  ;;  %v1702_v52 = vmul.f32 1.442695, %v1695_v18  ;;  %v1714_v2 = vmul.f32 1.442695, %v1707_v8  ;;  %v1673_v40 = vmax.f32 %v3522_v33, %v3534_v30 }
 0x1dc   : > { %2798 = vpow2.f32 %v943_v24  ;;  %v945_v35 = vmul.f32 1.442695, %v938_v23  ;;  %v912_v37 = vsub.f32 %v3396_v43, %v3582_v6  ;;  %v1704_v45 = vsub.f32 %v3456_v58, %v3542_v11 }
 0x1dd   : > { %v3571_v56 = vpop.eup %2788  ;;  %2800 = vpow2.f32 %v927_v63  ;;  %v915_v32 = vmul.f32 1.442695, %v911_v48  ;;  %v935_v30 = vsub.f32 %v3308_v34, %v3548_v21  ;;  %v3598_v43 = vmax.f32 %v1673_v40, %v1681_v25 }
 0x1de   : > { %1788 = vrot.lane.b32.xlu0 %v3571_v56, %s2939_s9  ;;  %2802 = vpow2.f32 %v1702_v52  ;;  %v917_v46 = vmul.f32 1.442695, %v912_v37  ;;  %v936_v58 = vsub.f32 %v3299_v61, %v3582_v6  ;;  %v1708_v29 = vmul.f32 1.442695, %v1704_v45 }
 0x1df   : > { %2804 = vpow2.f32 %v921_v1  ;;  %v1716_v41 = vsub.f32 %v3428_v17, %v3542_v11  ;;  %v939_v34 = vmul.f32 1.442695, %v935_v30  ;;  %v1693_v21 = vsub.f32 %v3339_v47, %v3598_v43 }
 0x1e0   : > { %2806 = vpow2.f32 %v1714_v2  ;;  %v941_v31 = vmul.f32 1.442695, %v936_v58  ;;  %v1705_v26 = vsub.f32 %v3406_v22, %v3598_v43  ;;  %v902_v27 = vsub.f32 %v3402_v42, %v3563_v16 }
 0x1e1   : > { %v2791_v57 = vpop.eup %2790  ;;  %2808 = vpow2.f32 %v945_v35  ;;  %v1720_v61 = vmul.f32 1.442695, %v1716_v41  ;;  %v1698_v17 = vmul.f32 1.442695, %v1693_v21  ;;  %v926_v14 = vsub.f32 %v3441_v55, %v3563_v16 }
 0x1e2   : > { %v2793_v9 = vpop.eup %2792  ;;  %1016 = vrot.lane.b32.xlu1 %v2791_v57, %s2939_s9  ;;  %2810 = vpow2.f32 %v915_v32  ;;  %v1710_v15 = vmul.f32 1.442695, %v1705_v26  ;;  %v909_v44 = vmul.f32 1.442695, %v902_v27  ;;  %v1718_v42 = vsub.f32 %v3417_v50, %v3536_v7 }
 0x1e3   : > { %v2795_v12 = vpop.eup %2794  ;;  %v949_v3 = vadd.f32 %v2793_v9, %v2791_v57  ;;  %2812 = vpow2.f32 %v917_v46  ;;  %v933_v57 = vmul.f32 1.442695, %v926_v14  ;;  %v900_v50 = vsub.f32 %v3318_v28, %v3582_v6 }
 0x1e4   : > { %1312 = vrot.lane.b32.xlu0 %v2795_v12, %s2939_s9  ;;  %2814 = vpow2.f32 %v1708_v29  ;;  %v1724_v16 = vmul.f32 1.442695, %v1718_v42  ;;  %v924_v2 = vsub.f32 %v3453_v38, %v3582_v6  ;;  %v1719_v40 = vsub.f32 %v3478_v39, %v3558_v62 }
 0x1e5   : > { %v2797_v51 = vpop.eup %2796  ;;  %v953_v10 = vadd.f32 %v2795_v12, %v949_v3  ;;  %2816 = vpow2.f32 %v939_v34  ;;  %v905_v12 = vmul.f32 1.442695, %v900_v50  ;;  %v1717_v25 = vsub.f32 %v3484_v53, %v3598_v43 }
 0x1e6   : > { %v2799_v20 = vpop.eup %2798  ;;  %1168 = vrot.lane.b32.xlu1 %v2793_v9, %s2939_s9  ;;  %2818 = vpow2.f32 %v941_v31  ;;  %v929_v28 = vmul.f32 1.442695, %v924_v2  ;;  %v1726_v37 = vmul.f32 1.442695, %v1719_v40  ;;  %v4559_v14 = vmov 100  }
 0x1e7   : > { %v3600_v33 = vadd.f32 %v2799_v20, %v953_v10  ;;  %v2801_v0 = vpop.eup %2800  ;;  %2820 = vpow2.f32 %v1720_v61  ;;  %v1722_v6 = vmul.f32 1.442695, %v1717_v25 }
 0x1e8   : > { %1012 = vrot.lane.b32.xlu0 %v2797_v51, %s2939_s9  ;;  %v3611_v13 = vpop.eup %2802  ;;  %2822 = vpow2.f32 %v1698_v17 }
 0x1e9   : > { %v3615_v11 = vpop.eup %2804  ;;  %2824 = vpow2.f32 %v1710_v15 }
 0x1ea   : > { %1456 = vrot.lane.b32.xlu1 %v2799_v20, %s2939_s9  ;;  %v2807_v47 = vpop.eup %2806  ;;  %2826 = vpow2.f32 %v909_v44 }
 0x1eb   : > { %v3622_v24 = vpop.eup %2808  ;;  %2828 = vpow2.f32 %v933_v57  ;;  %v1731_v62 = vadd.f32 %v2807_v47, %v3611_v13 }
 0x1ec   : > { %1308 = vrot.lane.b32.xlu0 %v2801_v0, %s2939_s9  ;;  %v2811_v19 = vpop.eup %2810  ;;  %2830 = vpow2.f32 %v1724_v16 }
 0x1ed   : > { %v2813_v22 = vpop.eup %2812  ;;  %v947_v8 = vadd.f32 %v2811_v19, %v2797_v51  ;;  %2832 = vpow2.f32 %v905_v12 }
 0x1ee   : > { %1794 = vrot.lane.b32.xlu1 %v3611_v13, %s2939_s9  ;;  %v3629_v18 = vpop.eup %2814  ;;  %2834 = vpow2.f32 %v929_v28 }
 0x1ef   : > { %v2817_v63 = vpop.eup %2816  ;;  %v1728_v52 = vadd.f32 %v3629_v18, %v3571_v56  ;;  %v951_v7 = vadd.f32 %v2801_v0, %v947_v8  ;;  %2836 = vpow2.f32 %v1726_v37 }
 0x1f0   : > { %1170 = vrot.lane.b32.xlu0 %v3615_v11, %s2939_s9  ;;  %v2819_v23 = vpop.eup %2818  ;;  %2838 = vpow2.f32 %v1722_v6 }
 0x1f1   : > { %v3639_v1 = vpop.eup %2820  ;;  %v955_v48 = vadd.f32 %v2817_v63, %v951_v7 }
 0x1f2   : > { %1938 = vrot.lane.b32.xlu1 %v2807_v47, %s2939_s9  ;;  %v2823_v55 = vpop.eup %2822  ;;  %v1732_v9 = vadd.f32 %v3639_v1, %v1728_v52 }
 0x1f3   : > { %v2825_v56 = vpop.eup %2824 }
 0x1f4   : > { %1458 = vrot.lane.b32.xlu0 %v3622_v24, %s2939_s9  ;;  %v2827_v3 = vpop.eup %2826  ;;  %v1729_v20 = vadd.f32 %v2825_v56, %v2823_v55 }
 0x1f5   : > { %v2829_v35 = vpop.eup %2828  ;;  %v950_v30 = vadd.f32 %v2827_v3, %v3615_v11 }
 0x1f6   : > { %1164 = vrot.lane.b32.xlu1 %v2811_v19, %s2939_s9  ;;  %v3657_v51 = vpop.eup %2830 }
 0x1f7   : > { %v1734_v38 = vadd.f32 %v3657_v51, %v3560_v54  ;;  %v2833_v39 = vpop.eup %2832  ;;  %v954_v43 = vadd.f32 %v2829_v35, %v950_v30 }
 0x1f8   : > { %1166 = vrot.lane.b32.xlu0 %v2813_v22, %s2939_s9  ;;  %v2835_v45 = vpop.eup %2834  ;;  %v948_v46 = vadd.f32 %v2833_v39, %v2813_v22 }
 0x1f9   : > { %v3665_v53 = vpop.eup %2836  ;;  %v958_v58 = vadd.f32 %v3622_v24, %v954_v43  ;;  %v4648_v43 = vld [vmem:[#allocation16_spill] sm:$0xff] }
 0x1fa   : > { %1452 = vrot.lane.b32.xlu1 %v2817_v63, %s2939_s9  ;;  %v1735_v10 = vadd.f32 %v3665_v53, %v1731_v62  ;;  %v3669_v54 = vpop.eup %2838  ;;  %v952_v29 = vadd.f32 %v2835_v45, %v948_v46  ;;  %v4645_v62 = vld [vmem:[#allocation23_spill] sm:$0xff] }
 0x1fb   : > { %v1733_v32 = vadd.f32 %v3669_v54, %v1729_v20 }
 0x1fc   : > { %1454 = vrot.lane.b32.xlu0 %v2819_v23, %s2939_s9  ;;  %v956_v0 = vadd.f32 %v2819_v23, %v952_v29  ;;  %v4649_v29 = vld [vmem:[#allocation24_spill] sm:$0xff] }
 0x1fe   : > { %1790 = vrot.lane.b32.xlu1 %v2823_v55, %s2939_s9 }
 0x200   : > { %1740 = vrot.lane.b32.xlu0 %v1732_v9, %s2939_s9 }
 0x202   : > { %1934 = vrot.lane.b32.xlu1 %v2825_v56, %s2939_s9 }
 0x204   : > { %963 = vrot.lane.b32.xlu0 %v955_v48, %s2939_s9 }
 0x206   : > { %1018 = vrot.lane.b32.xlu1 %v2827_v3, %s2939_s9  ;;  %v4644_v3 = vld [vmem:[#allocation66_spill] sm:$0xff] }
 0x20a   : > { %1314 = vrot.lane.b32.xlu1 %v2829_v35, %s2939_s9 }
 0x20e   : > { %1744 = vrot.lane.b32.xlu1 %v1734_v38, %s2939_s9 }
 0x212   : > { %1014 = vrot.lane.b32.xlu1 %v2833_v39, %s2939_s9 }
 0x216   : > { %1310 = vrot.lane.b32.xlu1 %v2835_v45, %s2939_s9 }
 0x217   : > { %v739_v41 = vpop.permute.xlu1 %738 }
 0x218   : > { %v748_v31 = vadd.f32 %v3512_v59, %v739_v41 }
 0x21a   : > { %1746 = vrot.lane.b32.xlu1 %v1735_v10, %s2939_s9  ;;  %v4646_v10 = vld [vmem:[#allocation17_spill] sm:$0xff] }
 0x21b   : > { %v3679_v34 = vpop.permute.xlu1 %740 }
 0x21e   : > { %1742 = vrot.lane.b32.xlu1 %v1733_v32, %s2939_s9 }
 0x21f   : > { %v3681_v21 = vpop.permute.xlu1 %756 }
 0x222   : > { %967 = vrot.lane.b32.xlu1 %v3600_v33, %s2939_s9  ;;  %v755_v33 = vpop.permute.xlu0 %754 }
 0x223   : > { %v3683_v13 = vpop.permute.xlu1 %736  ;;  %v3688_v11 = vadd.f32 %v755_v33, %v748_v31  ;;  %v4651_v33 = vld [vmem:[#allocation67_spill] sm:$0xff] }
 0x226   : > { %969 = vrot.lane.b32.xlu1 %v958_v58, %s2939_s9  ;;  %v735_v15 = vpop.permute.xlu0 %734 }
 0x227   : > { %v3686_v61 = vpop.permute.xlu1 %752  ;;  %v746_v40 = vadd.f32 %v4644_v3, %v735_v15  ;;  %v4660_v3 = vld [vmem:[#allocation61_spill] sm:$0xff] }
 0x22a   : > { %965 = vrot.lane.b32.xlu1 %v956_v0, %s2939_s9  ;;  %v751_v44 = vpop.permute.xlu0 %750 }
 0x22b   : > { %v3721_v35 = vadd.f32 %v751_v44, %v746_v40 }
 0x248   : > { %v1793_v17 = vpop.permute.xlu1 %1792 }
 0x249   : > { %v1802_v26 = vmul.f32 %v1793_v17, %v3688_v11  ;;  %v749_v17 = vadd.f32 %v4651_v33, %v3679_v34  ;;  %v4653_v34 = vld [vmem:[#allocation15_spill] sm:$0xff] }
 0x24b   : > { %v3692_v47 = vmul.f32 %v3492_v60, %v1802_v26  ;;  %v3700_v60 = vpop.permute.xlu0 %1936  ;;  %v4652_v26 = vld [vmem:[#allocation21_spill] sm:$0xff]  ;;  %v3755_v15 = vadd.f32 %v3681_v21, %v749_v17  ;;  %v4655_v21 = vld [vmem:[#allocation22_spill] sm:$0xff] }
 0x24d   : > { %1832 = vperm.xlu1 %2678, %v3692_v47  }
 0x254   : > { %v1017_v24 = vpop.permute.xlu1 %1016 }
 0x255   : > { %v1026_v27 = vmul.f32 %v1017_v24, %v3688_v11 }
 0x257   : > { %v1050_v19 = vmul.f32 %v3230_v5, %v1026_v27  ;;  %v3706_v5 = vpop.permute.xlu0 %1788 }
 0x258   : > { %v1169_v59 = vpop.permute.xlu1 %1168 }
 0x259   : > { %1064 = vperm.xlu1 %2678, %v1050_v19   ;;  %v1178_v42 = vmul.f32 %v1169_v59, %v3688_v11 }
 0x25b   : > { %v1194_v8 = vmul.f32 %v3228_v4, %v1178_v42  ;;  %v1313_v57 = vpop.permute.xlu0 %1312  ;;  %v4643_v4 = vld [vmem:[#allocation25_spill] sm:$0xff] }
 0x25c   : > { %v1457_v22 = vpop.permute.xlu1 %1456  ;;  %v1322_v9 = vmul.f32 %v1313_v57, %v3688_v11 }
 0x25d   : > { %2679 = vset.pattern.permute.xlu1 %v4559_v14  ;;  %v1466_v37 = vmul.f32 %v1457_v22, %v3688_v11 }
 0x25e   : > { %1089 = vperm.xlu1 %2679, %v1050_v19   ;;  %v1338_v56 = vmul.f32 %v4643_v4, %v1322_v9  ;;  %v4658_v9 = vld [vmem:[#allocation68_spill] sm:$0xff] }
 0x25f   : > { %v1013_v7 = vpop.permute.xlu0 %1012  ;;  %v1482_v45 = vmul.f32 %v4645_v62, %v1466_v37 }
 0x260   : > { %v3698_v63 = vpop.permute.xlu1 %1794  ;;  %v1024_v38 = vmul.f32 %v1013_v7, %v3721_v35  ;;  %v747_v7 = vadd.f32 %v4658_v9, %v3683_v13 }
 0x262   : > { %2680 = vset.pattern.permute.xlu1 %v4561_v36  ;;  %v3730_v20 = vmul.f32 %v4646_v10, %v1024_v38  ;;  %v3783_v4 = vadd.f32 %v3686_v61, %v747_v7  ;;  %v4662_v38 = vld [vmem:[#allocation20_spill] sm:$0xff] }
 0x263   : > { %1129 = vperm.xlu1 %2680, %v1050_v19   ;;  %v1309_v48 = vpop.permute.xlu0 %1308 }
 0x264   : > { %v3704_v52 = vpop.permute.xlu1 %1938  ;;  %4647 = vst [vmem:[#allocation25_spill] sm:$0xff] %v3730_v20  ;;  %v1320_v58 = vmul.f32 %v1309_v48, %v3721_v35 }
 0x266   : > { %v3740_v41 = vmul.f32 %v4649_v29, %v1320_v58 }
 0x267   : > { %2681 = vset.pattern.permute.xlu1 %v4557_v49  ;;  %v1171_v28 = vpop.permute.xlu0 %1170 }
 0x268   : > { %1208 = vperm.xlu1 %2681, %v1194_v8   ;;  %v1165_v23 = vpop.permute.xlu1 %1164  ;;  %4650 = vst [vmem:[#allocation66_spill] sm:$0xff] %v3740_v41  ;;  %v1179_v44 = vmul.f32 %v1171_v28, %v3755_v15  ;;  %v4661_v28 = vld [vmem:[#allocation14_spill] sm:$0xff] }
 0x269   : > { %v1176_v32 = vmul.f32 %v1165_v23, %v3721_v35  ;;  %v4656_v23 = vld [vmem:[#allocation19_spill] sm:$0xff] }
 0x26a   : > { %v1195_v42 = vmul.f32 %v4655_v21, %v1179_v44 }
 0x26b   : > { %v1459_v39 = vpop.permute.xlu0 %1458  ;;  %v1192_v46 = vmul.f32 %v4648_v43, %v1176_v32 }
 0x26c   : > { %2682 = vset.pattern.permute.xlu1 %v4559_v14  ;;  %v1453_v55 = vpop.permute.xlu1 %1452 }
 0x26d   : > { %1233 = vperm.xlu1 %2682, %v1194_v8   ;;  %v1464_v31 = vmul.f32 %v1453_v55, %v3721_v35  ;;  %v1467_v55 = vmul.f32 %v1459_v39, %v3755_v15 }
 0x26f   : > { %v1167_v30 = vpop.permute.xlu0 %1166  ;;  %v1480_v24 = vmul.f32 %v4652_v26, %v1464_v31 }
 0x270   : > { %v3711_v16 = vpop.permute.xlu1 %1790 }
 0x271   : > { %2683 = vset.pattern.permute.xlu1 %v4561_v36 }
 0x272   : > { %1273 = vperm.xlu1 %2683, %v1194_v8  }
 0x273   : > { %v3742_v0 = vpop.permute.xlu0 %1454 }
 0x274   : > { %v3715_v50 = vpop.permute.xlu1 %1934  ;;  %v1465_v32 = vmul.f32 %v3742_v0, %v3783_v4 }
 0x276   : > { %2684 = vset.pattern.permute.xlu1 %v4557_v49 }
 0x277   : > { %1352 = vperm.xlu1 %2684, %v1338_v56   ;;  %v1741_v27 = vpop.permute.xlu0 %1740 }
 0x278   : > { %v1019_v12 = vpop.permute.xlu1 %1018  ;;  %v1752_v19 = vmul.f32 %v1741_v27, %v3721_v35 }
 0x279   : > { %v1027_v59 = vmul.f32 %v1019_v12, %v3755_v15 }
 0x27b   : > { %2685 = vset.pattern.permute.xlu1 %v4559_v14  ;;  %v3763_v22 = vmul.f32 %v4653_v34, %v1027_v59  ;;  %v964_v29 = vpop.permute.xlu0 %963 }
 0x27c   : > { %1377 = vperm.xlu1 %2685, %v1338_v56   ;;  %v1315_v2 = vpop.permute.xlu1 %1314  ;;  %v975_v31 = vmul.f32 %v964_v29, %v3721_v35 }
 0x27d   : > { %4654 = vst [vmem:[#allocation23_spill] sm:$0xff] %v3763_v22  ;;  %v1323_v8 = vmul.f32 %v1315_v2, %v3755_v15  ;;  %v1801_v2 = vmul.f32 %v3711_v16, %v3783_v4  ;;  %v1177_v16 = vmul.f32 %v1167_v30, %v3783_v4  ;;  %v4665_v30 = vld [vmem:[#allocation26_spill] sm:$0xff] }
 0x27e   : > { %v3815_v43 = vmul.f32 %v4665_v30, %v1465_v32 }
 0x27f   : > { %v3774_v57 = vmul.f32 %v4656_v23, %v1323_v8  ;;  %v3791_v40 = vmul.f32 %v4660_v3, %v1801_v2 }
 0x280   : > { %2686 = vset.pattern.permute.xlu1 %v4561_v36  ;;  %v1745_v25 = vpop.permute.xlu1 %1744  ;;  %4666 = vst [vmem:[#allocation24_spill] sm:$0xff] %v3815_v43 }
 0x281   : > { %v1754_v6 = vmul.f32 %v1745_v25, %v3688_v11  ;;  %1417 = vperm.xlu1 %2686, %v1338_v56   ;;  %4657 = vst [vmem:[#allocation17_spill] sm:$0xff] %v3774_v57  ;;  %v4659_v56 = vld [vmem:[#allocation27_spill] sm:$0xff] }
 0x282   : > { %v1483_v48 = vmul.f32 %v4659_v56, %v1467_v55 }
 0x283   : > { %1764 = vrot.lane.b32.xlu0 %v1754_v6, %s2942_s10  ;;  %v3803_v6 = vmul.f32 %v4662_v38, %v1177_v16 }
 0x284   : > { %v1015_v12 = vpop.permute.xlu1 %1014 }
 0x285   : > { %2687 = vset.pattern.permute.xlu1 %v4557_v49  ;;  %v1025_v13 = vmul.f32 %v1015_v12, %v3783_v4  ;;  %4663 = vst [vmem:[#allocation16_spill] sm:$0xff] %v3803_v6 }
 0x286   : > { %1496 = vperm.xlu1 %2687, %v1482_v45  }
 0x287   : > { %1121 = vperm.xlu0 %2691, %v3730_v20   ;;  %v1049_v37 = vmul.f32 %v4661_v28, %v1025_v13 }
 0x288   : > { %v1311_v61 = vpop.permute.xlu1 %1310 }
 0x289   : > { %v1321_v39 = vmul.f32 %v1311_v61, %v3783_v4 }
 0x28a   : > { %2688 = vset.pattern.permute.xlu1 %v4559_v14 }
 0x28b   : > { %1521 = vperm.xlu1 %2688, %v1482_v45   ;;  %2693 = vset.pattern.permute.xlu0 %v4559_v14 }
 0x28c   : > { %1225 = vperm.xlu0 %2693, %v1192_v46   ;;  %v1747_v25 = vpop.permute.xlu1 %1746 }
 0x28d   : > { %v1755_v33 = vmul.f32 %v1747_v25, %v3755_v15 }
 0x28f   : > { %2689 = vset.pattern.permute.xlu1 %v4561_v36 }
 0x290   : > { %1561 = vperm.xlu1 %2689, %v1482_v45   ;;  %2696 = vset.pattern.permute.xlu0 %v4561_v36  ;;  %v1743_v62 = vpop.permute.xlu1 %1742  ;;  %v4664_v45 = vld [vmem:[#allocation18_spill] sm:$0xff] }
 0x291   : > { %1409 = vperm.xlu0 %2696, %v3740_v41   ;;  %v1337_v10 = vmul.f32 %v4664_v45, %v1321_v39  ;;  %v1753_v44 = vmul.f32 %v1743_v62, %v3783_v4 }
 0x294   : > { %2690 = vset.pattern.permute.xlu1 %v4559_v14 }
 0x295   : > { %1081 = vperm.xlu1 %2690, %v3730_v20   ;;  %2698 = vset.pattern.permute.xlu0 %v4559_v14 }
 0x296   : > { %1513 = vperm.xlu0 %2698, %v1480_v24  }
 0x299   : > { %2692 = vset.pattern.permute.xlu1 %v4557_v49 }
 0x29a   : > { %1198 = vperm.xlu1 %2692, %v1192_v46   ;;  %1760 = vrot.lane.b32.xlu0 %v1752_v19, %s2942_s10 }
 0x29b   : > { %2702 = vset.pattern.permute.xlu0 %v4561_v36 }
 0x29e   : > { %2694 = vset.pattern.permute.xlu1 %v4561_v36  ;;  %1133 = vperm.xlu0 %2702, %v3763_v22  }
 0x29f   : > { %1265 = vperm.xlu1 %2694, %v1192_v46   ;;  %v968_v46 = vpop.permute.xlu1 %967 }
 0x2a0   : > { %v977_v58 = vmul.f32 %v968_v46, %v3688_v11 }
 0x2a2   : > { %2704 = vset.pattern.permute.xlu0 %v4559_v14 }
 0x2a3   : > { %2695 = vset.pattern.permute.xlu1 %v4559_v14  ;;  %1237 = vperm.xlu0 %2704, %v1195_v42   ;;  %v970_v0 = vpop.permute.xlu1 %969 }
 0x2a4   : > { %1369 = vperm.xlu1 %2695, %v3740_v41  }
 0x2a7   : > { %2707 = vset.pattern.permute.xlu0 %v4561_v36  ;;  %v966_v17 = vpop.permute.xlu1 %965 }
 0x2a8   : > { %2697 = vset.pattern.permute.xlu1 %v4557_v49  ;;  %1421 = vperm.xlu0 %2707, %v3774_v57   ;;  %v976_v9 = vmul.f32 %v966_v17, %v3783_v4 }
 0x2a9   : > { %1486 = vperm.xlu1 %2697, %v1480_v24  }
 0x2ac   : > { %2709 = vset.pattern.permute.xlu0 %v4559_v14 }
 0x2ad   : > { %2699 = vset.pattern.permute.xlu1 %v4561_v36  ;;  %1525 = vperm.xlu0 %2709, %v1483_v48  }
 0x2ae   : > { %1553 = vperm.xlu1 %2699, %v1480_v24  }
 0x2b1   : > { %2710 = vset.pattern.permute.xlu0 %v4561_v36 }
 0x2b2   : > { %2700 = vset.pattern.permute.xlu1 %v4557_v49  ;;  %1565 = vperm.xlu0 %2710, %v1483_v48  }
 0x2b3   : > { %1827 = vperm.xlu1 %2700, %v3791_v40  }
 0x2b6   : > { %2711 = vset.pattern.permute.xlu0 %v4559_v14 }
 0x2b7   : > { %2701 = vset.pattern.permute.xlu1 %v4559_v14  ;;  %1085 = vperm.xlu0 %2711, %v1049_v37  }
 0x2b8   : > { %1093 = vperm.xlu1 %2701, %v3763_v22  }
 0x2bb   : > { %2714 = vset.pattern.permute.xlu0 %v4561_v36 }
 0x2bc   : > { %2703 = vset.pattern.permute.xlu1 %v4557_v49  ;;  %1269 = vperm.xlu0 %2714, %v3803_v6  }
 0x2bd   : > { %1213 = vperm.xlu1 %2703, %v1195_v42  }
 0x2c0   : > { %2716 = vset.pattern.permute.xlu0 %v4559_v14 }
 0x2c1   : > { %2705 = vset.pattern.permute.xlu1 %v4561_v36  ;;  %1373 = vperm.xlu0 %2716, %v1337_v10  }
 0x2c2   : > { %1277 = vperm.xlu1 %2705, %v1195_v42   ;;  %v978_v42 = vmul.f32 %v970_v0, %v3755_v15 }
 0x2c5   : > { %2719 = vset.pattern.permute.xlu0 %v4561_v36 }
 0x2c6   : > { %2706 = vset.pattern.permute.xlu1 %v4559_v14  ;;  %1557 = vperm.xlu0 %2719, %v3815_v43  }
 0x2c7   : > { %1381 = vperm.xlu1 %2706, %v3774_v57  }
 0x2ca   : > { %987 = vrot.lane.b32.xlu0 %v977_v58, %s2942_s10 }
 0x2cb   : > { %2708 = vset.pattern.permute.xlu1 %v4557_v49  ;;  %2720 = vset.pattern.permute.xlu0 %v4559_v14 }
 0x2cc   : > { %1501 = vperm.xlu1 %2708, %v1483_v48   ;;  %v3829_v26 = vpop.permute.xlu1 %1832 }
 0x2ce   : > { %983 = vrot.lane.b32.xlu0 %v975_v31, %s2942_s10 }
 0x2d0   : > { %1766 = vrot.lane.b32.xlu1 %v1755_v33, %s2942_s10 }
 0x2d4   : > { %1059 = vperm.xlu1 %2708, %v1049_v37  }
 0x2d8   : > { %2712 = vset.pattern.permute.xlu1 %v4561_v36  ;;  %v3832_v24 = vpop.permute.xlu1 %1064 }
 0x2d9   : > { %1125 = vperm.xlu1 %2712, %v1049_v37  }
 0x2dd   : > { %2713 = vset.pattern.permute.xlu1 %v4559_v14  ;;  %v3835_v27 = vpop.permute.xlu1 %1089 }
 0x2de   : > { %1229 = vperm.xlu1 %2713, %v3803_v6  }
 0x2e2   : > { %2715 = vset.pattern.permute.xlu1 %v4557_v49  ;;  %v3839_v19 = vpop.permute.xlu1 %1129 }
 0x2e3   : > { %1347 = vperm.xlu1 %2715, %v1337_v10  }
 0x2e7   : > { %2717 = vset.pattern.permute.xlu1 %v4561_v36  ;;  %v3842_v59 = vpop.permute.xlu1 %1208 }
 0x2e8   : > { %1413 = vperm.xlu1 %2717, %v1337_v10  }
 0x2ec   : > { %2718 = vset.pattern.permute.xlu1 %v4559_v14  ;;  %v3845_v34 = vpop.permute.xlu1 %1233 }
 0x2ed   : > { %1517 = vperm.xlu1 %2718, %v3815_v43  }
 0x2f1   : > { %1762 = vrot.lane.b32.xlu1 %v1753_v44, %s2942_s10  ;;  %v3850_v21 = vpop.permute.xlu1 %1273 }
 0x2f5   : > { %v1765_v8 = vpop.permute.xlu0 %1764  ;;  %989 = vrot.lane.b32.xlu1 %v978_v42, %s2942_s10 }
 0x2f6   : > { %v3854_v23 = vpop.permute.xlu1 %1352  ;;  %v1778_v55 = vsel %vm995_vm3, %v1765_v8, 0.0 }
 0x2f7   : > { %1779 = vadd.xlane.f32.xlu0 %v1778_v55 }
 0x2f9   : > { %985 = vrot.lane.b32.xlu1 %v976_v9, %s2942_s10 }
 0x2fb   : > { %v3859_v7 = vpop.permute.xlu1 %1377 }
 0x300   : > { %v3861_v56 = vpop.permute.xlu1 %1417 }
 0x305   : > { %v3863_v48 = vpop.permute.xlu1 %1496 }
 0x306   : > { %v3865_v12 = vpop.permute.xlu0 %1121 }
 0x30a   : > { %v3867_v2 = vpop.permute.xlu1 %1521 }
 0x30b   : > { %v3869_v3 = vpop.permute.xlu0 %1225 }
 0x30f   : > { %v3871_v13 = vpop.permute.xlu1 %1561 }
 0x310   : > { %v3873_v61 = vpop.permute.xlu0 %1409 }
 0x314   : > { %v3875_v28 = vpop.permute.xlu1 %1081 }
 0x315   : > { %v3877_v37 = vpop.permute.xlu0 %1513 }
 0x319   : > { %v1761_v16 = vpop.permute.xlu0 %1760  ;;  %v3879_v25 = vpop.permute.xlu1 %1198 }
 0x31a   : > { %4667 = vst [vmem:[#allocation67_spill] sm:$0xff] %v3879_v25  ;;  %v1772_v38 = vsel %vm995_vm3, %v1761_v16, 0.0 }
 0x31b   : > { %1773 = vadd.xlane.f32.xlu0 %v1772_v38 }
 0x31d   : > { %v3882_v39 = vpop.permute.xlu0 %1133 }
 0x31e   : > { %v1266_v62 = vpop.permute.xlu1 %1265 }
 0x322   : > { %v3884_v45 = vpop.permute.xlu0 %1237 }
 0x323   : > { %v1370_v10 = vpop.permute.xlu1 %1369 }
 0x327   : > { %v3886_v32 = vpop.permute.xlu0 %1421 }
 0x328   : > { %v3888_v30 = vpop.permute.xlu1 %1486 }
 0x329   : > { %4668 = vst [vmem:[#allocation21_spill] sm:$0xff] %v3888_v30 }
 0x32c   : > { %v3890_v46 = vpop.permute.xlu0 %1525 }
 0x32d   : > { %v3892_v58 = vpop.permute.xlu1 %1553 }
 0x331   : > { %v3894_v29 = vpop.permute.xlu0 %1565 }
 0x332   : > { %v3896_v0 = vpop.permute.xlu1 %1827 }
 0x336   : > { %v3898_v31 = vpop.permute.xlu0 %1085 }
 0x337   : > { %v3900_v33 = vpop.permute.xlu1 %1093 }
 0x33b   : > { %v3904_v44 = vpop.permute.xlu0 %1269 }
 0x33c   : > { %v3902_v17 = vpop.permute.xlu1 %1213 }
 0x33d   : > { %4669 = vst [vmem:[#allocation15_spill] sm:$0xff] %v3902_v17 }
 0x340   : > { %v3908_v8 = vpop.permute.xlu0 %1373 }
 0x341   : > { %v3906_v42 = vpop.permute.xlu1 %1277 }
 0x345   : > { %v3912_v9 = vpop.permute.xlu0 %1557 }
 0x346   : > { %v3910_v55 = vpop.permute.xlu1 %1381 }
 0x349   : > { %v988_v38 = vpop.permute.xlu0 %987 }
 0x34a   : > { %v1002_v30 = vsel %vm995_vm3, %v988_v38, 0.0 }
 0x34b   : > { %v3914_v16 = vpop.permute.xlu1 %1501 }
 0x34c   : > { %4670 = vst [vmem:[#allocation22_spill] sm:$0xff] %v3914_v16 }
 0x34d   : > { %v984_v17 = vpop.permute.xlu0 %983 }
 0x34e   : > { %v996_v43 = vsel %vm995_vm3, %v984_v17, 0.0 }
 0x34f   : > { %v1767_v49 = vpop.permute.xlu1 %1766 }
 0x350   : > { %v1781_v14 = vsel %vm995_vm3, %v1767_v49, 0.0 }
 0x351   : > { %1782 = vadd.xlane.f32.xlu0 %v1781_v14 }
 0x353   : > { %v3917_v36 = vpop.permute.xlu1 %1059 }
 0x355   : > { %1003 = vadd.xlane.f32.xlu0 %v1002_v30 }
 0x358   : > { %v1126_v25 = vpop.permute.xlu1 %1125 }
 0x359   : > { %997 = vadd.xlane.f32.xlu0 %v996_v43  ;;  %v4672_v43 = vld [vmem:[#allocation36_spill] sm:$0xff] }
 0x35a   : > { %v1138_v20 = vmul.f32 %v4672_v43, %v3839_v19  ;;  %v4674_v19 = vld [vmem:[#allocation52_spill] sm:$0xff] }
 0x35d   : > { %v3921_v57 = vpop.permute.xlu1 %1229 }
 0x362   : > { %v3923_v41 = vpop.permute.xlu1 %1347 }
 0x363   : > { %4671 = vst [vmem:[#allocation19_spill] sm:$0xff] %v3923_v41  ;;  %v1098_v41 = vmul.f32 %v4672_v43, %v3835_v27  ;;  %v1386_v27 = vmul.f32 %v4674_v19, %v3859_v7 }
 0x367   : > { %v3925_v16 = vpop.permute.xlu1 %1413 }
 0x36c   : > { %v3927_v6 = vpop.permute.xlu1 %1517 }
 0x370   : > { %v1763_v49 = vpop.permute.xlu1 %1762 }
 0x371   : > { %v1775_v14 = vsel %vm995_vm3, %v1763_v49, 0.0  ;;  %v4673_v49 = vld [vmem:[#allocation44_spill] sm:$0xff] }
 0x372   : > { %1776 = vadd.xlane.f32.xlu1 %v1775_v14  ;;  %v1242_v14 = vmul.f32 %v4673_v49, %v3845_v34  ;;  %v4676_v34 = vld [vmem:[#allocation38_spill] sm:$0xff] }
 0x373   : > { %v1136_v7 = vmul.f32 %v3865_v12, %v4676_v34  ;;  %v4680_v12 = vld [vmem:[#allocation48_spill] sm:$0xff] }
 0x374   : > { %v990_v22 = vpop.permute.xlu1 %989 }
 0x375   : > { %v1005_v38 = vsel %vm995_vm3, %v990_v22, 0.0  ;;  %v1282_v22 = vmul.f32 %v4673_v49, %v3850_v21  ;;  %v1096_v21 = vmul.f32 %v3875_v28, %v4676_v34 }
 0x376   : > { %1006 = vadd.xlane.f32.xlu0 %v1005_v38  ;;  %v1426_v38 = vmul.f32 %v4674_v19, %v3861_v56 }
 0x378   : > { %v986_v30 = vpop.permute.xlu1 %985 }
 0x379   : > { %v999_v17 = vsel %vm995_vm3, %v986_v30, 0.0  ;;  %v4677_v30 = vld [vmem:[#allocation46_spill] sm:$0xff] }
 0x37a   : > { %1000 = vadd.xlane.f32.xlu1 %v999_v17  ;;  %v1280_v17 = vmul.f32 %v1266_v62, %v4677_v30  ;;  %v1240_v28 = vmul.f32 %v3869_v3, %v4677_v30 }
 0x38b   : > { %1148 = vrot.lane.b32.xlu1 %v1138_v20, %s2943_s11  ;;  %v4675_v20 = vld [vmem:[#allocation29_spill] sm:$0xff] }
 0x38c   : > { %1108 = vrot.lane.b32.xlu0 %v1098_v41, %s2932_s29  ;;  %v1530_v41 = vmul.f32 %v4675_v20, %v3867_v2  ;;  %v1570_v56 = vmul.f32 %v4675_v20, %v3871_v13  ;;  %v4678_v2 = vld [vmem:[#allocation54_spill] sm:$0xff]  ;;  %v4679_v13 = vld [vmem:[#allocation41_spill] sm:$0xff] }
 0x38d   : > { %v1424_v62 = vmul.f32 %v3873_v61, %v4678_v2 }
 0x38f   : > { %1252 = vrot.lane.b32.xlu1 %v1242_v14, %s2932_s29  ;;  %v1384_v14 = vmul.f32 %v1370_v10, %v4678_v2  ;;  %v1243_v10 = vmul.f32 %v4680_v12, %v3884_v45 }
 0x390   : > { %1292 = vrot.lane.b32.xlu0 %v1282_v22, %s2943_s11  ;;  %v1139_v22 = vmul.f32 %v4679_v13, %v3882_v39 }
 0x393   : > { %1436 = vrot.lane.b32.xlu1 %v1426_v38, %s2943_s11  ;;  %v4681_v38 = vld [vmem:[#allocation31_spill] sm:$0xff] }
 0x394   : > { %1396 = vrot.lane.b32.xlu0 %v1386_v27, %s2932_s29  ;;  %v1528_v3 = vmul.f32 %v3877_v37, %v4681_v38  ;;  %v4682_v27 = vld [vmem:[#allocation57_spill] sm:$0xff]  ;;  %v1568_v61 = vmul.f32 %v3892_v58, %v4681_v38  ;;  %v1099_v37 = vmul.f32 %v4679_v13, %v3900_v33  ;;  %v1283_v58 = vmul.f32 %v4680_v12, %v3906_v42  ;;  %v4685_v33 = vld [vmem:[#allocation50_spill] sm:$0xff] }
 0x395   : > { %v1427_v39 = vmul.f32 %v4682_v27, %v3886_v32  ;;  %v4686_v42 = vld [vmem:[#allocation10_spill] sm:$0xff] }
 0x397   : > { %1540 = vrot.lane.b32.xlu1 %v1530_v41, %s2932_s29  ;;  %v4683_v41 = vld [vmem:[#allocation32_spill] sm:$0xff] }
 0x398   : > { %1104 = vrot.lane.b32.xlu0 %v1096_v21, %s2932_s29  ;;  %v1531_v45 = vmul.f32 %v4683_v41, %v3890_v46  ;;  %v1571_v32 = vmul.f32 %v4683_v41, %v3894_v29  ;;  %v4684_v21 = vld [vmem:[#allocation43_spill] sm:$0xff]  ;;  %v1387_v46 = vmul.f32 %v4682_v27, %v3910_v55 }
 0x399   : > { %v1097_v29 = vmul.f32 %v3898_v31, %v4684_v21  ;;  %v4688_v31 = vld [vmem:[#allocation12_spill] sm:$0xff] }
 0x39b   : > { %1580 = vrot.lane.b32.xlu1 %v1570_v56, %s2943_s11  ;;  %v1137_v56 = vmul.f32 %v1126_v25, %v4684_v21  ;;  %v1281_v25 = vmul.f32 %v3904_v44, %v4685_v33  ;;  %v4689_v44 = vld [vmem:[#allocation13_spill] sm:$0xff] }
 0x39c   : > { %1288 = vrot.lane.b32.xlu0 %v1280_v17, %s2943_s11  ;;  %v1241_v17 = vmul.f32 %v3921_v57, %v4685_v33  ;;  %v4687_v57 = vld [vmem:[#allocation59_spill] sm:$0xff] }
 0x39d   : > { %v1385_v55 = vmul.f32 %v3908_v8, %v4687_v57  ;;  %v4690_v8 = vld [vmem:[#allocation60_spill] sm:$0xff] }
 0x39f   : > { %1144 = vrot.lane.b32.xlu1 %v1136_v7, %s2943_s11 }
 0x3a0   : > { %1392 = vrot.lane.b32.xlu0 %v1384_v14, %s2932_s29  ;;  %v1803_v14 = vmul.f32 %v3698_v63, %v3755_v15 }
 0x3a3   : > { %1248 = vrot.lane.b32.xlu1 %v1240_v28, %s2932_s29 }
 0x3a4   : > { %1150 = vrot.lane.b32.xlu0 %v1139_v22, %s2943_s11  ;;  %v4044_v22 = vpop.xlane.xlu0 %1779 }
 0x3a5   : > { %4693 = vst [vmem:[#allocation68_spill] sm:$0xff] %v4044_v22 }
 0x3a7   : > { %1432 = vrot.lane.b32.xlu1 %v1424_v62, %s2943_s11 }
 0x3a8   : > { %1254 = vrot.lane.b32.xlu0 %v1243_v10, %s2932_s29  ;;  %v4046_v62 = vpop.xlane.xlu0 %1773 }
 0x3a9   : > { %4694 = vst [vmem:[#allocation27_spill] sm:$0xff] %v4046_v62 }
 0x3ab   : > { %1536 = vrot.lane.b32.xlu1 %v1528_v3, %s2932_s29 }
 0x3ac   : > { %1438 = vrot.lane.b32.xlu0 %v1427_v39, %s2943_s11 }
 0x3af   : > { %1576 = vrot.lane.b32.xlu1 %v1568_v61, %s2943_s11 }
 0x3b0   : > { %1542 = vrot.lane.b32.xlu0 %v1531_v45, %s2932_s29 }
 0x3b3   : > { %1110 = vrot.lane.b32.xlu1 %v1099_v37, %s2932_s29 }
 0x3b4   : > { %1582 = vrot.lane.b32.xlu0 %v1571_v32, %s2943_s11  ;;  %v1074_v32 = vmul.f32 %v4672_v43, %v3832_v24 }
 0x3b7   : > { %1294 = vrot.lane.b32.xlu1 %v1283_v58, %s2943_s11 }
 0x3b8   : > { %1146 = vrot.lane.b32.xlu0 %v1137_v56, %s2943_s11 }
 0x3bb   : > { %1398 = vrot.lane.b32.xlu1 %v1387_v46, %s2932_s29 }
 0x3bc   : > { %1250 = vrot.lane.b32.xlu0 %v1241_v17, %s2932_s29  ;;  %v1218_v17 = vmul.f32 %v4673_v49, %v3842_v59  ;;  %v1506_v59 = vmul.f32 %v4675_v20, %v3863_v48 }
 0x3bf   : > { %1106 = vrot.lane.b32.xlu1 %v1097_v29, %s2932_s29 }
 0x3c0   : > { %2080 = vrot.lane.b32.xlu0 %v3657_v51, %s2939_s9  ;;  %v1800_v51 = vmul.f32 %v3706_v5, %v3721_v35  ;;  %v4692_v5 = vmov 101  }
 0x3c2   : > { %v4032_v7 = vmul.f32 %v4690_v8, %v1800_v51  ;;  %v1362_v51 = vmul.f32 %v4674_v19, %v3854_v23 }
 0x3c3   : > { %1290 = vrot.lane.b32.xlu1 %v1281_v25, %s2943_s11 }
 0x3c4   : > { %2094 = vrot.lane.b32.xlu0 %v4686_v42, %s2934_s4 }
 0x3c7   : > { %1394 = vrot.lane.b32.xlu1 %v1385_v55, %s2932_s29 }
 0x3c8   : > { %2098 = vrot.lane.b32.xlu0 %v4688_v31, %s2934_s4 }
 0x3cb   : > { %2078 = vrot.lane.b32.xlu1 %v3669_v54, %s2939_s9  ;;  %v4691_v54 = vld [vmem:[#allocation62_spill] sm:$0xff] }
 0x3cc   : > { %1853 = vperm.xlu0 %2720, %v3791_v40   ;;  %v4039_v28 = vmul.f32 %v4691_v54, %v1803_v14 }
 0x3cf   : > { %2082 = vrot.lane.b32.xlu1 %v3665_v53, %s2939_s9  ;;  %v4569_v53 = vmov 1  }
 0x3d0   : > { %2725 = vset.pattern.permute.xlu0 %v4569_v53 }
 0x3d3   : > { %2096 = vrot.lane.b32.xlu1 %v4689_v44, %s2934_s4 }
 0x3d7   : > { %1849 = vperm.xlu1 %2718, %v4032_v7  }
 0x3db   : > { %1857 = vperm.xlu1 %2718, %v3692_v47  }
 0x3de   : > { %v4048_v10 = vpop.xlane.xlu0 %1782 }
 0x3df   : > { %1861 = vperm.xlu1 %2718, %v4039_v28   ;;  %4695 = vst [vmem:[#allocation61_spill] sm:$0xff] %v4048_v10  ;;  %v4710_v10 = vld [vmem:[#allocation42_spill] sm:$0xff] }
 0x3e2   : > { %v4050_v3 = vpop.xlane.xlu0 %1003 }
 0x3e3   : > { %2721 = vset.pattern.permute.xlu1 %v4692_v5  ;;  %4696 = vst [vmem:[#allocation14_spill] sm:$0xff] %v4050_v3  ;;  %v4714_v3 = vld [vmem:[#allocation9_spill] sm:$0xff] }
 0x3e6   : > { %v4052_v63 = vpop.xlane.xlu0 %997 }
 0x3e7   : > { %4697 = vst [vmem:[#allocation20_spill] sm:$0xff] %v4052_v63 }
 0x3ff   : > { %v4054_v39 = vpop.xlane.xlu1 %1776 }
 0x400   : > { %4698 = vst [vmem:[#allocation18_spill] sm:$0xff] %v4054_v39 }
 0x403   : > { %v4056_v61 = vpop.xlane.xlu0 %1006 }
 0x404   : > { %4699 = vst [vmem:[#allocation26_spill] sm:$0xff] %v4056_v61 }
 0x407   : > { %v1109_v45 = vpop.permute.xlu0 %1108  ;;  %v4058_v37 = vpop.xlane.xlu1 %1000 }
 0x408   : > { %4700 = vst [vmem:[#allocation36_spill] sm:$0xff] %v4058_v37  ;;  %v1118_v58 = vadd.f32 %v1109_v45, %v1074_v32 }
 0x40b   : > { %v1293_v56 = vpop.permute.xlu0 %1292  ;;  %v1149_v46 = vpop.permute.xlu1 %1148 }
 0x40c   : > { %v1158_v29 = vadd.f32 %v1149_v46, %v1118_v58 }
 0x40e   : > { %v1222_v25 = vadd.f32 %v1218_v17, %v1158_v29 }
 0x40f   : > { %v1397_v42 = vpop.permute.xlu0 %1396  ;;  %v1253_v55 = vpop.permute.xlu1 %1252 }
 0x410   : > { %v1262_v31 = vadd.f32 %v1253_v55, %v1222_v25 }
 0x412   : > { %v1302_v44 = vadd.f32 %v1293_v56, %v1262_v31 }
 0x413   : > { %v4066_v8 = vpop.permute.xlu0 %1104  ;;  %v1437_v14 = vpop.permute.xlu1 %1436 }
 0x414   : > { %v1366_v54 = vadd.f32 %v1362_v51, %v1302_v44 }
 0x416   : > { %v1406_v24 = vadd.f32 %v1397_v42, %v1366_v54 }
 0x417   : > { %v4068_v43 = vpop.permute.xlu0 %1288  ;;  %v4070_v45 = vpop.permute.xlu1 %1540 }
 0x418   : > { %4701 = vst [vmem:[#allocation44_spill] sm:$0xff] %v4070_v45  ;;  %v1446_v49 = vadd.f32 %v1437_v14, %v1406_v24 }
 0x41a   : > { %v4074_v32 = vadd.f32 %v1506_v59, %v1446_v49  ;;  %v1073_v59 = vmul.f32 %v3917_v36, %v4684_v21  ;;  %v4711_v36 = vld [vmem:[#allocation39_spill] sm:$0xff] }
 0x41b   : > { %v4076_v58 = vpop.permute.xlu0 %1392  ;;  %v4078_v46 = vpop.permute.xlu1 %1580 }
 0x41c   : > { %4702 = vst [vmem:[#allocation52_spill] sm:$0xff] %v4074_v32  ;;  %4703 = vst [vmem:[#allocation29_spill] sm:$0xff] %v4078_v46 }
 0x41f   : > { %v4080_v23 = vpop.permute.xlu0 %1150  ;;  %v4082_v19 = vpop.permute.xlu1 %1144 }
 0x423   : > { %v4084_v56 = vpop.permute.xlu0 %1254  ;;  %v4086_v17 = vpop.permute.xlu1 %1248 }
 0x427   : > { %v4088_v29 = vpop.permute.xlu0 %1438  ;;  %v4090_v25 = vpop.permute.xlu1 %1432 }
 0x428   : > { %4704 = vst [vmem:[#allocation38_spill] sm:$0xff] %v4088_v29 }
 0x42b   : > { %v4092_v48 = vpop.permute.xlu0 %1542  ;;  %v4094_v20 = vpop.permute.xlu1 %1536 }
 0x42c   : > { %4705 = vst [vmem:[#allocation46_spill] sm:$0xff] %v4092_v48  ;;  %4706 = vst [vmem:[#allocation54_spill] sm:$0xff] %v4094_v20 }
 0x42f   : > { %v4096_v42 = vpop.permute.xlu0 %1582  ;;  %v4098_v55 = vpop.permute.xlu1 %1576 }
 0x430   : > { %4707 = vst [vmem:[#allocation41_spill] sm:$0xff] %v4096_v42  ;;  %4708 = vst [vmem:[#allocation48_spill] sm:$0xff] %v4098_v55 }
 0x433   : > { %v1147_v31 = vpop.permute.xlu0 %1146  ;;  %v4100_v51 = vpop.permute.xlu1 %1110 }
 0x437   : > { %v4102_v44 = vpop.permute.xlu0 %1250  ;;  %v4104_v14 = vpop.permute.xlu1 %1294 }
 0x43b   : > { %v2081_v54 = vpop.permute.xlu0 %2080  ;;  %v4106_v24 = vpop.permute.xlu1 %1398 }
 0x43c   : > { %4709 = vst [vmem:[#allocation31_spill] sm:$0xff] %v4106_v24  ;;  %v4741_v24 = vld [vmem:[#allocation24_spill] sm:$0xff] }
 0x43f   : > { %v1107_v49 = vpop.permute.xlu1 %1106  ;;  %v2095_v53 = vpop.permute.xlu0 %2094 }
 0x440   : > { %v1117_v20 = vadd.f32 %v1107_v49, %v1073_v59  ;;  %v4713_v49 = vld [vmem:[#allocation6_spill] sm:$0xff] }
 0x441   : > { %v4124_v39 = vpack.i.bf16 %v4714_v3, %v4713_v49 }
 0x442   : > { %v4110_v62 = vadd.f32 %v1147_v31, %v1117_v20  ;;  %v4712_v31 = vld [vmem:[#allocation37_spill] sm:$0xff] }
 0x443   : > { %v4112_v63 = vpop.permute.xlu1 %1290  ;;  %v2099_v55 = vpop.permute.xlu0 %2098 }
 0x447   : > { %v4114_v42 = vpop.permute.xlu1 %1394 }
 0x44b   : > { %v1854_v48 = vpop.permute.xlu0 %1853  ;;  %v2079_v46 = vpop.permute.xlu1 %2078 }
 0x44c   : > { %v1865_v61 = vmul.f32 %v1854_v48, %v4710_v10  ;;  %v4715_v48 = vld [vmem:[#allocation40_spill] sm:$0xff] }
 0x44e   : > { %1874 = vrot.lane.b32.xlu1 %v1865_v61, %s2932_s29  ;;  %v4571_v61 = vmov 2  }
 0x44f   : > { %v2083_v45 = vpop.permute.xlu1 %2082 }
 0x453   : > { %v2097_v32 = vpop.permute.xlu1 %2096 }
 0x457   : > { %v1850_v22 = vpop.permute.xlu1 %1849 }
 0x458   : > { %v1864_v21 = vmul.f32 %v1850_v22, %v4711_v36  ;;  %v1946_v22 = vmul.f32 %v3700_v60, %v3688_v11  ;;  %v1425_v60 = vmul.f32 %v3925_v16, %v4687_v57 }
 0x45a   : > { %1872 = vrot.lane.b32.xlu0 %v1864_v21, %s2932_s29  ;;  %v4716_v21 = vld [vmem:[#allocation7_spill] sm:$0xff] }
 0x45b   : > { %v1858_v20 = vpop.permute.xlu1 %1857 }
 0x45c   : > { %v1866_v59 = vmul.f32 %v4712_v31, %v1858_v20  ;;  %v4717_v20 = vld [vmem:[#allocation64_spill] sm:$0xff] }
 0x45d   : > { %v1962_v3 = vmul.f32 %v4717_v20, %v1946_v22  ;;  %v4722_v20 = vld [vmem:[#allocation65_spill] sm:$0xff] }
 0x45e   : > { %1876 = vrot.lane.b32.xlu0 %v1866_v59, %s2932_s29  ;;  %v4720_v59 = vld [vmem:[#allocation63_spill] sm:$0xff] }
 0x45f   : > { %v1862_v37 = vpop.permute.xlu1 %1861 }
 0x460   : > { %v1867_v29 = vmul.f32 %v4715_v48, %v1862_v37  ;;  %v4718_v37 = vmov 100  }
 0x462   : > { %2727 = vperm.xlu0 %2725, %v4124_v39   ;;  %1878 = vrot.lane.b32.xlu1 %v1867_v29, %s2932_s29  ;;  %v1945_v29 = vmul.f32 %v3715_v50, %v3783_v4  ;;  %v1947_v50 = vmul.f32 %v3704_v52, %v3755_v15  ;;  %v2089_v52 = vmul.f32 %v2079_v46, %v3783_v4  ;;  %v4723_v4 = vmov 1  }
 0x463   : > { %v1842_v46 = vmul.f32 %v4712_v31, %v3829_v26 }
 0x464   : > { %v4146_v49 = vmul.f32 %v4720_v59, %v1945_v29  ;;  %v4160_v29 = vmul.f32 %v4722_v20, %v1947_v50  ;;  %v4728_v50 = vld [vmem:[#allocation28_spill] sm:$0xff] }
 0x466   : > { %2739 = vset.pattern.permute.xlu0 %v4571_v61  ;;  %1893 = vperm.xlu1 %2721, %v3791_v40   ;;  %v4719_v40 = vld [vmem:[#allocation11_spill] sm:$0xff] }
 0x467   : > { %2301 = vperm.xlu0 %2739, %v4716_v21  }
 0x46a   : > { %1932 = vrot.lane.b32.xlu1 %v3629_v18, %s2939_s9  ;;  %v4721_v18 = vld [vmem:[#allocation34_spill] sm:$0xff] }
 0x46b   : > { %2740 = vset.pattern.permute.xlu0 %v4718_v37  ;;  %2722 = vset.pattern.permute.xlu1 %v4718_v37  ;;  %v1529_v22 = vmul.f32 %v3927_v6, %v4721_v18  ;;  %v1569_v16 = vmul.f32 %v3912_v9, %v4721_v18  ;;  %v4169_v6 = vmul.f32 %v2095_v53, %v2089_v52  ;;  %v4739_v18 = vld [vmem:[#allocation66_spill] sm:$0xff] }
 0x46c   : > { %2001 = vperm.xlu0 %2740, %v1962_v3   ;;  %v2091_v9 = vmul.f32 %v2083_v45, %v3755_v15  ;;  %v1841_v15 = vmul.f32 %v3896_v0, %v4710_v10  ;;  %v4729_v0 = vld [vmem:[#allocation35_spill] sm:$0xff] }
 0x46e   : > { %1948 = vrot.lane.b32.xlu1 %v4719_v40, %s2933_s30  ;;  %v4177_v59 = vmul.f32 %v2099_v55, %v2091_v9  ;;  %v4730_v9 = vld [vmem:[#allocation33_spill] sm:$0xff]  ;;  %s2864_s30 = scalar_lea.vmem %s4433_s25, 128 }
 0x46f   : > { %p2865_p0 = scmp.ne.s32.totalorder %s4433_s25, %s2864_s30 }
 0x470   : > { %1434 = vrot.lane.b32.xlu0 %v1425_v60, %s2943_s11 }
 0x471   : > { %p2866_p1 = pnand %p2865_p0, %p3008_p6 }
 0x472   : > { %1997 = vperm.xlu1 %2722, %v4146_v49  }
 0x473   : > { %p2867_p2 = pneg %p2866_p1 }
 0x474   : > { %1538 = vrot.lane.b32.xlu0 %v1529_v22, %s2932_s29 }
 0x476   : > { %2076 = vrot.lane.b32.xlu1 %v3639_v1, %s2939_s9  ;;  %v2090_v1 = vmul.f32 %v2081_v54, %v3688_v11  ;;  %v4724_v11 = vmov 99  }
 0x478   : > { %1578 = vrot.lane.b32.xlu0 %v1569_v16, %s2943_s11  ;;  %v4174_v60 = vmul.f32 %v2097_v32, %v2090_v1 }
 0x47a   : > { %2005 = vperm.xlu1 %2722, %v4160_v29  }
 0x47e   : > { %2723 = vset.pattern.permute.xlu1 %v4692_v5 }
 0x47f   : > { %2041 = vperm.xlu1 %2723, %v1962_v3  }
 0x483   : > { %2092 = vrot.lane.b32.xlu1 %v4719_v40, %s2934_s4  ;;  %s2868_s4 = sshll.u32 %s2948_s16, 4  ;;  %s2869_s4 = int_to_ptr.vmem [resolvable:$false] %s2868_s4 }
 0x484   : > { %2724 = vset.pattern.permute.xlu1 %v4718_v37  ;;  %s2870_s5 = scalar_lea.vmem %s2869_s4, 256  ;;  %p2871_p3 = scmp.lt.s32.totalorder %s4433_s25, %s2869_s4 }
 0x485   : > { %p2872_p4 = scmp.lt.s32.totalorder %s2870_s5, %s2864_s30 }
 0x487   : > { %2141 = vperm.xlu1 %2724, %v4169_v6   ;;  %p2873_p5 = por %p2872_p4, %p2871_p3 }
 0x489   : > { %p2874_p7 = pnand %p2873_p5, %p2867_p2 }
 0x48b   : > { %2145 = vperm.xlu1 %2724, %v4174_v60  }
 0x48f   : > { %2149 = vperm.xlu1 %2724, %v4177_v59  }
 0x493   : > { %2731 = vset.pattern.permute.xlu1 %v4723_v4 }
 0x494   : > { %2261 = vperm.xlu1 %2731, %v4716_v21  }
 0x498   : > { %2732 = vset.pattern.permute.xlu1 %v4571_v61 }
 0x499   : > { %2734 = vperm.xlu1 %2732, %v4124_v39  }
 0x49d   : > { %2738 = vset.pattern.permute.xlu1 %v4692_v5 }
 0x49e   : > { %2189 = vperm.xlu1 %2738, %v4177_v59  }
 0x4a2   : > { %2741 = vset.pattern.permute.xlu1 %v4724_v11 }
 0x4a3   : > { %1971 = vperm.xlu1 %2741, %v4146_v49  }
 0x4a7   : > { %1976 = vperm.xlu1 %2741, %v1962_v3  }
 0x4ab   : > { %1981 = vperm.xlu1 %2741, %v4160_v29  }
 0x4af   : > { %2742 = vset.pattern.permute.xlu1 %v4692_v5 }
 0x4c0   : > { %v1875_v53 = vpop.permute.xlu1 %1874 }
 0x4c1   : > { %v4192_v45 = vadd.f32 %v1875_v53, %v1841_v15 }
 0x4cc   : > { %v4194_v32 = vpop.permute.xlu0 %1872 }
 0x4cd   : > { %4725 = vst [vmem:[#allocation57_spill] sm:$0xff] %v4194_v32 }
 0x4d0   : > { %v1877_v55 = vpop.permute.xlu0 %1876 }
 0x4d1   : > { %v4198_v54 = vadd.f32 %v1877_v55, %v1842_v46 }
 0x4d3   : > { %4726 = vst [vmem:[#allocation43_spill] sm:$0xff] %v4198_v54  ;;  %v4735_v54 = vld [vmem:[#allocation45_spill] sm:$0xff] }
 0x4d4   : > { %v4200_v37 = vpop.permute.xlu1 %1878 }
 0x4d5   : > { %4727 = vst [vmem:[#allocation50_spill] sm:$0xff] %v4200_v37 }
 0x4e1   : > { %v2728_v3 = vpop.permute.xlu0 %2727 }
 0x4e2   : > { %v2730_v40 = vunpack.i.h.bf16 %v2728_v3  ;;  %v2729_v22 = vunpack.i.l.bf16 %v2728_v3 }
 0x4e4   : > { %v4203_v16 = vmul.f32 %v2730_v40, %v4728_v50  ;;  %v4206_v20 = vmul.f32 %v2729_v22, %v4729_v0  ;;  %v4732_v22 = vld [vmem:[#allocation51_spill] sm:$0xff] }
 0x4e5   : > { %v1894_v52 = vpop.permute.xlu1 %1893 }
 0x4e6   : > { %v2302_v1 = vpop.permute.xlu0 %2301  ;;  %v1905_v40 = vmul.f32 %v1894_v52, %v4710_v10 }
 0x4e7   : > { %v4209_v15 = vmul.f32 %v4730_v9, %v2302_v1 }
 0x4e9   : > { %4731 = vst [vmem:[#allocation10_spill] sm:$0xff] %v4209_v15  ;;  %v1933_v26 = vpop.permute.xlu1 %1932 }
 0x4ea   : > { %v1944_v53 = vmul.f32 %v1933_v26, %v3721_v35  ;;  %v4733_v26 = vld [vmem:[#allocation49_spill] sm:$0xff] }
 0x4ed   : > { %v1949_v46 = vpop.permute.xlu1 %1948 }
 0x4ee   : > { %v4212_v55 = vmul.f32 %v1949_v46, %v1944_v53  ;;  %v4734_v46 = vld [vmem:[#allocation8_spill] sm:$0xff] }
 0x4f0   : > { %2033 = vperm.xlu1 %2742, %v4212_v55   ;;  %1993 = vperm.xlu0 %2740, %v4212_v55  }
 0x4f1   : > { %v1998_v3 = vpop.permute.xlu1 %1997 }
 0x4f2   : > { %v2009_v61 = vmul.f32 %v1998_v3, %v4732_v22 }
 0x4f4   : > { %1914 = vrot.lane.b32.xlu1 %v1905_v40, %s2943_s11 }
 0x4f5   : > { %v2077_v32 = vpop.permute.xlu1 %2076  ;;  %2743 = vset.pattern.permute.xlu1 %v4724_v11 }
 0x4f6   : > { %v2088_v10 = vmul.f32 %v2077_v32, %v3721_v35 }
 0x4f8   : > { %2120 = vperm.xlu1 %2743, %v4174_v60  }
 0x4f9   : > { %v2006_v1 = vpop.permute.xlu1 %2005 }
 0x4fa   : > { %v2011_v53 = vmul.f32 %v4733_v26, %v2006_v1 }
 0x4fc   : > { %2745 = vset.pattern.permute.xlu1 %v4723_v4 }
 0x4fd   : > { %2249 = vperm.xlu1 %2745, %v4734_v46  }
 0x4fe   : > { %v2042_v37 = vpop.permute.xlu1 %2041 }
 0x4ff   : > { %v2050_v15 = vmul.f32 %v4735_v54, %v2042_v37  ;;  %v4574_v37 = vmov 0  }
 0x501   : > { %2746 = vset.pattern.permute.xlu1 %v4574_v37  ;;  %v4738_v37 = vld [vmem:[#allocation16_spill] sm:$0xff] }
 0x502   : > { %v2093_v52 = vpop.permute.xlu1 %2092 }
 0x503   : > { %v4226_v3 = vmul.f32 %v2093_v52, %v2088_v10 }
 0x505   : > { %2137 = vperm.xlu0 %2740, %v4226_v3  }
 0x506   : > { %v2142_v40 = vpop.permute.xlu1 %2141 }
 0x509   : > { %2744 = vset.pattern.permute.xlu0 %v4692_v5 }
 0x50a   : > { %1889 = vperm.xlu0 %2744, %v4032_v7   ;;  %v2146_v1 = vpop.permute.xlu1 %2145 }
 0x50e   : > { %1897 = vperm.xlu0 %2744, %v3692_v47   ;;  %v2150_v4 = vpop.permute.xlu1 %2149 }
 0x512   : > { %1901 = vperm.xlu0 %2744, %v4039_v28  }
 0x513   : > { %v2262_v41 = vpop.permute.xlu1 %2261 }
 0x516   : > { %2037 = vperm.xlu0 %2744, %v4146_v49   ;;  %v4736_v49 = vld [vmem:[#allocation25_spill] sm:$0xff] }
 0x518   : > { %v4235_v35 = vpop.permute.xlu1 %2734 }
 0x51a   : > { %2045 = vperm.xlu0 %2744, %v4160_v29   ;;  %v4737_v29 = vld [vmem:[#allocation23_spill] sm:$0xff] }
 0x51d   : > { %v4238_v32 = vpop.permute.xlu1 %2189 }
 0x51e   : > { %2181 = vperm.xlu0 %2744, %v4169_v6  }
 0x522   : > { %2185 = vperm.xlu0 %2744, %v4174_v60   ;;  %v1972_v47 = vpop.permute.xlu1 %1971  ;;  %v4740_v60 = vld [vmem:[#allocation17_spill] sm:$0xff] }
 0x523   : > { %v1985_v5 = vmul.f32 %v1972_v47, %v4732_v22  ;;  %v2002_v47 = vpop.permute.xlu0 %2001 }
 0x526   : > { %2177 = vperm.xlu0 %2744, %v4226_v3   ;;  %v1977_v10 = vpop.permute.xlu1 %1976 }
 0x527   : > { %v4245_v52 = vmul.f32 %v4735_v54, %v1977_v10  ;;  %v4262_v10 = vpop.permute.xlu0 %1434 }
 0x52a   : > { %2752 = vset.pattern.permute.xlu0 %v4724_v11 }
 0x52b   : > { %1054 = vperm.xlu0 %2752, %v4736_v49  }
 0x52f   : > { %1069 = vperm.xlu0 %2752, %v4737_v29  }
 0x533   : > { %1203 = vperm.xlu0 %2752, %v4738_v37  }
 0x537   : > { %1342 = vperm.xlu0 %2752, %v4739_v18   ;;  %v4742_v18 = vld [vmem:[#allocation58_spill] sm:$0xff] }
 0x538   : > { %v2153_v37 = vmul.f32 %v2142_v40, %v4742_v18 }
 0x53b   : > { %1357 = vperm.xlu0 %2752, %v4740_v60  }
 0x53f   : > { %1491 = vperm.xlu0 %2752, %v4741_v24  }
 0x543   : > { %1822 = vperm.xlu0 %2752, %v4032_v7   ;;  %v4743_v7 = vld [vmem:[#allocation53_spill] sm:$0xff] }
 0x544   : > { %v2154_v24 = vmul.f32 %v4743_v7, %v2146_v1  ;;  %v4747_v1 = vld [vmem:[#allocation47_spill] sm:$0xff] }
 0x547   : > { %1837 = vperm.xlu0 %2752, %v4039_v28   ;;  %v4267_v28 = vpop.permute.xlu0 %1538 }
 0x548   : > { %4744 = vst [vmem:[#allocation59_spill] sm:$0xff] %v4267_v28 }
 0x54b   : > { %2115 = vperm.xlu0 %2752, %v4169_v6   ;;  %v4745_v6 = vld [vmem:[#allocation56_spill] sm:$0xff] }
 0x54f   : > { %2125 = vperm.xlu0 %2752, %v4177_v59   ;;  %v2155_v59 = vmul.f32 %v4745_v6, %v2150_v4 }
 0x553   : > { %2018 = vrot.lane.b32.xlu0 %v2009_v61, %s2932_s29  ;;  %v2267_v61 = vmul.f32 %v4730_v9, %v2262_v41 }
 0x557   : > { %2022 = vrot.lane.b32.xlu0 %v2011_v53, %s2932_s29  ;;  %v4272_v53 = vpop.permute.xlu0 %1578 }
 0x558   : > { %4746 = vst [vmem:[#allocation12_spill] sm:$0xff] %v4272_v53 }
 0x55b   : > { %2060 = vrot.lane.b32.xlu0 %v2050_v15, %s2943_s11  ;;  %v4274_v15 = vpop.permute.xlu1 %1981 }
 0x55f   : > { %2162 = vrot.lane.b32.xlu0 %v2153_v37, %s2932_s29 }
 0x563   : > { %2164 = vrot.lane.b32.xlu0 %v2154_v24, %s2932_s29 }
 0x567   : > { %2166 = vrot.lane.b32.xlu0 %v2155_v59, %s2932_s29 }
 0x56b   : > { %2278 = vrot.lane.b32.xlu0 %v2267_v61, %s2932_s29 }
 0x56f   : > { %v1994_v40 = vpop.permute.xlu0 %1993  ;;  %v4277_v49 = vpop.permute.xlu1 %2033 }
 0x570   : > { %v4280_v29 = vmul.f32 %v1994_v40, %v4747_v1 }
 0x573   : > { %v1915_v60 = vpop.permute.xlu1 %1914 }
 0x574   : > { %v1925_v37 = vadd.f32 %v1915_v60, %v4192_v45 }
 0x576   : > { %v4283_v4 = vadd.f32 %v1985_v5, %v1925_v37  ;;  %v4748_v37 = vmov 2  }
 0x577   : > { %v2121_v24 = vpop.permute.xlu1 %2120 }
 0x578   : > { %v4286_v41 = vmul.f32 %v4743_v7, %v2121_v24  ;;  %v4749_v24 = vmov 0  }
 0x584   : > { %v2138_v59 = vpop.permute.xlu0 %2137 }
 0x589   : > { %v1890_v9 = vpop.permute.xlu0 %1889 }
 0x58a   : > { %v4289_v53 = vmul.f32 %v1890_v9, %v4711_v36 }
 0x58d   : > { %v1898_v61 = vpop.permute.xlu0 %1897 }
 0x58e   : > { %v1906_v28 = vmul.f32 %v4712_v31, %v1898_v61 }
 0x590   : > { %1916 = vrot.lane.b32.xlu1 %v1906_v28, %s2943_s11 }
 0x591   : > { %v1902_v40 = vpop.permute.xlu0 %1901 }
 0x592   : > { %v1907_v5 = vmul.f32 %v4715_v48, %v1902_v40  ;;  %v2195_v40 = vmul.f32 %v4745_v6, %v4238_v32 }
 0x594   : > { %2748 = vperm.xlu1 %2746, %v4124_v39   ;;  %v2010_v39 = vmul.f32 %v4735_v54, %v2002_v47 }
 0x595   : > { %v2038_v45 = vpop.permute.xlu0 %2037 }
 0x598   : > { %1918 = vrot.lane.b32.xlu1 %v1907_v5, %s2943_s11  ;;  %v2049_v5 = vmul.f32 %v2038_v45, %v4732_v22 }
 0x599   : > { %v2046_v60 = vpop.permute.xlu0 %2045  ;;  %2753 = vset.pattern.permute.xlu1 %v4748_v37 }
 0x59c   : > { %2289 = vperm.xlu1 %2753, %v4734_v46  }
 0x59d   : > { %v2182_v9 = vpop.permute.xlu0 %2181 }
 0x5a0   : > { %2754 = vset.pattern.permute.xlu1 %v4749_v24 }
 0x5a1   : > { %2241 = vperm.xlu1 %2754, %v4716_v21   ;;  %v2186_v31 = vpop.permute.xlu0 %2185 }
 0x5a2   : > { %v2194_v28 = vmul.f32 %v4743_v7, %v2186_v31  ;;  %v2051_v7 = vmul.f32 %v4733_v26, %v2046_v60 }
 0x5a4   : > { %2204 = vrot.lane.b32.xlu0 %v2194_v28, %s2943_s11 }
 0x5a5   : > { %2020 = vrot.lane.b32.xlu1 %v2010_v39, %s2932_s29  ;;  %v2178_v61 = vpop.permute.xlu0 %2177  ;;  %v4752_v39 = vld [vmem:[#allocation55_spill] sm:$0xff] }
 0x5a6   : > { %2755 = vset.pattern.permute.xlu1 %v4724_v11  ;;  %v4750_v11 = vld [vmem:[#allocation67_spill] sm:$0xff] }
 0x5a7   : > { %v1216_v31 = vmul.f32 %v4750_v11, %v4677_v30  ;;  %v2152_v30 = vmul.f32 %v2138_v59, %v4752_v39 }
 0x5a8   : > { %2206 = vrot.lane.b32.xlu0 %v2195_v40, %s2943_s11 }
 0x5a9   : > { %2058 = vrot.lane.b32.xlu1 %v2049_v5, %s2943_s11 }
 0x5aa   : > { %v1055_v21 = vpop.permute.xlu0 %1054 }
 0x5ab   : > { %v1072_v54 = vmul.f32 %v1055_v21, %v4676_v34  ;;  %v4751_v34 = vld [vmem:[#allocation15_spill] sm:$0xff] }
 0x5ac   : > { %1966 = vperm.xlu0 %2752, %v4212_v55  }
 0x5ad   : > { %v1116_v47 = vadd.f32 %v4066_v8, %v1072_v54  ;;  %2062 = vrot.lane.b32.xlu1 %v2051_v7, %s2943_s11  ;;  %v1219_v8 = vmul.f32 %v4680_v12, %v4751_v34  ;;  %v2193_v12 = vmul.f32 %v2182_v9, %v4742_v18 }
 0x5ae   : > { %v1070_v32 = vpop.permute.xlu0 %1069 }
 0x5af   : > { %v1156_v22 = vadd.f32 %v4082_v19, %v1116_v47  ;;  %v1075_v45 = vmul.f32 %v4679_v13, %v1070_v32 }
 0x5b0   : > { %2756 = vset.pattern.permute.xlu0 %v4749_v24 }
 0x5b1   : > { %v1220_v28 = vadd.f32 %v1216_v31, %v1156_v22  ;;  %v1119_v60 = vadd.f32 %v4100_v51, %v1075_v45  ;;  %2274 = vrot.lane.b32.xlu1 %v4206_v20, %s2932_s29  ;;  %2226 = vperm.xlu0 %2756, %v4734_v46   ;;  %v2736_v20 = vunpack.i.l.bf16 %v4235_v35  ;;  %v2192_v46 = vmul.f32 %v2178_v61, %v4752_v39  ;;  %v4756_v22 = vld [vmem:[#allocation34_spill] sm:$0xff] }
 0x5b2   : > { %v1204_v55 = vpop.permute.xlu0 %1203 }
 0x5b3   : > { %v1159_v19 = vadd.f32 %v4080_v23, %v1119_v60  ;;  %v1217_v13 = vmul.f32 %v1204_v55, %v4685_v33  ;;  %v1260_v24 = vadd.f32 %v4086_v17, %v1220_v28  ;;  %v4757_v28 = vld [vmem:[#allocation22_spill] sm:$0xff] }
 0x5b5   : > { %v1223_v40 = vadd.f32 %v1219_v8, %v1159_v19  ;;  %v1221_v51 = vadd.f32 %v1217_v13, %v4110_v62  ;;  %2276 = vrot.lane.b32.xlu1 %v4203_v16, %s2932_s29  ;;  %2160 = vrot.lane.b32.xlu0 %v2152_v30, %s2932_s29  ;;  %v1300_v23 = vadd.f32 %v4068_v43, %v1260_v24  ;;  %v4753_v16 = vld [vmem:[#allocation19_spill] sm:$0xff]  ;;  %v4760_v19 = vld [vmem:[#allocation10_spill] sm:$0xff]  ;;  %v2250_v13 = vpop.permute.xlu1 %2249 }
 0x5b6   : > { %v1343_v59 = vpop.permute.xlu0 %1342  ;;  %2757 = vset.pattern.permute.xlu0 %v4748_v37  ;;  %v1361_v5 = vmul.f32 %v4753_v16, %v4687_v57  ;;  %v2737_v37 = vunpack.i.h.bf16 %v4235_v35  ;;  %v4754_v57 = vld [vmem:[#allocation21_spill] sm:$0xff]  ;;  %v4761_v24 = vld [vmem:[#allocation30_spill] sm:$0xff] }
 0x5b7   : > { %v1261_v33 = vadd.f32 %v4102_v44, %v1221_v51  ;;  %v1360_v62 = vmul.f32 %v1343_v59, %v4678_v2  ;;  %v1263_v17 = vadd.f32 %v4084_v56, %v1223_v40  ;;  %v2305_v44 = vmul.f32 %v2736_v20, %v4729_v0  ;;  %v4762_v20 = vld [vmem:[#allocation43_spill] sm:$0xff] }
 0x5b8   : > { %v2306_v32 = vmul.f32 %v2737_v37, %v4728_v50 }
 0x5b9   : > { %v1301_v21 = vadd.f32 %v4112_v63, %v1261_v33  ;;  %v1364_v7 = vadd.f32 %v1360_v62, %v1300_v23  ;;  %2202 = vrot.lane.b32.xlu1 %v2193_v12, %s2943_s11  ;;  %2200 = vrot.lane.b32.xlu0 %v2192_v46, %s2943_s11  ;;  %v1303_v2 = vadd.f32 %v4104_v14, %v1263_v17 }
 0x5ba   : > { %v1358_v9 = vpop.permute.xlu0 %1357  ;;  %v1504_v63 = vmul.f32 %v4754_v57, %v4681_v38  ;;  %v4758_v38 = vld [vmem:[#allocation32_spill] sm:$0xff]  ;;  %v1987_v17 = vmul.f32 %v4733_v26, %v4274_v15 }
 0x5bb   : > { %v1404_v43 = vadd.f32 %v4076_v58, %v1364_v7  ;;  %v1363_v56 = vmul.f32 %v4682_v27, %v1358_v9  ;;  %v1365_v61 = vadd.f32 %v1361_v5, %v1301_v21  ;;  %v4755_v58 = vld [vmem:[#allocation31_spill] sm:$0xff]  ;;  %v1507_v60 = vmul.f32 %v4758_v38, %v4757_v28 }
 0x5bc   : > { %v4766_v28 = vld [vmem:[#allocation59_spill] sm:$0xff] }
 0x5bd   : > { %v1444_v54 = vadd.f32 %v4090_v25, %v1404_v43  ;;  %v1367_v47 = vadd.f32 %v1363_v56, %v1303_v2  ;;  %2314 = vrot.lane.b32.xlu1 %v2305_v44, %s2943_s11  ;;  %v1405_v35 = vadd.f32 %v4114_v42, %v1365_v61  ;;  %v4759_v25 = vld [vmem:[#allocation38_spill] sm:$0xff] }
 0x5be   : > { %v1492_v11 = vpop.permute.xlu0 %1491 }
 0x5bf   : > { %v4358_v31 = vadd.f32 %v1504_v63, %v1444_v54  ;;  %v1407_v14 = vadd.f32 %v4755_v58, %v1367_v47  ;;  %v1445_v27 = vadd.f32 %v4262_v10, %v1405_v35  ;;  %v1505_v45 = vmul.f32 %v1492_v11, %v4756_v22 }
 0x5c0   : > { %v2048_v10 = vmul.f32 %v4277_v49, %v4747_v1  ;;  %v4763_v49 = vld [vmem:[#allocation50_spill] sm:$0xff] }
 0x5c1   : > { %v1447_v34 = vadd.f32 %v4759_v25, %v1407_v14  ;;  %v1509_v8 = vadd.f32 %v1505_v45, %v1445_v27  ;;  %2316 = vrot.lane.b32.xlu1 %v2306_v32, %s2943_s11  ;;  %v4764_v27 = vld [vmem:[#allocation36_spill] sm:$0xff] }
 0x5c2   : > { %v1823_v42 = vpop.permute.xlu0 %1822  ;;  %2840 = vrcp.f32 %v4764_v27  ;;  %v4769_v25 = vld [vmem:[#allocation52_spill] sm:$0xff] }
 0x5c3   : > { %v4367_v55 = vadd.f32 %v1507_v60, %v1447_v34  ;;  %v4370_v30 = vmul.f32 %v1823_v42, %v4711_v36  ;;  %v2264_v36 = vmul.f32 %v2250_v13, %v4761_v24  ;;  %v4768_v60 = vld [vmem:[#allocation68_spill] sm:$0xff] }
 0x5c4   : > { %v4770_v34 = vld [vmem:[#allocation44_spill] sm:$0xff] }
 0x5c5   : > { %2318 = vrot.lane.b32.xlu1 %v4760_v19, %s2943_s11  ;;  %v1550_v42 = vadd.f32 %v4770_v34, %v4769_v25 }
 0x5c6   : > { %v1838_v40 = vpop.permute.xlu0 %1837 }
 0x5c9   : > { %2110 = vperm.xlu1 %2755, %v4226_v3  }
 0x5cd   : > { %1912 = vrot.lane.b32.xlu1 %v4289_v53, %s2943_s11  ;;  %v2116_v53 = vpop.permute.xlu0 %2115 }
 0x5ce   : > { %v2129_v57 = vmul.f32 %v2116_v53, %v4742_v18  ;;  %v1549_v18 = vadd.f32 %v4766_v28, %v1509_v8  ;;  %v2841_v53 = vpop.eup %2840 }
 0x5d1   : > { %2016 = vrot.lane.b32.xlu1 %v4280_v29, %s2932_s29  ;;  %v2126_v46 = vpop.permute.xlu0 %2125  ;;  %v1843_v29 = vmul.f32 %v4715_v48, %v1838_v40  ;;  %v4771_v40 = vld [vmem:[#allocation12_spill] sm:$0xff] }
 0x5d2   : > { %v2131_v32 = vmul.f32 %v4745_v6, %v2126_v46  ;;  %v4773_v46 = vld [vmem:[#allocation61_spill] sm:$0xff] }
 0x5d3   : > { %v1887_v23 = vadd.f32 %v4763_v49, %v1843_v29  ;;  %v4774_v29 = vld [vmem:[#allocation29_spill] sm:$0xff] }
 0x5d5   : > { %2056 = vrot.lane.b32.xlu1 %v2048_v10, %s2943_s11  ;;  %v2019_v33 = vpop.permute.xlu0 %2018 }
 0x5d6   : > { %v2029_v2 = vadd.f32 %v2019_v33, %v4283_v4  ;;  %v4765_v4 = vld [vmem:[#allocation18_spill] sm:$0xff]  ;;  %v1590_v33 = vadd.f32 %v4774_v29, %v1550_v42 }
 0x5d7   : > { %2842 = vrcp.f32 %v4765_v4 }
 0x5d9   : > { %2272 = vrot.lane.b32.xlu1 %v2264_v36, %s2932_s29  ;;  %v2023_v5 = vpop.permute.xlu0 %2022 }
 0x602   : > { %v1917_v51 = vpop.permute.xlu1 %1916 }
 0x603   : > { %v1926_v3 = vadd.f32 %v1917_v51, %v4762_v20  ;;  %v1589_v51 = vadd.f32 %v4771_v40, %v1549_v18  ;;  %v4772_v20 = vld [vmem:[#allocation26_spill] sm:$0xff] }
 0x605   : > { %v1990_v12 = vadd.f32 %v4245_v52, %v1926_v3  ;;  %v2061_v52 = vpop.permute.xlu0 %2060 }
 0x609   : > { %v2163_v43 = vpop.permute.xlu0 %2162 }
 0x60d   : > { %v2165_v47 = vpop.permute.xlu0 %2164 }
 0x611   : > { %v2167_v22 = vpop.permute.xlu0 %2166 }
 0x613   : > { %v2749_v59 = vpop.permute.xlu1 %2748 }
 0x614   : > { %v2750_v38 = vunpack.i.l.bf16 %v2749_v59  ;;  %v2751_v10 = vunpack.i.h.bf16 %v2749_v59  ;;  %v1597_v59 = vmul.f32 %v2841_v53, %v1589_v51 }
 0x615   : > { %v2279_v6 = vpop.permute.xlu0 %2278 }
 0x616   : > { %v2245_v13 = vmul.f32 %v2750_v38, %v4729_v0  ;;  %v4775_v0 = vld [vmem:[#allocation46_spill] sm:$0xff] }
 0x617   : > { %v1919_v62 = vpop.permute.xlu1 %1918 }
 0x618   : > { %v1927_v16 = vadd.f32 %v1919_v62, %v1887_v23  ;;  %v2246_v62 = vmul.f32 %v2751_v10, %v4728_v50 }
 0x619   : > { %v2205_v49 = vpop.permute.xlu0 %2204 }
 0x61a   : > { %v1991_v21 = vadd.f32 %v1987_v17, %v1927_v16  ;;  %v1551_v16 = vadd.f32 %v4775_v0, %v4367_v55 }
 0x61b   : > { %v2290_v7 = vpop.permute.xlu1 %2289 }
 0x61c   : > { %v2304_v37 = vmul.f32 %v2290_v7, %v4761_v24  ;;  %v2031_v54 = vadd.f32 %v2023_v5, %v1991_v21  ;;  %v2843_v5 = vpop.eup %2842  ;;  %v4776_v21 = vld [vmem:[#allocation33_spill] sm:$0xff] }
 0x61e   : > { %2312 = vrot.lane.b32.xlu1 %v2304_v37, %s2943_s11 }
 0x620   : > { %v2242_v44 = vpop.permute.xlu1 %2241 }
 0x621   : > { %v2247_v7 = vmul.f32 %v4776_v21, %v2242_v44 }
 0x624   : > { %v2021_v9 = vpop.permute.xlu1 %2020 }
 0x625   : > { %v2030_v48 = vadd.f32 %v2021_v9, %v1990_v12 }
 0x627   : > { %v2070_v56 = vadd.f32 %v2061_v52, %v2030_v48 }
 0x628   : > { %v2059_v61 = vpop.permute.xlu1 %2058 }
 0x629   : > { %v2134_v26 = vadd.f32 %v4286_v41, %v2070_v56  ;;  %v2069_v15 = vadd.f32 %v2059_v61, %v2029_v2  ;;  %v4767_v41 = vld [vmem:[#allocation14_spill] sm:$0xff] }
 0x62a   : > { %2844 = vrcp.f32 %v4767_v41 }
 0x62b   : > { %v2133_v63 = vadd.f32 %v2129_v57, %v2069_v15  ;;  %2846 = vrcp.f32 %v4768_v60  ;;  %v2174_v3 = vadd.f32 %v2165_v47, %v2134_v26  ;;  %v4777_v15 = vld [vmem:[#allocation41_spill] sm:$0xff]  ;;  %v2287_v47 = vadd.f32 %v2279_v6, %v2247_v7 }
 0x62c   : > { %v2063_v35 = vpop.permute.xlu1 %2062  ;;  %2848 = vrcp.f32 %v4772_v20  ;;  %v1591_v50 = vadd.f32 %v4777_v15, %v1551_v16 }
 0x62d   : > { %v2071_v11 = vadd.f32 %v2063_v35, %v2031_v54  ;;  %v2173_v36 = vadd.f32 %v2163_v43, %v2133_v63  ;;  %2850 = vrcp.f32 %v4773_v46  ;;  %v2214_v37 = vadd.f32 %v2205_v49, %v2174_v3  ;;  %v2207_v54 = vpop.permute.xlu0 %2206 }
 0x62f   : > { %v2135_v58 = vadd.f32 %v2131_v32, %v2071_v11 }
 0x630   : > { %v2275_v14 = vpop.permute.xlu1 %2274 }
 0x631   : > { %v2285_v8 = vadd.f32 %v2275_v14, %v2245_v13  ;;  %v2175_v52 = vadd.f32 %v2167_v22, %v2135_v58  ;;  %v1967_v6 = vpop.permute.xlu0 %1966 }
 0x632   : > { %v1984_v3 = vmul.f32 %v1967_v6, %v4747_v1 }
 0x633   : > { %v2215_v35 = vadd.f32 %v2207_v54, %v2175_v52  ;;  %v4779_v54 = vld [vmem:[#allocation20_spill] sm:$0xff] }
 0x634   : > { %v2277_v45 = vpop.permute.xlu1 %2276  ;;  %v2845_v2 = vpop.eup %2844 }
 0x635   : > { %v2286_v9 = vadd.f32 %v2277_v45, %v2246_v62  ;;  %v1598_v61 = vmul.f32 %v2845_v2, %v1590_v33  ;;  %v2847_v63 = vpop.eup %2846 }
 0x636   : > { %v2222_v32 = vmul.f32 %v2847_v63, %v2214_v37  ;;  %v2849_v44 = vpop.eup %2848 }
 0x637   : > { %v1599_v27 = vmul.f32 %v2849_v44, %v1591_v50  ;;  %v2851_v45 = vpop.eup %2850 }
 0x638   : > { %v2203_v19 = vpop.permute.xlu1 %2202  ;;  %v2223_v38 = vmul.f32 %v2851_v45, %v2215_v35 }
 0x639   : > { %v2213_v12 = vadd.f32 %v2203_v19, %v2173_v36  ;;  %v4778_v36 = vld [vmem:[#allocation57_spill] sm:$0xff] }
 0x63a   : > { %v1884_v40 = vadd.f32 %v4778_v36, %v4370_v30 }
 0x63b   : > { %v2221_v48 = vmul.f32 %v2843_v5, %v2213_v12 }
 0x63c   : > { %v2315_v23 = vpop.permute.xlu1 %2314 }
 0x63d   : > { %v2325_v17 = vadd.f32 %v2315_v23, %v2285_v8 }
 0x63f   : > { %v2329_v43 = vadd.f32 %v2325_v17, %v1597_v59 }
 0x640   : > { %v2317_v56 = vpop.permute.xlu1 %2316 }
 0x641   : > { %v2333_v57 = vadd.f32 %v2329_v43, %v2221_v48  ;;  %v2326_v26 = vadd.f32 %v2317_v56, %v2286_v9 }
 0x643   : > { %v2337_v55 = vmin.f32 %v2333_v57, 0.0  ;;  %v2330_v11 = vadd.f32 %v2326_v26, %v1598_v61  ;;  %vm2381_vm5 = vcmp.gt.f32.partialorder %v2333_v57, 0.0 }
 0x644   : > { %v2319_v14 = vpop.permute.xlu1 %2318 }
 0x645   : > { %v2334_v58 = vadd.f32 %v2330_v11, %v2222_v32  ;;  %v2327_v22 = vadd.f32 %v2319_v14, %v2287_v47  ;;  %v2346_v4 = vmul.f32 1.442695, %v2337_v55  ;;  %v2357_v28 = vmul.f32 0.16666667, %v2337_v55  ;;  %v4780_v47 = vld [vmem:[#allocation27_spill] sm:$0xff] }
 0x646   : > { %vm2341_vm4 = vcmp.lt.f32.partialorder %v2337_v55, -0.001 }
 0x647   : > { %v2338_v18 = vmin.f32 %v2334_v58, 0.0  ;;  %v2331_v41 = vadd.f32 %v2327_v22, %v1599_v27  ;;  %2852 = vpow2.f32 %v2346_v4  ;;  %v2361_v25 = vadd.f32 0.5, %v2357_v28 }
 0x648   : > { %v2111_v60 = vpop.permute.xlu1 %2110  ;;  %vm2382_vm7 = vcmp.gt.f32.partialorder %v2334_v58, 0.0 }
 0x649   : > { %v2335_v34 = vadd.f32 %v2331_v41, %v2223_v38  ;;  %v2348_v42 = vmul.f32 1.442695, %v2338_v18  ;;  %v2365_v19 = vmul.f32 %v2361_v25, %v2337_v55  ;;  %v2358_v10 = vmul.f32 0.16666667, %v2338_v18 }
 0x64a   : > { %v2128_v7 = vmul.f32 %v2111_v60, %v4752_v39  ;;  %vm2342_vm6 = vcmp.lt.f32.partialorder %v2338_v18, -0.001 }
 0x64b   : > { %v2339_v13 = vmin.f32 %v2335_v34, 0.0  ;;  %2854 = vpow2.f32 %v2348_v42  ;;  %v2362_v20 = vadd.f32 0.5, %v2358_v10  ;;  %v2369_v46 = vadd.f32 1.0, %v2365_v19 }
 0x64c   : > { %v1913_v51 = vpop.permute.xlu1 %1912  ;;  %vm2383_vm9 = vcmp.gt.f32.partialorder %v2335_v34, 0.0 }
 0x64d   : > { %v1924_v8 = vadd.f32 %v1913_v51, %v1884_v40  ;;  %v2350_v12 = vmul.f32 1.442695, %v2339_v13  ;;  %v2359_v53 = vmul.f32 0.16666667, %v2339_v13  ;;  %v2366_v29 = vmul.f32 %v2362_v20, %v2338_v18 }
 0x64e   : > { %v2373_v17 = vmul.f32 %v2369_v46, %v2337_v55  ;;  %vm2343_vm8 = vcmp.lt.f32.partialorder %v2339_v13, -0.001  ;;  %v4781_v55 = vld [vmem:[#allocation54_spill] sm:$0xff] }
 0x64f   : > { %v1988_v33 = vadd.f32 %v1984_v3, %v1924_v8  ;;  %2856 = vpow2.f32 %v2350_v12  ;;  %v2363_v49 = vadd.f32 0.5, %v2359_v53  ;;  %v2370_v0 = vadd.f32 1.0, %v2366_v29 }
 0x650   : > { %v2017_v23 = vpop.permute.xlu1 %2016  ;;  %2858 = vrcp.f32 %v4779_v54  ;;  %v1548_v32 = vadd.f32 %v4781_v55, %v4358_v31 }
 0x651   : > { %v2853_v62 = vpop.eup %2852  ;;  %v2367_v16 = vmul.f32 %v2363_v49, %v2339_v13  ;;  %v2028_v30 = vadd.f32 %v2017_v23, %v1988_v33  ;;  %v2374_v48 = vmul.f32 %v2370_v0, %v2338_v18  ;;  %2860 = vrcp.f32 %v4780_v47 }
 0x652   : > { %v2544_v59 = vadd.f32 -1.0, %v2853_v62 }
 0x653   : > { %v2371_v43 = vadd.f32 1.0, %v2367_v16 }
 0x654   : > { %v2057_v5 = vpop.permute.xlu1 %2056  ;;  %v2377_v21 = vsel %vm2341_vm4, %v2544_v59, %v2373_v17 }
 0x655   : > { %v2855_v1 = vpop.eup %2854  ;;  %v2068_v37 = vadd.f32 %v2057_v5, %v2028_v30  ;;  %v2385_v52 = vsel %vm2381_vm5, %v2333_v57, %v2377_v21  ;;  %v2375_v50 = vmul.f32 %v2371_v43, %v2339_v13  ;;  %v2227_v57 = vpop.permute.xlu0 %2226 }
 0x656   : > { %2390 = vrot.lane.b32.xlu0 %v2385_v52, %s2947_s17  ;;  %v2545_v9 = vadd.f32 -1.0, %v2855_v1  ;;  %v2244_v14 = vmul.f32 %v2227_v57, %v4761_v24 }
 0x657   : > { %v2132_v2 = vadd.f32 %v2128_v7, %v2068_v37 }
 0x658   : > { %v2378_v56 = vsel %vm2342_vm6, %v2545_v9, %v2374_v48  ;;  %v2273_v44 = vpop.permute.xlu1 %2272 }
 0x659   : > { %v2857_v61 = vpop.eup %2856  ;;  %v2386_v26 = vsel %vm2382_vm7, %v2334_v58, %v2378_v56  ;;  %v2161_v35 = vpop.permute.xlu0 %2160  ;;  %v4782_v58 = vld [vmem:[#allocation48_spill] sm:$0xff]  ;;  %v2284_v45 = vadd.f32 %v2273_v44, %v2244_v14 }
 0x65a   : > { %2396 = vrot.lane.b32.xlu1 %v2386_v26, %s2943_s11  ;;  %v2546_v15 = vadd.f32 -1.0, %v2857_v61  ;;  %v2172_v11 = vadd.f32 %v2161_v35, %v2132_v2  ;;  %v1588_v27 = vadd.f32 %v4782_v58, %v1548_v32  ;;  %v2859_v28 = vpop.eup %2858 }
 0x65b   : > { %v2861_v60 = vpop.eup %2860 }
 0x65c   : > { %v2379_v63 = vsel %vm2343_vm8, %v2546_v15, %v2375_v50  ;;  %v1596_v38 = vmul.f32 %v2859_v28, %v1588_v27 }
 0x65d   : > { %v2387_v39 = vsel %vm2383_vm9, %v2335_v34, %v2379_v63  ;;  %v2201_v22 = vpop.permute.xlu0 %2200 }
 0x65e   : > { %2402 = vrot.lane.b32.xlu0 %v2387_v39, %s2932_s29  ;;  %v2212_v4 = vadd.f32 %v2201_v22, %v2172_v11  ;;  %s2408_s29 = scalar_lea.sflag [#allocation4], %s3048_s6 }
 0x660   : > { %v2220_v25 = vmul.f32 %v2861_v60, %v2212_v4 }
 0x690   : > { %v2313_v18 = vpop.permute.xlu1 %2312 }
 0x691   : > { %v2324_v41 = vadd.f32 %v2313_v18, %v2284_v45 }
 0x693   : > { %v2328_v34 = vadd.f32 %v2324_v41, %v1596_v38 }
 0x695   : > { %v2332_v42 = vadd.f32 %v2328_v34, %v2220_v25 }
 0x697   : > { %v2336_v6 = vmin.f32 %v2332_v42, 0.0  ;;  %vm2380_vm11 = vcmp.gt.f32.partialorder %v2332_v42, 0.0 }
 0x699   : > { %v2344_v31 = vmul.f32 1.442695, %v2336_v6  ;;  %v2356_v19 = vmul.f32 0.16666667, %v2336_v6  ;;  %vm2340_vm10 = vcmp.lt.f32.partialorder %v2336_v6, -0.001 }
 0x69b   : > { %2862 = vpow2.f32 %v2344_v31  ;;  %v2360_v10 = vadd.f32 0.5, %v2356_v19 }
 0x69d   : > { %v2364_v24 = vmul.f32 %v2360_v10, %v2336_v6 }
 0x69f   : > { %v2368_v13 = vadd.f32 1.0, %v2364_v24 }
 0x6a1   : > { %v2372_v51 = vmul.f32 %v2368_v13, %v2336_v6 }
 0x6a5   : > { %v2863_v36 = vpop.eup %2862 }
 0x6a6   : > { %v2543_v40 = vadd.f32 -1.0, %v2863_v36 }
 0x6a8   : > { %v2376_v20 = vsel %vm2340_vm10, %v2543_v40, %v2372_v51 }
 0x6a9   : > { %v2384_v3 = vsel %vm2380_vm11, %v2332_v42, %v2376_v20 }
 0x6aa   : > { %2388 = vst.msk [vmem:[%s350_s20] sm:$0xff] %vm487_vm0, %v2384_v3 }
 0x6c8   : > { %v2391_v8 = vpop.permute.xlu0 %2390 }
 0x6c9   : > { %2394 = vst.msk [vmem:[%s350_s20] sm:$0xff] %vm2393_vm12, %v2391_v8 }
 0x6cc   : > { %v2397_v12 = vpop.permute.xlu1 %2396 }
 0x6cd   : > { %2400 = vst.msk [vmem:[%s350_s20] sm:$0xff] %vm2399_vm13, %v2397_v12 }
 0x6d0   : > { %v2403_v53 = vpop.permute.xlu0 %2402 }
 0x6d1   : > { %2406 = vst.msk [vmem:[%s350_s20] sm:$0xff] %vm2405_vm14, %v2403_v53 }
 0x6d2   : > { %2877 = shalt.err (!%p2874_p7)
}
 0x6d3   : > { %s2878_s6 = scalar_lea.hbm %s4431_s28, 128  ;;  %s2882_s9 = scalar_lea.hbm %s4478_s3, 256 }
 0x6d4   : > { %p2879_p10 = scmp.ne.s32.totalorder %s4431_s28, %s2878_s6  ;;  %p2883_p13 = scmp.lt.u32.totalorder %s4431_s28, %s4478_s3 }
 0x6d5   : > { %p2884_p0 = scmp.lt.u32.totalorder %s2882_s9, %s2878_s6  ;;  %p2886_p2 = scmp.lt.u32.totalorder %s2878_s6, %s4431_s28 }
 0x6d6   : > { %p2880_p11 = pnand %p2879_p10, %p3008_p6 }
 0x6d7   : > { %p2885_p1 = por %p2884_p0, %p2883_p13 }
 0x6d8   : > { %p2881_p12 = pneg %p2880_p11 }
 0x6d9   : > { %p2887_p3 = por %p2886_p2, %p2885_p1 }
 0x6db   : > { %p2888_p4 = pnand %p2887_p3, %p2881_p12 }
 0x6dd   : > { %2891 = shalt.err (!%p2888_p4)
}
 0x6de   : > { %2619 = dma.vmem_to_hbm [thread:$0]  (%p3008_p6), %s4433_s25, 128, %s4431_s28, %s2408_s29  }
 0x6df PF: > { %s2433_s17 = sand.u32 1, %s2914_s12   ;;  %p2622_p5 = pnand %p2500_p9, %p3012_p8 }
 0x6e0   : > { %s2434_s19 = scalar_lea.sflag [#allocation4], %s2433_s17 }
 0x6e1   : > { %2909 = dma.done.wait (!%p2622_p5), %s2434_s19, 128  }
 0x6e2   : > { %2911 = vsyncadd (!%p2622_p5), %s2434_s19, 4294967168  ;;  %p13_p7 = scmp.ge.s32.totalorder %s2994_s18, 4   ;;  %s4783_s12 = smov %s2918_s13 }
 0x6e3   : > { %s4784_s13 = smov %s2922_s14  ;;  %s4785_s14 = smov %s3006_s21 }
 0x6e4   : > { %s4786_s15 = smov %s2994_s18  ;;  %15 = sbr.rel (!%p13_p7) target bundleno = 3 (0x3), region = 116 }
 0x6eb   :  { %2439 = vsyncpa [#allocation4], 1 }
 0x6ec   :  { %2441 = vsyncpa [#allocation4 + $0x1], 1 }

</bundles_post_ra>
